<compile_context>
chip_gen: v6e
topology: v6e:2x2x1
jax: 0.10.0
libtpu: 0.0.40
codegen_flags: <defaults>
</compile_context>

<pallas_src>
import jax
import jax.numpy as jnp
from jax.experimental import pallas as pl
from jax.experimental.pallas import tpu as pltpu

BN_EPS = 1e-5
LANE = 128
VMEM_LIMIT_BYTES = 32 * 1024 * 1024  # safe on v5e/v6e/v7x (v7x: 64 MiB physical VMEM)


def _round_up(x, m):
    return (x + m - 1) // m * m


# ---------------------------------------------------------------------------
# Kernel 1: 3x3 conv (3 shifted MXU matmuls over an H-expanded input tile)
#           + per-channel sum / sum-of-squares accumulation for BatchNorm.
# ---------------------------------------------------------------------------
def conv_stats_kernel(x_ref, w_ref, y_ref, ssum_ref, ssq_ref):
    # x_ref   : (TBR, W+2, 3*Cin)   bf16  H-expanded, W-padded input rows
    # w_ref   : (3, 3*Cin, Coutp)   bf16  per-kx flattened weights (resident)
    # y_ref   : (TBR*W, Coutp)      f32   pre-BN conv output tile
    # ssum_ref: (1, Coutp)          f32   accumulated across the whole grid
    # ssq_ref : (1, Coutp)          f32   accumulated across the whole grid
    tbr, wp, kdim = x_ref.shape
    w_out = wp - 2
    coutp = y_ref.shape[-1]

    x = x_ref[...]
    acc = jnp.zeros((tbr * w_out, coutp), jnp.float32)
    for kx in range(3):  # static unroll: 3 shifted matmuls == 3x3 conv
        xs = x[:, kx:kx + w_out, :].reshape(tbr * w_out, kdim)
        acc = acc + jnp.dot(xs, w_ref[kx], preferred_element_type=jnp.float32)
    y_ref[...] = acc

    @pl.when(pl.program_id(0) == 0)
    def _():
        ssum_ref[...] = jnp.zeros_like(ssum_ref)
        ssq_ref[...] = jnp.zeros_like(ssq_ref)

    ssum_ref[...] += jnp.sum(acc, axis=0, keepdims=True)
    ssq_ref[...] += jnp.sum(acc * acc, axis=0, keepdims=True)


# ---------------------------------------------------------------------------
# Kernel 2: BatchNorm apply (y * scale + shift) + ReLU, lane-dense stores.
# ---------------------------------------------------------------------------
def bn_relu_kernel(y_ref, scale_ref, shift_ref, o_ref):
    y = y_ref[...]
    out = y * scale_ref[...] + shift_ref[...]      # (R, C) * (1, C) broadcast
    o_ref[...] = jnp.maximum(out, 0.0).astype(o_ref.dtype)


def _pick_row_tile(nh, w, wp, kdim, coutp):
    """Image rows (of N*H) per grid step: largest divisor of nh whose
    double-buffered tiles stay under ~10 MiB and ~2k output pixels."""
    budget = 10 * 1024 * 1024
    eligible = []
    for cand in range(1, nh + 1):
        if nh % cand:
            continue
        pixels = cand * w
        if pixels > 2048:
            continue
        tile_bytes = 2 * (cand * wp * kdim * 2      # bf16 input tile, 2 buffers
                          + pixels * coutp * 4)     # f32 output tile, 2 buffers
        if tile_bytes > budget:
            continue
        eligible.append(cand)
    if not eligible:
        return 1
    aligned = [c for c in eligible if (c * w) % 8 == 0] or eligible
    best = max(aligned)
    # keep >= 2 grid steps when possible so the pipeline and the cross-tile BN
    # accumulation are exercised (and kernel 2 can shard across v7x's 2 TCs).
    if best == nh and nh > 1:
        smaller = ([c for c in aligned if c < nh]
                   or [c for c in eligible if c < nh])
        if smaller:
            best = max(smaller)
    return best


def _conv_bn_relu_layer(x_nhwc, w_hwio, gamma, beta, *, out_dtype):
    """One (Conv3x3 pad=1 -> BatchNorm(batch stats) -> ReLU) block."""
    n, h, w, cin = x_nhwc.shape
    cout = w_hwio.shape[-1]
    coutp = _round_up(cout, LANE)
    wp = w + 2
    nh = n * h
    kdim = 3 * cin
    rows = nh * w

    # --- layout glue (JAX): H-expanded, W-padded bf16 input (3x, not 9x) -----
    xp = jnp.pad(x_nhwc.astype(jnp.bfloat16), ((0, 0), (1, 1), (1, 1), (0, 0)))
    xh = jnp.concatenate([xp[:, 0:h], xp[:, 1:h + 1], xp[:, 2:h + 2]], axis=-1)
    xh = xh.reshape(nh, wp, kdim)

    # weights (ky,kx,cin,cout) -> (kx, ky*cin, coutp), zero-padded, bf16
    wk = jnp.transpose(w_hwio, (1, 0, 2, 3)).reshape(3, kdim, cout)
    wk = jnp.pad(wk, ((0, 0), (0, 0), (0, coutp - cout))).astype(jnp.bfloat16)

    tbr = _pick_row_tile(nh, w, wp, kdim, coutp)
    grid = (nh // tbr,)

    # --- pass 1: conv + per-channel sufficient statistics --------------------
    y, ssum, ssq = pl.pallas_call(
        conv_stats_kernel,
        grid=grid,
        in_specs=[
            pl.BlockSpec((tbr, wp, kdim), lambda t: (t, 0, 0)),
            pl.BlockSpec((3, kdim, coutp), lambda t: (0, 0, 0)),   # resident
        ],
        out_specs=(
            pl.BlockSpec((tbr * w, coutp), lambda t: (t, 0)),
            pl.BlockSpec((1, coutp), lambda t: (0, 0)),            # accumulator
            pl.BlockSpec((1, coutp), lambda t: (0, 0)),            # accumulator
        ),
        out_shape=(
            jax.ShapeDtypeStruct((rows, coutp), jnp.float32),
            jax.ShapeDtypeStruct((1, coutp), jnp.float32),
            jax.ShapeDtypeStruct((1, coutp), jnp.float32),
        ),
        compiler_params=pltpu.CompilerParams(
            dimension_semantics=("arbitrary",),   # stats accumulate serially
            vmem_limit_bytes=VMEM_LIMIT_BYTES),
    )(xh, wk)

    # --- fold batch stats into a per-channel affine (tiny (1, Coutp) math) ---
    count = float(rows)
    mean = ssum / count
    var = ssq / count - mean * mean        # padded channels stay exactly 0
    gp = jnp.pad(gamma.reshape(1, cout), ((0, 0), (0, coutp - cout)))
    bp = jnp.pad(beta.reshape(1, cout), ((0, 0), (0, coutp - cout)))
    scale = gp * jax.lax.rsqrt(var + BN_EPS)
    shift = bp - mean * scale
    # NOTE: the Conv2d bias is intentionally absent here: a per-channel constant
    # added before training-mode BN cancels exactly in (y - mean).

    # --- pass 2: normalize + ReLU (parallel over row tiles) ------------------
    out = pl.pallas_call(
        bn_relu_kernel,
        grid=grid,
        in_specs=[
            pl.BlockSpec((tbr * w, coutp), lambda t: (t, 0)),
            pl.BlockSpec((1, coutp), lambda t: (0, 0)),            # resident
            pl.BlockSpec((1, coutp), lambda t: (0, 0)),            # resident
        ],
        out_specs=pl.BlockSpec((tbr * w, coutp), lambda t: (t, 0)),
        out_shape=jax.ShapeDtypeStruct((rows, coutp), out_dtype),
        compiler_params=pltpu.CompilerParams(
            dimension_semantics=("parallel",),    # shards across v7x's 2 TCs
            vmem_limit_bytes=VMEM_LIMIT_BYTES),
    )(y, scale, shift)

    return out.reshape(n, h, w, coutp)[..., :cout]


@jax.jit
def inconv_forward(x_nchw, params):
    """Forward pass of inconv (double_conv) on an NCHW input."""
    x = jnp.transpose(x_nchw, (0, 2, 3, 1))  # NCHW -> NHWC
    # TODO(synk): the remaining 3x H-expanded HBM stream could be cut to 1x with a
    # manual halo DMA (memory_space=pl.ANY + make_async_copy) inside kernel 1.
    y1 = _conv_bn_relu_layer(x, params["w1"], params["g1"], params["beta1"],
                             out_dtype=jnp.bfloat16)   # bf16 feed to next conv
    y2 = _conv_bn_relu_layer(y1, params["w2"], params["g2"], params["beta2"],
                             out_dtype=jnp.float32)
    return jnp.transpose(y2, (0, 3, 1, 2))  # NHWC -> NCHW


def init_params(key, in_ch, out_ch):
    ks = jax.random.split(key, 8)
    s1 = 1.0 / jnp.sqrt(9.0 * in_ch)
    s2 = 1.0 / jnp.sqrt(9.0 * out_ch)
    return {
        # conv weights stored as (kh, kw, Cin, Cout) == HWIO
        "w1": jax.random.normal(ks[0], (3, 3, in_ch, out_ch), jnp.float32) * s1,
        "b1": jax.random.normal(ks[1], (1, out_ch), jnp.float32) * 0.1,
        "g1": 1.0 + 0.1 * jax.random.normal(ks[2], (1, out_ch), jnp.float32),
        "beta1": 0.1 * jax.random.normal(ks[3], (1, out_ch), jnp.float32),
        "w2": jax.random.normal(ks[4], (3, 3, out_ch, out_ch), jnp.float32) * s2,
        "b2": jax.random.normal(ks[5], (1, out_ch), jnp.float32) * 0.1,
        "g2": 1.0 + 0.1 * jax.random.normal(ks[6], (1, out_ch), jnp.float32),
        "beta2": 0.1 * jax.random.normal(ks[7], (1, out_ch), jnp.float32),
    }


def _reference_forward(x_nchw, params):
    """Pure-JAX reference (lax conv + training-mode BN + ReLU) with the same
    precision policy as the kernel path: bf16 conv inputs, f32 accumulate/BN,
    bf16 inter-layer activation.  Includes the conv bias (which BN cancels)."""
    def conv(x, w, b):
        y = jax.lax.conv_general_dilated(
            x.astype(jnp.bfloat16), w.astype(jnp.bfloat16),
            window_strides=(1, 1), padding="SAME",
            dimension_numbers=("NHWC", "HWIO", "NHWC"),
            preferred_element_type=jnp.float32)
        return y + b.reshape(1, 1, 1, -1)

    def bn_relu(y, g, be):
        m = jnp.mean(y, axis=(0, 1, 2), keepdims=True)
        v = jnp.mean((y - m) ** 2, axis=(0, 1, 2), keepdims=True)
        yn = (y - m) * jax.lax.rsqrt(v + BN_EPS)
        return jnp.maximum(yn * g.reshape(1, 1, 1, -1) + be.reshape(1, 1, 1, -1), 0.0)

    x = jnp.transpose(x_nchw, (0, 2, 3, 1))
    y = bn_relu(conv(x, params["w1"], params["b1"]), params["g1"], params["beta1"])
    y = y.astype(jnp.bfloat16).astype(jnp.float32)   # inter-layer bf16, as in kernels
    y = bn_relu(conv(y, params["w2"], params["b2"]), params["g2"], params["beta2"])
    return jnp.transpose(y, (0, 3, 1, 2))


if __name__ == "__main__":
    N, IN_CH, OUT_CH, H, W = 2, 4, 8, 16, 16

    key = jax.random.PRNGKey(0)
    k_x, k_p = jax.random.split(key)
    x = jax.random.normal(k_x, (N, IN_CH, H, W), jnp.float32)
    params = init_params(k_p, IN_CH, OUT_CH)

    out = jax.block_until_ready(inconv_forward(x, params))
    ref = jax.block_until_ready(_reference_forward(x, params))

    assert out.shape == (N, OUT_CH, H, W)
    assert bool(jnp.all(jnp.isfinite(out)))
    assert jnp.allclose(out, ref, rtol=5e-3, atol=5e-3), (
        "max abs diff vs reference: %f" % float(jnp.max(jnp.abs(out - ref))))

    print("KERNEL_OK")
</pallas_src>

<mosaic_0001>
module attributes {stable_mosaic.version = 11 : i64} {
  func.func @conv_stats_kernel(%arg0: i32, %arg1: memref<16x18x12xbf16, #tpu.memory_space<vmem>>, %arg2: memref<3x12x128xbf16, #tpu.memory_space<vmem>>, %arg3: memref<256x128xf32, #tpu.memory_space<vmem>>, %arg4: memref<1x128xf32, #tpu.memory_space<vmem>>, %arg5: memref<1x128xf32, #tpu.memory_space<vmem>>) attributes {dimension_semantics = [#tpu.dimension_semantics<arbitrary>], iteration_bounds = array<i64: 2>, scalar_prefetch = 0 : i64, scratch_operands = 0 : i64, tpu.core_type = #tpu.core_type<tc>, window_params = [{transform_indices = @transform_0, window_bounds = array<i64: 16, 18, 12>}, {pipeline_mode = #tpu.pipeline_mode<synchronous>, transform_indices = @transform_1, window_bounds = array<i64: 3, 12, 128>}, {transform_indices = @transform_2, window_bounds = array<i64: 256, 128>}, {pipeline_mode = #tpu.pipeline_mode<synchronous>, transform_indices = @transform_3, window_bounds = array<i64: 1, 128>}, {pipeline_mode = #tpu.pipeline_mode<synchronous>, transform_indices = @transform_4, window_bounds = array<i64: 1, 128>}]} {
    %c0 = arith.constant 0 : index
    %c0_0 = arith.constant 0 : index
    %c0_1 = arith.constant 0 : index
    %0 = vector.load %arg1[%c0, %c0_0, %c0_1] : memref<16x18x12xbf16, #tpu.memory_space<vmem>>, vector<16x18x12xbf16>
    %cst = arith.constant 0.000000e+00 : f32
    %1 = vector.broadcast %cst : f32 to vector<256x128xf32>
    %2 = vector.extract_strided_slice %0 {offsets = [0, 0, 0], sizes = [16, 16, 12], strides = [1, 1, 1]} : vector<16x18x12xbf16> to vector<16x16x12xbf16>
    %3 = vector.shape_cast %2 : vector<16x16x12xbf16> to vector<256x12xbf16>
    %c0_2 = arith.constant 0 : index
    %c0_3 = arith.constant 0 : index
    %c0_4 = arith.constant 0 : index
    %4 = vector.load %arg2[%c0_2, %c0_3, %c0_4] : memref<3x12x128xbf16, #tpu.memory_space<vmem>>, vector<1x12x128xbf16>
    %5 = vector.shape_cast %4 : vector<1x12x128xbf16> to vector<12x128xbf16>
    %cst_5 = arith.constant dense<0.000000e+00> : vector<256x128xf32>
    %6 = tpu.matmul %3, %5, %cst_5 {dimension_numbers = #tpu.dot_dimension_numbers<[1], [0], [0], [1], [0, 0, 1, 1], [], []>} : vector<256x12xbf16>, vector<12x128xbf16>, vector<256x128xf32> -> vector<256x128xf32>
    %7 = arith.addf %1, %6 : vector<256x128xf32>
    %8 = vector.extract_strided_slice %0 {offsets = [0, 1, 0], sizes = [16, 16, 12], strides = [1, 1, 1]} : vector<16x18x12xbf16> to vector<16x16x12xbf16>
    %9 = vector.shape_cast %8 : vector<16x16x12xbf16> to vector<256x12xbf16>
    %c1 = arith.constant 1 : index
    %c0_6 = arith.constant 0 : index
    %c0_7 = arith.constant 0 : index
    %10 = vector.load %arg2[%c1, %c0_6, %c0_7] : memref<3x12x128xbf16, #tpu.memory_space<vmem>>, vector<1x12x128xbf16>
    %11 = vector.shape_cast %10 : vector<1x12x128xbf16> to vector<12x128xbf16>
    %cst_8 = arith.constant dense<0.000000e+00> : vector<256x128xf32>
    %12 = tpu.matmul %9, %11, %cst_8 {dimension_numbers = #tpu.dot_dimension_numbers<[1], [0], [0], [1], [0, 0, 1, 1], [], []>} : vector<256x12xbf16>, vector<12x128xbf16>, vector<256x128xf32> -> vector<256x128xf32>
    %13 = arith.addf %7, %12 : vector<256x128xf32>
    %14 = vector.extract_strided_slice %0 {offsets = [0, 2, 0], sizes = [16, 16, 12], strides = [1, 1, 1]} : vector<16x18x12xbf16> to vector<16x16x12xbf16>
    %15 = vector.shape_cast %14 : vector<16x16x12xbf16> to vector<256x12xbf16>
    %c2 = arith.constant 2 : index
    %c0_9 = arith.constant 0 : index
    %c0_10 = arith.constant 0 : index
    %16 = vector.load %arg2[%c2, %c0_9, %c0_10] : memref<3x12x128xbf16, #tpu.memory_space<vmem>>, vector<1x12x128xbf16>
    %17 = vector.shape_cast %16 : vector<1x12x128xbf16> to vector<12x128xbf16>
    %cst_11 = arith.constant dense<0.000000e+00> : vector<256x128xf32>
    %18 = tpu.matmul %15, %17, %cst_11 {dimension_numbers = #tpu.dot_dimension_numbers<[1], [0], [0], [1], [0, 0, 1, 1], [], []>} : vector<256x12xbf16>, vector<12x128xbf16>, vector<256x128xf32> -> vector<256x128xf32>
    %19 = arith.addf %13, %18 : vector<256x128xf32>
    %c0_12 = arith.constant 0 : index
    %c0_13 = arith.constant 0 : index
    %20 = vector.load %arg3[%c0_12, %c0_13] : memref<256x128xf32, #tpu.memory_space<vmem>>, vector<256x128xf32>
    tpu.vector_store %arg3[%c0_12, %c0_13], %19 {strides = array<i32>} : memref<256x128xf32, #tpu.memory_space<vmem>>, vector<256x128xf32>,
    %c0_i32 = arith.constant 0 : i32
    %21 = arith.cmpi eq, %arg0, %c0_i32 : i32
    %22 = arith.extui %21 : i1 to i32
    %c0_i32_14 = arith.constant 0 : i32
    %23 = arith.cmpi ne, %22, %c0_i32_14 : i32
    scf.if %23 {
      %cst_25 = arith.constant 0.000000e+00 : f32
      %35 = vector.broadcast %cst_25 : f32 to vector<1x128xf32>
      %c0_26 = arith.constant 0 : index
      %c0_27 = arith.constant 0 : index
      %36 = vector.load %arg4[%c0_26, %c0_27] : memref<1x128xf32, #tpu.memory_space<vmem>>, vector<1x128xf32>
      tpu.vector_store %arg4[%c0_26, %c0_27], %35 {strides = array<i32>} : memref<1x128xf32, #tpu.memory_space<vmem>>, vector<1x128xf32>,
      %cst_28 = arith.constant 0.000000e+00 : f32
      %37 = vector.broadcast %cst_28 : f32 to vector<1x128xf32>
      %c0_29 = arith.constant 0 : index
      %c0_30 = arith.constant 0 : index
      %38 = vector.load %arg5[%c0_29, %c0_30] : memref<1x128xf32, #tpu.memory_space<vmem>>, vector<1x128xf32>
      tpu.vector_store %arg5[%c0_29, %c0_30], %37 {strides = array<i32>} : memref<1x128xf32, #tpu.memory_space<vmem>>, vector<1x128xf32>,
    } else {
    }
    %c0_15 = arith.constant 0 : index
    %c0_16 = arith.constant 0 : index
    %24 = vector.load %arg4[%c0_15, %c0_16] : memref<1x128xf32, #tpu.memory_space<vmem>>, vector<1x128xf32>
    %cst_17 = arith.constant dense<0.000000e+00> : vector<128xf32>
    %25 = vector.multi_reduction <add>, %19, %cst_17 [0] : vector<256x128xf32> to vector<128xf32>
    %26 = vector.shape_cast %25 : vector<128xf32> to vector<1x128xf32>
    %27 = arith.addf %24, %26 : vector<1x128xf32>
    %c0_18 = arith.constant 0 : index
    %c0_19 = arith.constant 0 : index
    %28 = vector.load %arg4[%c0_18, %c0_19] : memref<1x128xf32, #tpu.memory_space<vmem>>, vector<1x128xf32>
    tpu.vector_store %arg4[%c0_18, %c0_19], %27 {strides = array<i32>} : memref<1x128xf32, #tpu.memory_space<vmem>>, vector<1x128xf32>,
    %c0_20 = arith.constant 0 : index
    %c0_21 = arith.constant 0 : index
    %29 = vector.load %arg5[%c0_20, %c0_21] : memref<1x128xf32, #tpu.memory_space<vmem>>, vector<1x128xf32>
    %30 = arith.mulf %19, %19 : vector<256x128xf32>
    %cst_22 = arith.constant dense<0.000000e+00> : vector<128xf32>
    %31 = vector.multi_reduction <add>, %30, %cst_22 [0] : vector<256x128xf32> to vector<128xf32>
    %32 = vector.shape_cast %31 : vector<128xf32> to vector<1x128xf32>
    %33 = arith.addf %29, %32 : vector<1x128xf32>
    %c0_23 = arith.constant 0 : index
    %c0_24 = arith.constant 0 : index
    %34 = vector.load %arg5[%c0_23, %c0_24] : memref<1x128xf32, #tpu.memory_space<vmem>>, vector<1x128xf32>
    tpu.vector_store %arg5[%c0_23, %c0_24], %33 {strides = array<i32>} : memref<1x128xf32, #tpu.memory_space<vmem>>, vector<1x128xf32>,
    return
  }
  func.func @transform_0(%arg0: i32) -> (i32, i32, i32) {
    %c0_i32 = arith.constant 0 : i32
    %c0_i32_0 = arith.constant 0 : i32
    %c0_i32_1 = arith.constant 0 : i32
    return %arg0, %c0_i32, %c0_i32_0 : i32, i32, i32
  }
  func.func @transform_1(%arg0: i32) -> (i32, i32, i32) {
    %c0_i32 = arith.constant 0 : i32
    %c0_i32_0 = arith.constant 0 : i32
    %c0_i32_1 = arith.constant 0 : i32
    %c0_i32_2 = arith.constant 0 : i32
    return %c0_i32, %c0_i32_0, %c0_i32_1 : i32, i32, i32
  }
  func.func @transform_2(%arg0: i32) -> (i32, i32) {
    %c0_i32 = arith.constant 0 : i32
    %c0_i32_0 = arith.constant 0 : i32
    return %arg0, %c0_i32 : i32, i32
  }
  func.func @transform_3(%arg0: i32) -> (i32, i32) {
    %c0_i32 = arith.constant 0 : i32
    %c0_i32_0 = arith.constant 0 : i32
    %c0_i32_1 = arith.constant 0 : i32
    return %c0_i32, %c0_i32_0 : i32, i32
  }
  func.func @transform_4(%arg0: i32) -> (i32, i32) {
    %c0_i32 = arith.constant 0 : i32
    %c0_i32_0 = arith.constant 0 : i32
    %c0_i32_1 = arith.constant 0 : i32
    return %c0_i32, %c0_i32_0 : i32, i32
  }
}

module attributes {stable_mosaic.version = 11 : i64} {
  func.func @bn_relu_kernel(%arg0: i32, %arg1: memref<256x128xf32, #tpu.memory_space<vmem>>, %arg2: memref<1x128xf32, #tpu.memory_space<vmem>>, %arg3: memref<1x128xf32, #tpu.memory_space<vmem>>, %arg4: memref<256x128xbf16, #tpu.memory_space<vmem>>) attributes {dimension_semantics = [#tpu.dimension_semantics<parallel>], iteration_bounds = array<i64: 2>, scalar_prefetch = 0 : i64, scratch_operands = 0 : i64, tpu.core_type = #tpu.core_type<tc>, window_params = [{transform_indices = @transform_0, window_bounds = array<i64: 256, 128>}, {pipeline_mode = #tpu.pipeline_mode<synchronous>, transform_indices = @transform_1, window_bounds = array<i64: 1, 128>}, {pipeline_mode = #tpu.pipeline_mode<synchronous>, transform_indices = @transform_2, window_bounds = array<i64: 1, 128>}, {transform_indices = @transform_3, window_bounds = array<i64: 256, 128>}]} {
    %c0 = arith.constant 0 : index
    %c0_0 = arith.constant 0 : index
    %0 = vector.load %arg1[%c0, %c0_0] : memref<256x128xf32, #tpu.memory_space<vmem>>, vector<256x128xf32>
    %c0_1 = arith.constant 0 : index
    %c0_2 = arith.constant 0 : index
    %1 = vector.load %arg2[%c0_1, %c0_2] : memref<1x128xf32, #tpu.memory_space<vmem>>, vector<1x128xf32>
    %2 = vector.broadcast %1 : vector<1x128xf32> to vector<256x128xf32>
    %3 = arith.mulf %0, %2 : vector<256x128xf32>
    %c0_3 = arith.constant 0 : index
    %c0_4 = arith.constant 0 : index
    %4 = vector.load %arg3[%c0_3, %c0_4] : memref<1x128xf32, #tpu.memory_space<vmem>>, vector<1x128xf32>
    %5 = vector.broadcast %4 : vector<1x128xf32> to vector<256x128xf32>
    %6 = arith.addf %3, %5 : vector<256x128xf32>
    %cst = arith.constant 0.000000e+00 : f32
    %7 = vector.broadcast %cst : f32 to vector<256x128xf32>
    %8 = arith.maximumf %6, %7 : vector<256x128xf32>
    %9 = arith.truncf %8 : vector<256x128xf32> to vector<256x128xbf16>
    %c0_5 = arith.constant 0 : index
    %c0_6 = arith.constant 0 : index
    %10 = vector.load %arg4[%c0_5, %c0_6] : memref<256x128xbf16, #tpu.memory_space<vmem>>, vector<256x128xbf16>
    tpu.vector_store %arg4[%c0_5, %c0_6], %9 {strides = array<i32>} : memref<256x128xbf16, #tpu.memory_space<vmem>>, vector<256x128xbf16>,
    return
  }
  func.func @transform_0(%arg0: i32) -> (i32, i32) {
    %c0_i32 = arith.constant 0 : i32
    %c0_i32_0 = arith.constant 0 : i32
    return %arg0, %c0_i32 : i32, i32
  }
  func.func @transform_1(%arg0: i32) -> (i32, i32) {
    %c0_i32 = arith.constant 0 : i32
    %c0_i32_0 = arith.constant 0 : i32
    %c0_i32_1 = arith.constant 0 : i32
    return %c0_i32, %c0_i32_0 : i32, i32
  }
  func.func @transform_2(%arg0: i32) -> (i32, i32) {
    %c0_i32 = arith.constant 0 : i32
    %c0_i32_0 = arith.constant 0 : i32
    %c0_i32_1 = arith.constant 0 : i32
    return %c0_i32, %c0_i32_0 : i32, i32
  }
  func.func @transform_3(%arg0: i32) -> (i32, i32) {
    %c0_i32 = arith.constant 0 : i32
    %c0_i32_0 = arith.constant 0 : i32
    return %arg0, %c0_i32 : i32, i32
  }
}

module attributes {stable_mosaic.version = 11 : i64} {
  func.func @conv_stats_kernel(%arg0: i32, %arg1: memref<16x18x24xbf16, #tpu.memory_space<vmem>>, %arg2: memref<3x24x128xbf16, #tpu.memory_space<vmem>>, %arg3: memref<256x128xf32, #tpu.memory_space<vmem>>, %arg4: memref<1x128xf32, #tpu.memory_space<vmem>>, %arg5: memref<1x128xf32, #tpu.memory_space<vmem>>) attributes {dimension_semantics = [#tpu.dimension_semantics<arbitrary>], iteration_bounds = array<i64: 2>, scalar_prefetch = 0 : i64, scratch_operands = 0 : i64, tpu.core_type = #tpu.core_type<tc>, window_params = [{transform_indices = @transform_0, window_bounds = array<i64: 16, 18, 24>}, {pipeline_mode = #tpu.pipeline_mode<synchronous>, transform_indices = @transform_1, window_bounds = array<i64: 3, 24, 128>}, {transform_indices = @transform_2, window_bounds = array<i64: 256, 128>}, {pipeline_mode = #tpu.pipeline_mode<synchronous>, transform_indices = @transform_3, window_bounds = array<i64: 1, 128>}, {pipeline_mode = #tpu.pipeline_mode<synchronous>, transform_indices = @transform_4, window_bounds = array<i64: 1, 128>}]} {
    %c0 = arith.constant 0 : index
    %c0_0 = arith.constant 0 : index
    %c0_1 = arith.constant 0 : index
    %0 = vector.load %arg1[%c0, %c0_0, %c0_1] : memref<16x18x24xbf16, #tpu.memory_space<vmem>>, vector<16x18x24xbf16>
    %cst = arith.constant 0.000000e+00 : f32
    %1 = vector.broadcast %cst : f32 to vector<256x128xf32>
    %2 = vector.extract_strided_slice %0 {offsets = [0, 0, 0], sizes = [16, 16, 24], strides = [1, 1, 1]} : vector<16x18x24xbf16> to vector<16x16x24xbf16>
    %3 = vector.shape_cast %2 : vector<16x16x24xbf16> to vector<256x24xbf16>
    %c0_2 = arith.constant 0 : index
    %c0_3 = arith.constant 0 : index
    %c0_4 = arith.constant 0 : index
    %4 = vector.load %arg2[%c0_2, %c0_3, %c0_4] : memref<3x24x128xbf16, #tpu.memory_space<vmem>>, vector<1x24x128xbf16>
    %5 = vector.shape_cast %4 : vector<1x24x128xbf16> to vector<24x128xbf16>
    %cst_5 = arith.constant dense<0.000000e+00> : vector<256x128xf32>
    %6 = tpu.matmul %3, %5, %cst_5 {dimension_numbers = #tpu.dot_dimension_numbers<[1], [0], [0], [1], [0, 0, 1, 1], [], []>} : vector<256x24xbf16>, vector<24x128xbf16>, vector<256x128xf32> -> vector<256x128xf32>
    %7 = arith.addf %1, %6 : vector<256x128xf32>
    %8 = vector.extract_strided_slice %0 {offsets = [0, 1, 0], sizes = [16, 16, 24], strides = [1, 1, 1]} : vector<16x18x24xbf16> to vector<16x16x24xbf16>
    %9 = vector.shape_cast %8 : vector<16x16x24xbf16> to vector<256x24xbf16>
    %c1 = arith.constant 1 : index
    %c0_6 = arith.constant 0 : index
    %c0_7 = arith.constant 0 : index
    %10 = vector.load %arg2[%c1, %c0_6, %c0_7] : memref<3x24x128xbf16, #tpu.memory_space<vmem>>, vector<1x24x128xbf16>
    %11 = vector.shape_cast %10 : vector<1x24x128xbf16> to vector<24x128xbf16>
    %cst_8 = arith.constant dense<0.000000e+00> : vector<256x128xf32>
    %12 = tpu.matmul %9, %11, %cst_8 {dimension_numbers = #tpu.dot_dimension_numbers<[1], [0], [0], [1], [0, 0, 1, 1], [], []>} : vector<256x24xbf16>, vector<24x128xbf16>, vector<256x128xf32> -> vector<256x128xf32>
    %13 = arith.addf %7, %12 : vector<256x128xf32>
    %14 = vector.extract_strided_slice %0 {offsets = [0, 2, 0], sizes = [16, 16, 24], strides = [1, 1, 1]} : vector<16x18x24xbf16> to vector<16x16x24xbf16>
    %15 = vector.shape_cast %14 : vector<16x16x24xbf16> to vector<256x24xbf16>
    %c2 = arith.constant 2 : index
    %c0_9 = arith.constant 0 : index
    %c0_10 = arith.constant 0 : index
    %16 = vector.load %arg2[%c2, %c0_9, %c0_10] : memref<3x24x128xbf16, #tpu.memory_space<vmem>>, vector<1x24x128xbf16>
    %17 = vector.shape_cast %16 : vector<1x24x128xbf16> to vector<24x128xbf16>
    %cst_11 = arith.constant dense<0.000000e+00> : vector<256x128xf32>
    %18 = tpu.matmul %15, %17, %cst_11 {dimension_numbers = #tpu.dot_dimension_numbers<[1], [0], [0], [1], [0, 0, 1, 1], [], []>} : vector<256x24xbf16>, vector<24x128xbf16>, vector<256x128xf32> -> vector<256x128xf32>
    %19 = arith.addf %13, %18 : vector<256x128xf32>
    %c0_12 = arith.constant 0 : index
    %c0_13 = arith.constant 0 : index
    %20 = vector.load %arg3[%c0_12, %c0_13] : memref<256x128xf32, #tpu.memory_space<vmem>>, vector<256x128xf32>
    tpu.vector_store %arg3[%c0_12, %c0_13], %19 {strides = array<i32>} : memref<256x128xf32, #tpu.memory_space<vmem>>, vector<256x128xf32>,
    %c0_i32 = arith.constant 0 : i32
    %21 = arith.cmpi eq, %arg0, %c0_i32 : i32
    %22 = arith.extui %21 : i1 to i32
    %c0_i32_14 = arith.constant 0 : i32
    %23 = arith.cmpi ne, %22, %c0_i32_14 : i32
    scf.if %23 {
      %cst_25 = arith.constant 0.000000e+00 : f32
      %35 = vector.broadcast %cst_25 : f32 to vector<1x128xf32>
      %c0_26 = arith.constant 0 : index
      %c0_27 = arith.constant 0 : index
      %36 = vector.load %arg4[%c0_26, %c0_27] : memref<1x128xf32, #tpu.memory_space<vmem>>, vector<1x128xf32>
      tpu.vector_store %arg4[%c0_26, %c0_27], %35 {strides = array<i32>} : memref<1x128xf32, #tpu.memory_space<vmem>>, vector<1x128xf32>,
      %cst_28 = arith.constant 0.000000e+00 : f32
      %37 = vector.broadcast %cst_28 : f32 to vector<1x128xf32>
      %c0_29 = arith.constant 0 : index
      %c0_30 = arith.constant 0 : index
      %38 = vector.load %arg5[%c0_29, %c0_30] : memref<1x128xf32, #tpu.memory_space<vmem>>, vector<1x128xf32>
      tpu.vector_store %arg5[%c0_29, %c0_30], %37 {strides = array<i32>} : memref<1x128xf32, #tpu.memory_space<vmem>>, vector<1x128xf32>,
    } else {
    }
    %c0_15 = arith.constant 0 : index
    %c0_16 = arith.constant 0 : index
    %24 = vector.load %arg4[%c0_15, %c0_16] : memref<1x128xf32, #tpu.memory_space<vmem>>, vector<1x128xf32>
    %cst_17 = arith.constant dense<0.000000e+00> : vector<128xf32>
    %25 = vector.multi_reduction <add>, %19, %cst_17 [0] : vector<256x128xf32> to vector<128xf32>
    %26 = vector.shape_cast %25 : vector<128xf32> to vector<1x128xf32>
    %27 = arith.addf %24, %26 : vector<1x128xf32>
    %c0_18 = arith.constant 0 : index
    %c0_19 = arith.constant 0 : index
    %28 = vector.load %arg4[%c0_18, %c0_19] : memref<1x128xf32, #tpu.memory_space<vmem>>, vector<1x128xf32>
    tpu.vector_store %arg4[%c0_18, %c0_19], %27 {strides = array<i32>} : memref<1x128xf32, #tpu.memory_space<vmem>>, vector<1x128xf32>,
    %c0_20 = arith.constant 0 : index
    %c0_21 = arith.constant 0 : index
    %29 = vector.load %arg5[%c0_20, %c0_21] : memref<1x128xf32, #tpu.memory_space<vmem>>, vector<1x128xf32>
    %30 = arith.mulf %19, %19 : vector<256x128xf32>
    %cst_22 = arith.constant dense<0.000000e+00> : vector<128xf32>
    %31 = vector.multi_reduction <add>, %30, %cst_22 [0] : vector<256x128xf32> to vector<128xf32>
    %32 = vector.shape_cast %31 : vector<128xf32> to vector<1x128xf32>
    %33 = arith.addf %29, %32 : vector<1x128xf32>
    %c0_23 = arith.constant 0 : index
    %c0_24 = arith.constant 0 : index
    %34 = vector.load %arg5[%c0_23, %c0_24] : memref<1x128xf32, #tpu.memory_space<vmem>>, vector<1x128xf32>
    tpu.vector_store %arg5[%c0_23, %c0_24], %33 {strides = array<i32>} : memref<1x128xf32, #tpu.memory_space<vmem>>, vector<1x128xf32>,
    return
  }
  func.func @transform_0(%arg0: i32) -> (i32, i32, i32) {
    %c0_i32 = arith.constant 0 : i32
    %c0_i32_0 = arith.constant 0 : i32
    %c0_i32_1 = arith.constant 0 : i32
    return %arg0, %c0_i32, %c0_i32_0 : i32, i32, i32
  }
  func.func @transform_1(%arg0: i32) -> (i32, i32, i32) {
    %c0_i32 = arith.constant 0 : i32
    %c0_i32_0 = arith.constant 0 : i32
    %c0_i32_1 = arith.constant 0 : i32
    %c0_i32_2 = arith.constant 0 : i32
    return %c0_i32, %c0_i32_0, %c0_i32_1 : i32, i32, i32
  }
  func.func @transform_2(%arg0: i32) -> (i32, i32) {
    %c0_i32 = arith.constant 0 : i32
    %c0_i32_0 = arith.constant 0 : i32
    return %arg0, %c0_i32 : i32, i32
  }
  func.func @transform_3(%arg0: i32) -> (i32, i32) {
    %c0_i32 = arith.constant 0 : i32
    %c0_i32_0 = arith.constant 0 : i32
    %c0_i32_1 = arith.constant 0 : i32
    return %c0_i32, %c0_i32_0 : i32, i32
  }
  func.func @transform_4(%arg0: i32) -> (i32, i32) {
    %c0_i32 = arith.constant 0 : i32
    %c0_i32_0 = arith.constant 0 : i32
    %c0_i32_1 = arith.constant 0 : i32
    return %c0_i32, %c0_i32_0 : i32, i32
  }
}

module attributes {stable_mosaic.version = 11 : i64} {
  func.func @bn_relu_kernel(%arg0: i32, %arg1: memref<256x128xf32, #tpu.memory_space<vmem>>, %arg2: memref<1x128xf32, #tpu.memory_space<vmem>>, %arg3: memref<1x128xf32, #tpu.memory_space<vmem>>, %arg4: memref<256x128xf32, #tpu.memory_space<vmem>>) attributes {dimension_semantics = [#tpu.dimension_semantics<parallel>], iteration_bounds = array<i64: 2>, scalar_prefetch = 0 : i64, scratch_operands = 0 : i64, tpu.core_type = #tpu.core_type<tc>, window_params = [{transform_indices = @transform_0, window_bounds = array<i64: 256, 128>}, {pipeline_mode = #tpu.pipeline_mode<synchronous>, transform_indices = @transform_1, window_bounds = array<i64: 1, 128>}, {pipeline_mode = #tpu.pipeline_mode<synchronous>, transform_indices = @transform_2, window_bounds = array<i64: 1, 128>}, {transform_indices = @transform_3, window_bounds = array<i64: 256, 128>}]} {
    %c0 = arith.constant 0 : index
    %c0_0 = arith.constant 0 : index
    %0 = vector.load %arg1[%c0, %c0_0] : memref<256x128xf32, #tpu.memory_space<vmem>>, vector<256x128xf32>
    %c0_1 = arith.constant 0 : index
    %c0_2 = arith.constant 0 : index
    %1 = vector.load %arg2[%c0_1, %c0_2] : memref<1x128xf32, #tpu.memory_space<vmem>>, vector<1x128xf32>
    %2 = vector.broadcast %1 : vector<1x128xf32> to vector<256x128xf32>
    %3 = arith.mulf %0, %2 : vector<256x128xf32>
    %c0_3 = arith.constant 0 : index
    %c0_4 = arith.constant 0 : index
    %4 = vector.load %arg3[%c0_3, %c0_4] : memref<1x128xf32, #tpu.memory_space<vmem>>, vector<1x128xf32>
    %5 = vector.broadcast %4 : vector<1x128xf32> to vector<256x128xf32>
    %6 = arith.addf %3, %5 : vector<256x128xf32>
    %cst = arith.constant 0.000000e+00 : f32
    %7 = vector.broadcast %cst : f32 to vector<256x128xf32>
    %8 = arith.maximumf %6, %7 : vector<256x128xf32>
    %c0_5 = arith.constant 0 : index
    %c0_6 = arith.constant 0 : index
    %9 = vector.load %arg4[%c0_5, %c0_6] : memref<256x128xf32, #tpu.memory_space<vmem>>, vector<256x128xf32>
    tpu.vector_store %arg4[%c0_5, %c0_6], %8 {strides = array<i32>} : memref<256x128xf32, #tpu.memory_space<vmem>>, vector<256x128xf32>,
    return
  }
  func.func @transform_0(%arg0: i32) -> (i32, i32) {
    %c0_i32 = arith.constant 0 : i32
    %c0_i32_0 = arith.constant 0 : i32
    return %arg0, %c0_i32 : i32, i32
  }
  func.func @transform_1(%arg0: i32) -> (i32, i32) {
    %c0_i32 = arith.constant 0 : i32
    %c0_i32_0 = arith.constant 0 : i32
    %c0_i32_1 = arith.constant 0 : i32
    return %c0_i32, %c0_i32_0 : i32, i32
  }
  func.func @transform_2(%arg0: i32) -> (i32, i32) {
    %c0_i32 = arith.constant 0 : i32
    %c0_i32_0 = arith.constant 0 : i32
    %c0_i32_1 = arith.constant 0 : i32
    return %c0_i32, %c0_i32_0 : i32, i32
  }
  func.func @transform_3(%arg0: i32) -> (i32, i32) {
    %c0_i32 = arith.constant 0 : i32
    %c0_i32_0 = arith.constant 0 : i32
    return %arg0, %c0_i32 : i32, i32
  }
}

</mosaic_0001>

<bundles_post_ra>
// kernel: inconv_forward.5
= control target key start
LH: loop header
LB: loop body
LE: loop exit
PB: predicated region body
PF: predicated region fallthrough
CT: control target
= control target key end

     0   :  { %s740_s12 = smov 0   ;;  %s887_s0 = inlined_call_operand.vmem [shape: f32[512,128], index: 0, kind: input, shape index: {}]   ;;  %s888_s1 = inlined_call_operand.vmem [shape: f32[1,128], index: 1, kind: input, shape index: {}]   ;;  %s889_s2 = inlined_call_operand.vmem [shape: f32[1,128], index: 2, kind: input, shape index: {}]   ;;  %s890_s3 = inlined_call_operand.vmem [shape: bf16[512,128], index: 3, kind: output, shape index: {}]  }
   0x1 LB: > { %s532_s13 = sadd.s32 4294967295, %s718_s12   ;;  %p536_p0 = scmp.ge.s32.totalorder %s718_s12, 1  ;;  %s718_s12 = sphi %s740_s12, %s13_s12  }
   0x2   : > { %p138_p1 = scmp.lt.s32.totalorder %s718_s12, 3 }
   0x4   : > { %p139_p2 = pnand %p536_p0, %p138_p1 }
   0x5   : > { %s537_s14 = sshll.u32 (!%p139_p2), %s532_s13, 5 }
   0x6   : > { %142 = sbr.rel (%p139_p2) target bundleno = 49 (0x31), region = 32  ;;  %p163_p3 = scmp.lt.s32.totalorder (!%p139_p2), %s537_s14, 63 }
   0xb   : > { %s892_s14 = smov (!%p163_p3, %s537_s14), 63  ;;  %v754_v0 = vld [vmem:[%s888_s1] ss:$0 sm:$0xff] }
   0xc   : > { %s538_s15 = sshll.u32 %s892_s14, 3  ;;  %v764_v1 = vld [vmem:[%s889_s2] ss:$0 sm:$0xff]  ;;  %s540_s23 = sshll.u32 %s892_s14, 2 }
   0xd   : > { %s759_s20 = scalar_lea.vmem %s887_s0, %s538_s15  ;;  %s796_s26 = scalar_lea.vmem %s890_s3, %s540_s23 }
   0xe   : > { %v174_v2 = vld [vmem:[%s759_s20] sm:$0xff]  ;;  %v175_v3 = vld [vmem:[%s759_s20 + $0x8] sm:$0xff]  ;;  %v176_v4 = vld [vmem:[%s759_s20 + $0x10] sm:$0xff] }
   0xf   : > { %v213_v5 = vmul.f32 %v754_v0, %v174_v2  ;;  %v214_v6 = vmul.f32 %v754_v0, %v175_v3  ;;  %v177_v7 = vld [vmem:[%s759_s20 + $0x18] sm:$0xff]  ;;  %v215_v8 = vmul.f32 %v754_v0, %v176_v4  ;;  %v178_v9 = vld [vmem:[%s759_s20 + $0x20] sm:$0xff]  ;;  %v179_v10 = vld [vmem:[%s759_s20 + $0x28] sm:$0xff] }
  0x10   : > { %v216_v11 = vmul.f32 %v754_v0, %v177_v7  ;;  %v217_v12 = vmul.f32 %v754_v0, %v178_v9  ;;  %v218_v13 = vmul.f32 %v754_v0, %v179_v10  ;;  %v180_v14 = vld [vmem:[%s759_s20 + $0x30] sm:$0xff]  ;;  %v181_v15 = vld [vmem:[%s759_s20 + $0x38] sm:$0xff]  ;;  %v182_v24 = vld [vmem:[%s759_s20 + $0x40] sm:$0xff] }
  0x11   : > { %v252_v16 = vadd.f32 %v764_v1, %v213_v5  ;;  %v253_v17 = vadd.f32 %v764_v1, %v214_v6  ;;  %v254_v18 = vadd.f32 %v764_v1, %v215_v8  ;;  %v219_v19 = vmul.f32 %v754_v0, %v180_v14  ;;  %v183_v25 = vld [vmem:[%s759_s20 + $0x48] sm:$0xff]  ;;  %v184_v30 = vld [vmem:[%s759_s20 + $0x50] sm:$0xff]  ;;  %v185_v35 = vld [vmem:[%s759_s20 + $0x58] sm:$0xff] }
  0x12   : > { %v255_v20 = vadd.f32 %v764_v1, %v216_v11  ;;  %v256_v21 = vadd.f32 %v764_v1, %v217_v12  ;;  %v257_v22 = vadd.f32 %v764_v1, %v218_v13  ;;  %v220_v23 = vmul.f32 %v754_v0, %v181_v15  ;;  %v186_v36 = vld [vmem:[%s759_s20 + $0x60] sm:$0xff]  ;;  %v187_v41 = vld [vmem:[%s759_s20 + $0x68] sm:$0xff]  ;;  %v188_v42 = vld [vmem:[%s759_s20 + $0x70] sm:$0xff] }
  0x13   : > { %v284_v26 = vmax.f32 %v252_v16, 0.0  ;;  %v285_v27 = vmax.f32 %v253_v17, 0.0  ;;  %v286_v28 = vmax.f32 %v254_v18, 0.0  ;;  %v258_v29 = vadd.f32 %v764_v1, %v219_v19  ;;  %v189_v51 = vld [vmem:[%s759_s20 + $0x78] sm:$0xff]  ;;  %v190_v56 = vld [vmem:[%s759_s20 + $0x80] sm:$0xff]  ;;  %v191_v61 = vld [vmem:[%s759_s20 + $0x88] sm:$0xff] }
  0x14   : > { %v287_v31 = vmax.f32 %v255_v20, 0.0  ;;  %v288_v32 = vmax.f32 %v256_v21, 0.0  ;;  %v289_v33 = vmax.f32 %v257_v22, 0.0  ;;  %v259_v34 = vadd.f32 %v764_v1, %v220_v23  ;;  %v192_v4 = vld [vmem:[%s759_s20 + $0x90] sm:$0xff]  ;;  %v193_v5 = vld [vmem:[%s759_s20 + $0x98] sm:$0xff]  ;;  %v194_v10 = vld [vmem:[%s759_s20 + $0xa0] sm:$0xff] }
  0x15   : > { %v612_v37 = vpack.c.bf16 %v285_v27, %v284_v26  ;;  %v290_v38 = vmax.f32 %v258_v29, 0.0  ;;  %v221_v39 = vmul.f32 %v754_v0, %v182_v24  ;;  %v222_v40 = vmul.f32 %v754_v0, %v183_v25  ;;  %v195_v15 = vld [vmem:[%s759_s20 + $0xa8] sm:$0xff]  ;;  %v196_v20 = vld [vmem:[%s759_s20 + $0xb0] sm:$0xff]  ;;  %v197_v25 = vld [vmem:[%s759_s20 + $0xb8] sm:$0xff] }
  0x16   : > { %v617_v43 = vpack.c.bf16 %v287_v31, %v286_v28  ;;  %v622_v44 = vpack.c.bf16 %v289_v33, %v288_v32  ;;  %v291_v45 = vmax.f32 %v259_v34, 0.0  ;;  %v223_v46 = vmul.f32 %v754_v0, %v184_v30  ;;  %v198_v30 = vld [vmem:[%s759_s20 + $0xc0] sm:$0xff] }
  0x17   : > { %613 = vst [vmem:[%s796_s26] sm:$0xff] %v612_v37   ;;  %v260_v47 = vadd.f32 %v764_v1, %v221_v39  ;;  %v261_v48 = vadd.f32 %v764_v1, %v222_v40  ;;  %v224_v49 = vmul.f32 %v754_v0, %v185_v35  ;;  %v225_v50 = vmul.f32 %v754_v0, %v186_v36  ;;  %v199_v35 = vld [vmem:[%s759_s20 + $0xc8] sm:$0xff]  ;;  %v200_v40 = vld [vmem:[%s759_s20 + $0xd0] sm:$0xff] }
  0x18   : > { %689 = vst [vmem:[%s796_s26 + $0x8] sm:$0xff] %v617_v43   ;;  %690 = vst [vmem:[%s796_s26 + $0x10] sm:$0xff] %v622_v44   ;;  %v627_v52 = vpack.c.bf16 %v291_v45, %v290_v38  ;;  %v262_v53 = vadd.f32 %v764_v1, %v223_v46  ;;  %v226_v54 = vmul.f32 %v754_v0, %v187_v41  ;;  %v201_v41 = vld [vmem:[%s759_s20 + $0xd8] sm:$0xff]  ;;  %v202_v46 = vld [vmem:[%s759_s20 + $0xe0] sm:$0xff] }
  0x19   : > { %v227_v55 = vmul.f32 %v754_v0, %v188_v42  ;;  %v292_v57 = vmax.f32 %v260_v47, 0.0  ;;  %v293_v58 = vmax.f32 %v261_v48, 0.0  ;;  %v263_v59 = vadd.f32 %v764_v1, %v224_v49 }
  0x1a   : > { %v264_v60 = vadd.f32 %v764_v1, %v225_v50  ;;  %691 = vst [vmem:[%s796_s26 + $0x18] sm:$0xff] %v627_v52   ;;  %v294_v62 = vmax.f32 %v262_v53, 0.0  ;;  %v265_v63 = vadd.f32 %v764_v1, %v226_v54  ;;  %v228_v2 = vmul.f32 %v754_v0, %v189_v51  ;;  %v203_v51 = vld [vmem:[%s759_s20 + $0xe8] sm:$0xff] }
  0x1b   : > { %v266_v3 = vadd.f32 %v764_v1, %v227_v55  ;;  %v632_v6 = vpack.c.bf16 %v293_v58, %v292_v57  ;;  %v295_v7 = vmax.f32 %v263_v59, 0.0  ;;  %v229_v9 = vmul.f32 %v754_v0, %v190_v56  ;;  %v204_v56 = vld [vmem:[%s759_s20 + $0xf0] sm:$0xff] }
  0x1c   : > { %v296_v8 = vmax.f32 %v264_v60, 0.0  ;;  %v297_v11 = vmax.f32 %v265_v63, 0.0  ;;  %v267_v12 = vadd.f32 %v764_v1, %v228_v2  ;;  %v230_v14 = vmul.f32 %v754_v0, %v191_v61  ;;  %v205_v61 = vld [vmem:[%s759_s20 + $0xf8] sm:$0xff] }
  0x1d   : > { %v298_v13 = vmax.f32 %v266_v3, 0.0  ;;  %692 = vst [vmem:[%s796_s26 + $0x20] sm:$0xff] %v632_v6   ;;  %v637_v16 = vpack.c.bf16 %v295_v7, %v294_v62  ;;  %v268_v17 = vadd.f32 %v764_v1, %v229_v9  ;;  %v231_v18 = vmul.f32 %v754_v0, %v192_v4 }
  0x1e   : > { %v232_v19 = vmul.f32 %v754_v0, %v193_v5  ;;  %v642_v21 = vpack.c.bf16 %v297_v11, %v296_v8  ;;  %v299_v22 = vmax.f32 %v267_v12, 0.0  ;;  %v269_v23 = vadd.f32 %v764_v1, %v230_v14 }
  0x1f   : > { %v233_v24 = vmul.f32 %v754_v0, %v194_v10  ;;  %693 = vst [vmem:[%s796_s26 + $0x28] sm:$0xff] %v637_v16   ;;  %v300_v26 = vmax.f32 %v268_v17, 0.0  ;;  %v270_v27 = vadd.f32 %v764_v1, %v231_v18  ;;  %v234_v29 = vmul.f32 %v754_v0, %v195_v15 }
  0x20   : > { %v271_v28 = vadd.f32 %v764_v1, %v232_v19  ;;  %694 = vst [vmem:[%s796_s26 + $0x30] sm:$0xff] %v642_v21   ;;  %v647_v31 = vpack.c.bf16 %v299_v22, %v298_v13  ;;  %v301_v32 = vmax.f32 %v269_v23, 0.0  ;;  %v235_v34 = vmul.f32 %v754_v0, %v196_v20 }
  0x21   : > { %v272_v33 = vadd.f32 %v764_v1, %v233_v24  ;;  %v302_v36 = vmax.f32 %v270_v27, 0.0  ;;  %v273_v38 = vadd.f32 %v764_v1, %v234_v29  ;;  %v236_v39 = vmul.f32 %v754_v0, %v197_v25 }
  0x22   : > { %v303_v37 = vmax.f32 %v271_v28, 0.0  ;;  %695 = vst [vmem:[%s796_s26 + $0x38] sm:$0xff] %v647_v31   ;;  %v652_v42 = vpack.c.bf16 %v301_v32, %v300_v26  ;;  %v274_v44 = vadd.f32 %v764_v1, %v235_v34  ;;  %v237_v45 = vmul.f32 %v754_v0, %v198_v30 }
  0x23   : > { %v304_v43 = vmax.f32 %v272_v33, 0.0  ;;  %v305_v48 = vmax.f32 %v273_v38, 0.0  ;;  %v275_v49 = vadd.f32 %v764_v1, %v236_v39  ;;  %v238_v50 = vmul.f32 %v754_v0, %v199_v35 }
  0x24   : > { %v657_v47 = vpack.c.bf16 %v303_v37, %v302_v36  ;;  %696 = vst [vmem:[%s796_s26 + $0x40] sm:$0xff] %v652_v42   ;;  %v306_v52 = vmax.f32 %v274_v44, 0.0  ;;  %v276_v53 = vadd.f32 %v764_v1, %v237_v45  ;;  %v239_v54 = vmul.f32 %v754_v0, %v200_v40 }
  0x25   : > { %v240_v55 = vmul.f32 %v754_v0, %v201_v41  ;;  %v662_v57 = vpack.c.bf16 %v305_v48, %v304_v43  ;;  %v307_v58 = vmax.f32 %v275_v49, 0.0  ;;  %v277_v59 = vadd.f32 %v764_v1, %v238_v50 }
  0x26   : > { %697 = vst [vmem:[%s796_s26 + $0x48] sm:$0xff] %v657_v47   ;;  %v241_v60 = vmul.f32 %v754_v0, %v202_v46  ;;  %v308_v62 = vmax.f32 %v276_v53, 0.0  ;;  %v278_v63 = vadd.f32 %v764_v1, %v239_v54  ;;  %v242_v3 = vmul.f32 %v754_v0, %v203_v51 }
  0x27   : > { %v279_v2 = vadd.f32 %v764_v1, %v240_v55  ;;  %698 = vst [vmem:[%s796_s26 + $0x50] sm:$0xff] %v662_v57   ;;  %v667_v4 = vpack.c.bf16 %v307_v58, %v306_v52  ;;  %v309_v5 = vmax.f32 %v277_v59, 0.0  ;;  %v243_v7 = vmul.f32 %v754_v0, %v204_v56 }
  0x28   : > { %v280_v6 = vadd.f32 %v764_v1, %v241_v60  ;;  %v310_v8 = vmax.f32 %v278_v63, 0.0  ;;  %v281_v10 = vadd.f32 %v764_v1, %v242_v3  ;;  %v244_v11 = vmul.f32 %v754_v0, %v205_v61 }
  0x29   : > { %v311_v9 = vmax.f32 %v279_v2, 0.0  ;;  %699 = vst [vmem:[%s796_s26 + $0x58] sm:$0xff] %v667_v4   ;;  %v672_v12 = vpack.c.bf16 %v309_v5, %v308_v62  ;;  %v282_v14 = vadd.f32 %v764_v1, %v243_v7 }
  0x2a   : > { %v312_v13 = vmax.f32 %v280_v6, 0.0  ;;  %v313_v16 = vmax.f32 %v281_v10, 0.0  ;;  %v283_v17 = vadd.f32 %v764_v1, %v244_v11 }
  0x2b   : > { %v677_v15 = vpack.c.bf16 %v311_v9, %v310_v8  ;;  %700 = vst [vmem:[%s796_s26 + $0x60] sm:$0xff] %v672_v12   ;;  %v314_v18 = vmax.f32 %v282_v14, 0.0 }
  0x2c   : > { %v682_v19 = vpack.c.bf16 %v313_v16, %v312_v13  ;;  %v315_v20 = vmax.f32 %v283_v17, 0.0 }
  0x2d   : > { %701 = vst [vmem:[%s796_s26 + $0x68] sm:$0xff] %v677_v15  }
  0x2e   : > { %702 = vst [vmem:[%s796_s26 + $0x70] sm:$0xff] %v682_v19   ;;  %v687_v21 = vpack.c.bf16 %v315_v20, %v314_v18 }
  0x30   : > { %703 = vst [vmem:[%s796_s26 + $0x78] sm:$0xff] %v687_v21  }
  0x31 PF: > { %s13_s12 = sadd.s32 1, %s718_s12  }
  0x32   : > { %p10_p4 = scmp.ge.s32.totalorder %s13_s12, 4  }
  0x34   :  { %12 = sbr.rel (!%p10_p4) target bundleno = 1 (0x1), region = 62 }

// kernel: inconv_forward.4
= control target key start
LH: loop header
LB: loop body
LE: loop exit
PB: predicated region body
PF: predicated region fallthrough
CT: control target
= control target key end

     0   :  { %s2206_s15 = smov 0   ;;  %s3083_s0 = inlined_call_operand.vmem [shape: bf16[32,18,12], index: 0, kind: input, shape index: {}]   ;;  %s3084_s1 = inlined_call_operand.vmem [shape: bf16[3,12,128], index: 1, kind: input, shape index: {}]   ;;  %s3085_s2 = inlined_call_operand.vmem [shape: f32[512,128], index: 2, kind: output, shape index: {0}]   ;;  %s3086_s3 = inlined_call_operand.vmem [shape: f32[1,128], index: 3, kind: output, shape index: {1}]   ;;  %s3087_s4 = inlined_call_operand.vmem [shape: f32[1,128], index: 4, kind: output, shape index: {2}]  }
   0x1 LB: > { %s2212_s16 = sadd.s32 4294967295, %s2178_s15   ;;  %p1857_p0 = scmp.ge.s32.totalorder %s2178_s15, 1  ;;  %s2178_s15 = sphi %s2206_s15, %s15_s15  }
   0x2   : > { %p159_p1 = scmp.lt.s32.totalorder %s2178_s15, 3 }
   0x4   : > { %p160_p2 = pnand %p1857_p0, %p159_p1 }
   0x6   : > { %163 = sbr.rel (%p160_p2) target bundleno = 442 (0x1ba), region = 28 }
   0xb   : > { %v2153_v0 = vld [vmem:[%s3084_s1 + $0x8] sm:$0x3f]   ;;  %vm742_vm0 = vcmask 1045504   ;;  %s1858_s19 = sshll.u32 %s2212_s16, 4  ;;  %v2154_v2 = vld [vmem:[%s3084_s1] sm:$0x3f]  }
   0xc   : > { %2140 = vmatprep.subr.msk.bf16.mxu1 %vm742_vm0, %v2153_v0  ;;  %2139 = vmatprep.subr.msk.bf16.mxu0 %vm742_vm0, %v2153_v0  ;;  %v744_v1 = vsel %vm742_vm0, %v2153_v0, 0  ;;  %p187_p3 = scmp.lt.s32.totalorder %s1858_s19, 31  ;;  %v2155_v3 = vld [vmem:[%s3084_s1 + $0x10] sm:$0x3f]   ;;  %vm250_vm1 = vsmask.f32 3328 }
   0xd   : > { %2138 = vmatpush3.bf16.msra.mxu1 %v744_v1  ;;  %2036 = vmatpush3.bf16.msra.mxu0 %v744_v1  ;;  %vm251_vm2 = vsmask.f32 7440  ;;  %v2237_v4 = vsel %vm742_vm0, %v2154_v2, 0  ;;  %v2240_v5 = vsel %vm742_vm0, %v2155_v3, 0  ;;  %vm693_vm3 = vcmask 97280   ;;  %s1860_s28 = sshll.u32 %s2212_s16, 5 }
   0xe   : > { %s3131_s19 = smov (!%p187_p3, %s1858_s19), 31  ;;  %2141 = vmatprep.subr.msk.bf16.mxu1 %vm742_vm0, %v2154_v2  ;;  %2142 = vmatprep.subr.msk.bf16.mxu0 %vm742_vm0, %v2155_v3  ;;  %vm2279_vm4 = vmor %vm250_vm1, %vm251_vm2  ;;  %vm1220_vm5 = vcmask 1042432   ;;  %vm1221_vm6 = vcmask 1046532   ;;  %p194_p4 = scmp.lt.s32.totalorder %s1860_s28, 63 }
   0xf   : > { %s2143_s24 = smul.u32 12, %s3131_s19  ;;  %vm2550_vm7 = vmor %vm1220_vm5, %vm1221_vm6  ;;  %p1981_p5 = scmp.ne.s32.totalorder %s2212_s16, 0 }
  0x10   : > { %s3133_s28 = smov (!%p194_p4, %s1860_s28), 63 }
  0x11   : > { %s2234_s27 = scalar_lea.vmem %s3083_s0, %s2143_s24  ;;  %s1861_s29 = sshll.u32 %s3133_s28, 3 }
  0x12   : > { %v2243_v6 = vld [vmem:[%s2234_s27] sm:$0xf]  ;;  %v2246_v7 = vld [vmem:[%s2234_s27 + $0x4] sm:$0xf]  ;;  %v2249_v8 = vld [vmem:[%s2234_s27 + $0x8] sm:$0x1]  ;;  %s2811_s6 = scalar_lea.vmem %s3085_s2, %s1861_s29 }
  0x13   : > { %v254_v9 = vshrl.u32 %v2243_v6, 16  ;;  %v257_v10 = vshll.u32 %v2243_v6, 16  ;;  %v263_v11 = vshll.u32 %v2246_v7, 16  ;;  %v267_v12 = vshrl.u32 %v2246_v7, 16  ;;  %v2256_v13 = vld [vmem:[%s2234_s27 + $0x60] sm:$0xf] }
  0x14   : > { %v273_v14 = vshll.u32 %v2249_v8, 16  ;;  %v2261_v16 = vld [vmem:[%s2234_s27 + $0x64] sm:$0xf]  ;;  %v2264_v17 = vld [vmem:[%s2234_s27 + $0x68] sm:$0x1]  ;;  %v446_v23 = vshrl.u32 %v2256_v13, 16 }
  0x15   : > { %v256_v18 = vrot.slane %v254_v9, 4  ;;  %v259_v19 = vrot.slane %v257_v10, 5  ;;  %v265_v20 = vrot.slane %v263_v11, 5  ;;  %v269_v21 = vrot.slane %v267_v12, 4  ;;  %v2272_v30 = vld [vmem:[%s2234_s27 + $0xc] sm:$0xf] }
  0x16   : > { %v275_v22 = vrot.slane %v273_v14, 5  ;;  %v449_v24 = vshll.u32 %v2256_v13, 16  ;;  %v455_v25 = vshll.u32 %v2261_v16, 16  ;;  %v459_v28 = vshrl.u32 %v2261_v16, 16  ;;  %v2275_v31 = vld [vmem:[%s2234_s27 + $0x10] sm:$0xf] }
  0x17   : > { %v260_v26 = vor.u32 %v259_v19, %v256_v18  ;;  %v270_v27 = vor.u32 %v269_v21, %v265_v20  ;;  %v465_v29 = vshll.u32 %v2264_v17, 16  ;;  %v448_v33 = vrot.slane %v446_v23, 4  ;;  %v2286_v42 = vld [vmem:[%s2234_s27 + $0x14] sm:$0x1]  ;;  %v2297_v54 = vld [vmem:[%s2234_s27 + $0x6c] sm:$0xf] }
  0x18   : > { %v451_v34 = vrot.slane %v449_v24, 5  ;;  %v457_v35 = vrot.slane %v455_v25, 5  ;;  %v461_v39 = vrot.slane %v459_v28, 4  ;;  %v278_v43 = vshrl.u32 %v2272_v30, 16  ;;  %3105 = vst [vmem:[#allocation2_spill] sm:$0xff] %v2297_v54 }
  0x19   : > { %v261_v37 = vrot.slane %v260_v26, 4  ;;  %v271_v38 = vrot.slane %v270_v27, 4  ;;  %v467_v40 = vrot.slane %v465_v29, 5  ;;  %v281_v44 = vshll.u32 %v2272_v30, 16  ;;  %v2301_v59 = vld [vmem:[%s2234_s27 + $0x70] sm:$0xf] }
  0x1a   : > { %v452_v41 = vor.u32 %v451_v34, %v448_v33  ;;  %v287_v45 = vshll.u32 %v2275_v31, 16  ;;  %v462_v48 = vor.u32 %v461_v39, %v457_v35  ;;  %v291_v49 = vshrl.u32 %v2275_v31, 16  ;;  %v2309_v0 = vld [vmem:[%s2234_s27 + $0x74] sm:$0x1]  ;;  %v2315_v10 = vld [vmem:[%s2234_s27 + $0x18] sm:$0xf] }
  0x1b   : > { %v266_v46 = vsel %vm2279_vm4, %v261_v37, %v265_v20  ;;  %v276_v47 = vsel %vm2279_vm4, %v271_v38, %v275_v22  ;;  %v280_v52 = vrot.slane %v278_v43, 4  ;;  %v283_v53 = vrot.slane %v281_v44, 5  ;;  %3106 = vst [vmem:[#allocation3_spill] sm:$0xff] %v2309_v0  ;;  %v2322_v23 = vld [vmem:[%s2234_s27 + $0x1c] sm:$0xf] }
  0x1c   : > { %v1864_v50 = vcombine.low %v266_v46, %v276_v47  ;;  %v453_v51 = vrot.slane %v452_v41, 4  ;;  %v463_v55 = vrot.slane %v462_v48, 4  ;;  %v289_v56 = vrot.slane %v287_v45, 5  ;;  %v2328_v27 = vld [vmem:[%s2234_s27 + $0x20] sm:$0x1] }
  0x1d   : > { %v293_v57 = vrot.slane %v291_v49, 4  ;;  %v297_v58 = vshll.u32 %v2286_v42, 16  ;;  %v284_v61 = vor.u32 %v283_v53, %v280_v52  ;;  %v470_v9 = vshrl.u32 %v2297_v54, 16  ;;  %v2335_v37 = vld [vmem:[%s2234_s27 + $0x78] sm:$0xf] }
  0x1e   : > { %2037 = vmatprep.mubr.msk.bf16.mxu0 %vm693_vm3, %v1864_v50  ;;  %v458_v60 = vsel %vm2279_vm4, %v453_v51, %v457_v35  ;;  %v468_v1 = vsel %vm2279_vm4, %v463_v55, %v467_v40  ;;  %v473_v14 = vshll.u32 %v2297_v54, 16  ;;  %v479_v18 = vshll.u32 %v2301_v59, 16  ;;  %3107 = vst [vmem:[#allocation4_spill] sm:$0xff] %v2335_v37  ;;  %v2341_v47 = vld [vmem:[%s2234_s27 + $0x7c] sm:$0xf] }
  0x1f   : > { %v294_v2 = vor.u32 %v293_v57, %v289_v56  ;;  %v299_v3 = vrot.slane %v297_v58, 5  ;;  %v1872_v11 = vcombine.low %v458_v60, %v468_v1  ;;  %v285_v12 = vrot.slane %v284_v61, 4  ;;  %3108 = vst [vmem:[#allocation5_spill] sm:$0xff] %v2341_v47  ;;  %v2348_v57 = vld [vmem:[%s2234_s27 + $0x80] sm:$0x1] }
  0x20   : > { %v472_v20 = vrot.slane %v470_v9, 4  ;;  %v483_v21 = vshrl.u32 %v2301_v59, 16  ;;  %v489_v22 = vshll.u32 %v2309_v0, 16  ;;  %v475_v25 = vrot.slane %v473_v14, 5  ;;  %3109 = vst [vmem:[#allocation6_spill] sm:$0xff] %v2348_v57 }
  0x21   : > { %v295_v19 = vrot.slane %v294_v2, 4  ;;  %2053 = vmatprep.mubr.msk.bf16.mxu1 %vm693_vm3, %v1872_v11  ;;  %v290_v24 = vsel %vm2279_vm4, %v285_v12, %v289_v56  ;;  %v481_v26 = vrot.slane %v479_v18, 5  ;;  %v302_v28 = vshrl.u32 %v2315_v10, 16  ;;  %v2354_v2 = vld [vmem:[%s2234_s27 + $0x24] sm:$0xf] }
  0x22   : > { %v485_v33 = vrot.slane %v483_v21, 4  ;;  %v491_v34 = vrot.slane %v489_v22, 5  ;;  %v305_v35 = vshll.u32 %v2315_v10, 16  ;;  %v476_v39 = vor.u32 %v475_v25, %v472_v20  ;;  %v2360_v12 = vld [vmem:[%s2234_s27 + $0x28] sm:$0xf] }
  0x23   : > { %v300_v29 = vsel %vm2279_vm4, %v295_v19, %v299_v3  ;;  %v304_v40 = vrot.slane %v302_v28, 4  ;;  %v311_v41 = vshll.u32 %v2322_v23, 16  ;;  %v315_v45 = vshrl.u32 %v2322_v23, 16  ;;  %v2366_v25 = vld [vmem:[%s2234_s27 + $0x2c] sm:$0x1] }
  0x24   : > { %v1865_v38 = vcombine.low %v290_v24, %v300_v29  ;;  %v486_v43 = vor.u32 %v485_v33, %v481_v26  ;;  %v307_v44 = vrot.slane %v305_v35, 5  ;;  %v321_v46 = vshll.u32 %v2328_v27, 16  ;;  %v2373_v35 = vld [vmem:[%s2234_s27 + $0x84] sm:$0xf]  ;;  %v2517_v0 = vld [vmem:[%s2234_s27 + $0x5c] sm:$0x1] }
  0x25   : > { %v477_v48 = vrot.slane %v476_v39, 4  ;;  %v313_v49 = vrot.slane %v311_v41, 5  ;;  %v494_v50 = vshrl.u32 %v2335_v37, 16  ;;  %v497_v51 = vshll.u32 %v2335_v37, 16  ;;  %v2541_v54 = vld [vmem:[%s2234_s27 + $0xbc] sm:$0x1] }
  0x26   : > { %2038 = vmatmul.mubr.msk.bf16.vlgmr.msra.gmra.mxu0 %vm693_vm3, %v1865_v38  ;;  %v487_v52 = vrot.slane %v486_v43, 4  ;;  %v308_v53 = vor.u32 %v307_v44, %v304_v40  ;;  %v317_v55 = vrot.slane %v315_v45, 4  ;;  %v323_v56 = vrot.slane %v321_v46, 5  ;;  %v2380_v43 = vld [vmem:[%s2234_s27 + $0x88] sm:$0xf] }
  0x27   : > { %2104 = vmatpush3.bf16.msra.mxu0 %v2240_v5  ;;  %v482_v58 = vsel %vm2279_vm4, %v477_v48, %v481_v26  ;;  %v496_v60 = vrot.slane %v494_v50, 4  ;;  %v499_v61 = vrot.slane %v497_v51, 5  ;;  %v503_v1 = vshll.u32 %v2341_v47, 16  ;;  %v2386_v51 = vld [vmem:[%s2234_s27 + $0x8c] sm:$0x1] }
  0x28   : > { %v492_v3 = vsel %vm2279_vm4, %v487_v52, %v491_v34  ;;  %v309_v9 = vrot.slane %v308_v53, 4  ;;  %v318_v5 = vor.u32 %v317_v55, %v313_v49  ;;  %v507_v11 = vshrl.u32 %v2341_v47, 16 }
  0x29   : > { %v1873_v14 = vcombine.low %v482_v58, %v492_v3  ;;  %v500_v18 = vor.u32 %v499_v61, %v496_v60  ;;  %v505_v19 = vrot.slane %v503_v1, 5  ;;  %v513_v20 = vshll.u32 %v2348_v57, 16  ;;  %v2394_v60 = vld [vmem:[%s2234_s27 + $0x30] sm:$0xf] }
  0x2a   : > { %v314_v21 = vsel %vm2279_vm4, %v309_v9, %v313_v49  ;;  %v319_v22 = vrot.slane %v318_v5, 4  ;;  %v509_v24 = vrot.slane %v507_v11, 4  ;;  %v326_v26 = vshrl.u32 %v2354_v2, 16  ;;  %v2399_v5 = vld [vmem:[%s2234_s27 + $0x34] sm:$0xf] }
  0x2b   : > { %2054 = vmatmul.mubr.msk.bf16.vlgmr.msra.gmra.mxu1 %vm693_vm3, %v1873_v14  ;;  %v501_v28 = vrot.slane %v500_v18, 4  ;;  %v515_v29 = vrot.slane %v513_v20, 5  ;;  %v329_v33 = vshll.u32 %v2354_v2, 16  ;;  %v335_v34 = vshll.u32 %v2360_v12, 16 }
  0x2c   : > { %2070 = vmatpush3.bf16.msra.mxu1 %v2237_v4  ;;  %v324_v38 = vsel %vm2279_vm4, %v319_v22, %v323_v56  ;;  %v510_v39 = vor.u32 %v509_v24, %v505_v19  ;;  %v328_v40 = vrot.slane %v326_v26, 4  ;;  %v339_v41 = vshrl.u32 %v2360_v12, 16 }
  0x2d   : > { %v1866_v44 = vcombine.low %v314_v21, %v324_v38  ;;  %v506_v45 = vsel %vm2279_vm4, %v501_v28, %v505_v19  ;;  %v331_v46 = vrot.slane %v329_v33, 5  ;;  %v337_v48 = vrot.slane %v335_v34, 5  ;;  %v2412_v38 = vld [vmem:[%s2234_s27 + $0x90] sm:$0xf] }
  0x2e   : > { %v511_v49 = vrot.slane %v510_v39, 4  ;;  %v341_v50 = vrot.slane %v339_v41, 4  ;;  %v345_v4 = vshll.u32 %v2366_v25, 16  ;;  %v518_v52 = vshrl.u32 %v2373_v35, 16 }
  0x2f   : > { %2041 = vmatprep.mubr.msk.bf16.mxu0 %vm693_vm3, %v1866_v44  ;;  %v332_v53 = vor.u32 %v331_v46, %v328_v40  ;;  %v521_v55 = vshll.u32 %v2373_v35, 16  ;;  %v527_v56 = vshll.u32 %v2380_v43, 16  ;;  %v531_v58 = vshrl.u32 %v2380_v43, 16 }
  0x30   : > { %v516_v61 = vsel %vm2279_vm4, %v511_v49, %v515_v29  ;;  %v342_v1 = vor.u32 %v341_v50, %v337_v48  ;;  %v347_v3 = vrot.slane %v345_v4, 5  ;;  %v520_v9 = vrot.slane %v518_v52, 4  ;;  %v2407_v29 = vld [vmem:[%s2234_s27 + $0x38] sm:$0x1] }
  0x31   : > { %v1874_v11 = vcombine.low %v506_v45, %v516_v61  ;;  %v333_v14 = vrot.slane %v332_v53, 4  ;;  %v523_v18 = vrot.slane %v521_v55, 5  ;;  %v529_v19 = vrot.slane %v527_v56, 5  ;;  %v2417_v45 = vld [vmem:[%s2234_s27 + $0x94] sm:$0xf] }
  0x32   : > { %v343_v20 = vrot.slane %v342_v1, 4  ;;  %v533_v21 = vrot.slane %v531_v58, 4  ;;  %v537_v22 = vshll.u32 %v2386_v51, 16  ;;  %v350_v24 = vshrl.u32 %v2394_v60, 16  ;;  %v2426_v61 = vld [vmem:[%s2234_s27 + $0x98] sm:$0x1] }
  0x33   : > { %2057 = vmatprep.mubr.msk.bf16.mxu1 %vm693_vm3, %v1874_v11  ;;  %v338_v26 = vsel %vm2279_vm4, %v333_v14, %v337_v48  ;;  %v524_v28 = vor.u32 %v523_v18, %v520_v9  ;;  %v353_v33 = vshll.u32 %v2394_v60, 16  ;;  %v359_v34 = vshll.u32 %v2399_v5, 16  ;;  %v2431_v9 = vld [vmem:[%s2234_s27 + $0x3c] sm:$0xf] }
  0x34   : > { %v348_v39 = vsel %vm2279_vm4, %v343_v20, %v347_v3  ;;  %v534_v40 = vor.u32 %v533_v21, %v529_v19  ;;  %v539_v41 = vrot.slane %v537_v22, 5  ;;  %v352_v44 = vrot.slane %v350_v24, 4  ;;  %v2436_v21 = vld [vmem:[%s2234_s27 + $0x40] sm:$0xf] }
  0x35   : > { %v1867_v46 = vcombine.low %v338_v26, %v348_v39  ;;  %v525_v48 = vrot.slane %v524_v28, 4  ;;  %v355_v49 = vrot.slane %v353_v33, 5  ;;  %v361_v50 = vrot.slane %v359_v34, 5 }
  0x36   : > { %v535_v4 = vrot.slane %v534_v40, 4  ;;  %v363_v52 = vshrl.u32 %v2399_v5, 16  ;;  %v369_v53 = vshll.u32 %v2407_v29, 16  ;;  %v542_v55 = vshrl.u32 %v2412_v38, 16 }
  0x37   : > { %2042 = vmatmul.mubr.msk.bf16.gmra.mxu0 %vm693_vm3, %v1867_v46  ;;  %v530_v56 = vsel %vm2279_vm4, %v525_v48, %v529_v19  ;;  %v356_v58 = vor.u32 %v355_v49, %v352_v44  ;;  %v545_v1 = vshll.u32 %v2412_v38, 16  ;;  %v551_v3 = vshll.u32 %v2417_v45, 16  ;;  %v2445_v44 = vld [vmem:[%s2234_s27 + $0x44] sm:$0x1]  ;;  %v2450_v49 = vld [vmem:[%s2234_s27 + $0x9c] sm:$0xf] }
  0x38   : > { %v540_v11 = vsel %vm2279_vm4, %v535_v4, %v539_v41  ;;  %v365_v14 = vrot.slane %v363_v52, 4  ;;  %v371_v18 = vrot.slane %v369_v53, 5  ;;  %v544_v20 = vrot.slane %v542_v55, 4 }
  0x39   : > { %v1875_v19 = vcombine.low %v530_v56, %v540_v11  ;;  %v357_v22 = vrot.slane %v356_v58, 4  ;;  %v547_v24 = vrot.slane %v545_v1, 5  ;;  %v553_v26 = vrot.slane %v551_v3, 5 }
  0x3a   : > { %v366_v28 = vor.u32 %v365_v14, %v361_v50  ;;  %v555_v33 = vshrl.u32 %v2417_v45, 16  ;;  %v561_v34 = vshll.u32 %v2426_v61, 16  ;;  %v374_v39 = vshrl.u32 %v2431_v9, 16 }
  0x3b   : > { %2058 = vmatmul.mubr.msk.bf16.gmra.mxu1 %vm693_vm3, %v1875_v19  ;;  %v362_v40 = vsel %vm2279_vm4, %v357_v22, %v361_v50  ;;  %v548_v41 = vor.u32 %v547_v24, %v544_v20  ;;  %v377_v46 = vshll.u32 %v2431_v9, 16  ;;  %v383_v48 = vshll.u32 %v2436_v21, 16  ;;  %v2457_v20 = vld [vmem:[%s2234_s27 + $0xa0] sm:$0xf] }
  0x3c   : > { %v367_v4 = vrot.slane %v366_v28, 4  ;;  %v557_v52 = vrot.slane %v555_v33, 4  ;;  %v563_v53 = vrot.slane %v561_v34, 5  ;;  %v376_v55 = vrot.slane %v374_v39, 4  ;;  %v2463_v34 = vld [vmem:[%s2234_s27 + $0xa4] sm:$0x1] }
  0x3d   : > { %v549_v56 = vrot.slane %v548_v41, 4  ;;  %v379_v58 = vrot.slane %v377_v46, 5  ;;  %v385_v1 = vrot.slane %v383_v48, 5  ;;  %v387_v50 = vshrl.u32 %v2436_v21, 16  ;;  %v2466_v39 = vld [vmem:[%s2234_s27 + $0x48] sm:$0xf] }
  0x3e   : > { %v372_v3 = vsel %vm2279_vm4, %v367_v4, %v371_v18  ;;  %v558_v11 = vor.u32 %v557_v52, %v553_v26  ;;  %v393_v14 = vshll.u32 %v2445_v44, 16  ;;  %v566_v19 = vshrl.u32 %v2450_v49, 16 }
  0x3f   : > { %v1868_v22 = vcombine.low %v362_v40, %v372_v3  ;;  %v554_v24 = vsel %vm2279_vm4, %v549_v56, %v553_v26  ;;  %v380_v28 = vor.u32 %v379_v58, %v376_v55  ;;  %v389_v33 = vrot.slane %v387_v50, 4  ;;  %v2476_v50 = vld [vmem:[%s2234_s27 + $0x4c] sm:$0xf] }
  0x40   : > { %v559_v41 = vrot.slane %v558_v11, 4  ;;  %v395_v18 = vrot.slane %v393_v14, 5  ;;  %v568_v46 = vrot.slane %v566_v19, 4  ;;  %v569_v48 = vshll.u32 %v2450_v49, 16 }
  0x41   : > { %2045 = vmatprep.mubr.msk.bf16.mxu0 %vm693_vm3, %v1868_v22  ;;  %v381_v4 = vrot.slane %v380_v28, 4  ;;  %v390_v40 = vor.u32 %v389_v33, %v385_v1  ;;  %v575_v52 = vshll.u32 %v2457_v20, 16  ;;  %v579_v26 = vshrl.u32 %v2457_v20, 16  ;;  %v2482_v28 = vld [vmem:[%s2234_s27 + $0x50] sm:$0x1] }
  0x42   : > { %v564_v55 = vsel %vm2279_vm4, %v559_v41, %v563_v53  ;;  %v571_v56 = vrot.slane %v569_v48, 5  ;;  %v585_v58 = vshll.u32 %v2463_v34, 16  ;;  %v398_v3 = vshrl.u32 %v2466_v39, 16  ;;  %v2485_v41 = vld [vmem:[%s2234_s27 + $0xa8] sm:$0xf] }
  0x43   : > { %v1876_v11 = vcombine.low %v554_v24, %v564_v55  ;;  %v386_v14 = vsel %vm2279_vm4, %v381_v4, %v385_v1  ;;  %v391_v19 = vrot.slane %v390_v40, 4  ;;  %v577_v22 = vrot.slane %v575_v52, 5  ;;  %3110 = vst [vmem:[#allocation7_spill] sm:$0xff] %v2485_v41  ;;  %v2495_v55 = vld [vmem:[%s2234_s27 + $0xac] sm:$0xf] }
  0x44   : > { %v572_v33 = vor.u32 %v571_v56, %v568_v46  ;;  %v581_v36 = vrot.slane %v579_v26, 4  ;;  %v587_v63 = vrot.slane %v585_v58, 5  ;;  %v400_v53 = vrot.slane %v398_v3, 4  ;;  %3111 = vst [vmem:[#allocation8_spill] sm:$0xff] %v2495_v55 }
  0x45   : > { %2061 = vmatprep.mubr.msk.bf16.mxu1 %vm693_vm3, %v1876_v11  ;;  %v396_v24 = vsel %vm2279_vm4, %v391_v19, %v395_v18  ;;  %v401_v48 = vshll.u32 %v2466_v39, 16  ;;  %v407_v1 = vshll.u32 %v2476_v50, 16  ;;  %v411_v4 = vshrl.u32 %v2476_v50, 16  ;;  %v2498_v11 = vld [vmem:[%s2234_s27 + $0xb0] sm:$0x1] }
  0x46   : > { %v1869_v40 = vcombine.low %v386_v14, %v396_v24  ;;  %v573_v52 = vrot.slane %v572_v33, 4  ;;  %v582_v46 = vor.u32 %v581_v36, %v577_v22  ;;  %v417_v26 = vshll.u32 %v2482_v28, 16  ;;  %3112 = vst [vmem:[#allocation9_spill] sm:$0xff] %v2498_v11 }
  0x47   : > { %v403_v56 = vrot.slane %v401_v48, 5  ;;  %v409_v58 = vrot.slane %v407_v1, 5  ;;  %v413_v3 = vrot.slane %v411_v4, 4  ;;  %v590_v18 = vshrl.u32 %v2485_v41, 16  ;;  %v2507_v1 = vld [vmem:[%s2234_s27 + $0x54] sm:$0xf] }
  0x48   : > { %2046 = vmatmul.mubr.msk.bf16.gmra.mxu0 %vm693_vm3, %v1869_v40  ;;  %v578_v14 = vsel %vm2279_vm4, %v573_v52, %v577_v22  ;;  %v583_v19 = vrot.slane %v582_v46, 4  ;;  %v419_v36 = vrot.slane %v417_v26, 5  ;;  %v593_v33 = vshll.u32 %v2485_v41, 16  ;;  %v2514_v46 = vld [vmem:[%s2234_s27 + $0x58] sm:$0xf] }
  0x49   : > { %v404_v24 = vor.u32 %v403_v56, %v400_v53  ;;  %v414_v15 = vor.u32 %v413_v3, %v409_v58  ;;  %v592_v62 = vrot.slane %v590_v18, 4  ;;  %v599_v48 = vshll.u32 %v2495_v55, 16 }
  0x4a   : > { %v588_v4 = vsel %vm2279_vm4, %v583_v19, %v587_v63  ;;  %v595_v40 = vrot.slane %v593_v33, 5  ;;  %v603_v22 = vshrl.u32 %v2495_v55, 16  ;;  %v609_v52 = vshll.u32 %v2498_v11, 16 }
  0x4b   : > { %v1877_v53 = vcombine.low %v578_v14, %v588_v4  ;;  %v405_v26 = vrot.slane %v404_v24, 4  ;;  %v415_v56 = vrot.slane %v414_v15, 4  ;;  %v601_v3 = vrot.slane %v599_v48, 5  ;;  %v2528_v24 = vld [vmem:[%s2234_s27 + $0xb4] sm:$0xf] }
  0x4c   : > { %v596_v18 = vor.u32 %v595_v40, %v592_v62  ;;  %v605_v57 = vrot.slane %v603_v22, 4  ;;  %v611_v37 = vrot.slane %v609_v52, 5  ;;  %v422_v63 = vshrl.u32 %v2507_v1, 16  ;;  %3113 = vst [vmem:[#allocation10_spill] sm:$0xff] %v2528_v24  ;;  %v2531_v22 = vld [vmem:[%s2234_s27 + $0xb8] sm:$0xf] }
  0x4d   : > { %2062 = vmatmul.mubr.msk.bf16.gmra.mxu1 %vm693_vm3, %v1877_v53  ;;  %v410_v19 = vsel %vm2279_vm4, %v405_v26, %v409_v58  ;;  %v420_v33 = vsel %vm2279_vm4, %v415_v56, %v419_v36  ;;  %v425_v14 = vshll.u32 %v2507_v1, 16  ;;  %v431_v15 = vshll.u32 %v2514_v46, 16 }
  0x4e   : > { %v1870_v62 = vcombine.low %v410_v19, %v420_v33  ;;  %v597_v48 = vrot.slane %v596_v18, 4  ;;  %v606_v4 = vor.u32 %v605_v57, %v601_v3  ;;  %v424_v40 = vrot.slane %v422_v63, 4 }
  0x4f   : > { %v427_v52 = vrot.slane %v425_v14, 5  ;;  %v433_v53 = vrot.slane %v431_v15, 5  ;;  %v435_v58 = vshrl.u32 %v2514_v46, 16  ;;  %v441_v26 = vshll.u32 %v2517_v0, 16 }
  0x50   : > { %2049 = vmatprep.mubr.msk.bf16.mxu0 %vm693_vm3, %v1870_v62  ;;  %v602_v36 = vsel %vm2279_vm4, %v597_v48, %v601_v3  ;;  %v607_v56 = vrot.slane %v606_v4, 4  ;;  %v614_v19 = vshrl.u32 %v2528_v24, 16  ;;  %v617_v18 = vshll.u32 %v2528_v24, 16 }
  0x51   : > { %v428_v57 = vor.u32 %v427_v52, %v424_v40  ;;  %v437_v63 = vrot.slane %v435_v58, 4  ;;  %v443_v33 = vrot.slane %v441_v26, 5  ;;  %v623_v14 = vshll.u32 %v2531_v22, 16 }
  0x52   : > { %v612_v15 = vsel %vm2279_vm4, %v607_v56, %v611_v37  ;;  %v616_v47 = vrot.slane %v614_v19, 4  ;;  %v619_v62 = vrot.slane %v617_v18, 5  ;;  %v627_v11 = vshrl.u32 %v2531_v22, 16 }
  0x53   : > { %v1878_v3 = vcombine.low %v602_v36, %v612_v15  ;;  %v429_v48 = vrot.slane %v428_v57, 4  ;;  %v438_v4 = vor.u32 %v437_v63, %v433_v53  ;;  %v625_v41 = vrot.slane %v623_v14, 5 }
  0x54   : > { %v620_v55 = vor.u32 %v619_v62, %v616_v47  ;;  %v629_v24 = vrot.slane %v627_v11, 4  ;;  %v633_v40 = vshll.u32 %v2541_v54, 16  ;;  %v1930_v37 = vrot.slane %v2243_v6, 9 }
  0x55   : > { %2065 = vmatprep.mubr.msk.bf16.mxu1 %vm693_vm3, %v1878_v3  ;;  %v434_v58 = vsel %vm2279_vm4, %v429_v48, %v433_v53  ;;  %v439_v26 = vrot.slane %v438_v4, 4  ;;  %v1225_v36 = vrot.slane %v2246_v7, 5  ;;  %v1898_v47 = vcombine.low %v2272_v30, %v2275_v31 }
  0x56   : > { %v621_v11 = vrot.slane %v620_v55, 4  ;;  %v630_v56 = vor.u32 %v629_v24, %v625_v41  ;;  %v635_v19 = vrot.slane %v633_v40, 5  ;;  %v1931_v18 = vrot.slane %v2272_v30, 9 }
  0x57   : > { %v444_v57 = vsel %vm2279_vm4, %v439_v26, %v443_v33  ;;  %v1226_v63 = vsel %vm2550_vm7, %v1930_v37, %v1225_v36  ;;  %v1227_v14 = vrot.slane %v1225_v36, 4  ;;  %v3116_v53 = vrot.slane %v2275_v31, 5 }
  0x58   : > { %v1871_v62 = vcombine.low %v434_v58, %v444_v57  ;;  %v626_v3 = vsel %vm2279_vm4, %v621_v11, %v625_v41  ;;  %v631_v48 = vrot.slane %v630_v56, 4  ;;  %v3118_v24 = vrot.slane %v2249_v8, 5 }
  0x59   : > { %v1234_v15 = vrot.slane %v3116_v53, 4  ;;  %v3117_v55 = vmov %v3116_v53  ;;  %v3119_v4 = vrot.slane %v2286_v42, 5  ;;  %v1899_v37 = vcombine.low %v2315_v10, %v2322_v23 }
  0x5a   : > { %v1233_v30 = vsel %vm2550_vm7, %v1931_v18, %v3117_v55  ;;  %v1229_v33 = vsel %vm2550_vm7, %v1227_v14, %v3118_v24  ;;  %v1932_v41 = vrot.slane %v2315_v10, 9  ;;  %2050 = vmatmul.mubr.msk.bf16.gmra.mxu0 %vm693_vm3, %v1871_v62  ;;  %v636_v31 = vsel %vm2279_vm4, %v631_v48, %v635_v19 }
  0x5b   : > { %v1236_v40 = vsel %vm2550_vm7, %v1234_v15, %v3119_v4  ;;  %v1948_v58 = vcombine.low %v1226_v63, %v1229_v33  ;;  %v1239_v26 = vrot.slane %v2322_v23, 5  ;;  %v1879_v36 = vcombine.low %v626_v3, %v636_v31 }
  0x5c   : > { %v1949_v8 = vcombine.low %v1233_v30, %v1236_v40  ;;  %v1242_v42 = vrot.slane %v2328_v27, 5  ;;  %v1246_v10 = vrot.slane %v2360_v12, 5  ;;  %v1933_v32 = vrot.slane %v2354_v2, 9 }
  0x5d   : > { %2105 = vmatprep.mubr.msk.bf16.mxu0 %vm693_vm3, %v1948_v58  ;;  %v1240_v11 = vsel %vm2550_vm7, %v1932_v41, %v1239_v26  ;;  %v1241_v56 = vrot.slane %v1239_v26, 4  ;;  %2066 = vmatmul.mubr.msk.bf16.gmra.mxu1 %vm693_vm3, %v1879_v36  ;;  %v1934_v19 = vrot.slane %v2394_v60, 9  ;;  %v1253_v18 = vrot.slane %v2399_v5, 5 }
  0x5e   : > { %v3120_v23 = vcombine.low %v2243_v6, %v2246_v7  ;;  %v1248_v57 = vrot.slane %v1246_v10, 4  ;;  %v1249_v63 = vrot.slane %v2366_v25, 5  ;;  %v1256_v14 = vrot.slane %v2407_v29, 5 }
  0x5f   : > { %v1243_v27 = vsel %vm2550_vm7, %v1241_v56, %v1242_v42  ;;  %v1255_v15 = vrot.slane %v1253_v18, 4  ;;  %v1260_v62 = vrot.slane %v2436_v21, 5  ;;  %v1247_v3 = vsel %vm2550_vm7, %v1933_v32, %v1246_v10 }
  0x60   : > { %2071 = vmatprep.mubr.msk.bf16.mxu1 %vm693_vm3, %v3120_v23  ;;  %v1950_v53 = vcombine.low %v1240_v11, %v1243_v27  ;;  %v1254_v6 = vsel %vm2550_vm7, %v1934_v19, %v1253_v18  ;;  %v1267_v7 = vrot.slane %v2476_v50, 5  ;;  %v1250_v48 = vsel %vm2550_vm7, %v1248_v57, %v1249_v63 }
  0x61   : > { %v1257_v25 = vsel %vm2550_vm7, %v1255_v15, %v1256_v14  ;;  %v1935_v29 = vrot.slane %v2431_v9, 9  ;;  %v1263_v55 = vrot.slane %v2445_v44, 5  ;;  %v1262_v30 = vrot.slane %v1260_v62, 4 }
  0x62   : > { %2106 = vmatmul.mubr.msk.bf16.vlgmr.msra.gmra.mxu0 %vm693_vm3, %v1949_v8  ;;  %v1936_v24 = vrot.slane %v2466_v39, 9  ;;  %v1269_v33 = vrot.slane %v1267_v7, 4  ;;  %v1270_v4 = vrot.slane %v2482_v28, 5  ;;  %v1951_v40 = vcombine.low %v1247_v3, %v1250_v48 }
  0x63   : > { %2109 = vmatprep.mubr.msk.bf16.mxu0 %vm693_vm3, %v1950_v53  ;;  %v1952_v41 = vcombine.low %v1254_v6, %v1257_v25  ;;  %v1261_v31 = vsel %vm2550_vm7, %v1935_v29, %v1260_v62  ;;  %v1264_v44 = vsel %vm2550_vm7, %v1262_v30, %v1263_v55  ;;  %v1274_v28 = vrot.slane %v2514_v46, 5  ;;  %v3121_v25 = vld [vmem:[#allocation8_spill] sm:$0xff]  ;;  %v3122_v29 = vld [vmem:[#allocation7_spill] sm:$0xff] }
  0x64   : > { %v1268_v58 = vsel %vm2550_vm7, %v1936_v24, %v1267_v7  ;;  %v1271_v8 = vsel %vm2550_vm7, %v1269_v33, %v1270_v4  ;;  %v1938_v26 = vrot.slane %v2256_v13, 9  ;;  %v1281_v36 = vrot.slane %v2261_v16, 5  ;;  %v3123_v4 = vld [vmem:[#allocation9_spill] sm:$0xff] }
  0x65   : > { %2072 = vmatmul.mubr.msk.bf16.vlgmr.msra.gmra.mxu1 %vm693_vm3, %v1898_v47  ;;  %v1284_v47 = vrot.slane %v2264_v17, 5  ;;  %v1900_v42 = vcombine.low %v2354_v2, %v2360_v12  ;;  %v1901_v11 = vcombine.low %v2394_v60, %v2399_v5  ;;  %v1902_v56 = vcombine.low %v2431_v9, %v2436_v21 }
  0x66   : > { %2075 = vmatprep.mubr.msk.bf16.mxu1 %vm693_vm3, %v1899_v37  ;;  %v1937_v37 = vrot.slane %v2507_v1, 9  ;;  %v1903_v10 = vcombine.low %v2466_v39, %v2476_v50  ;;  %v1953_v17 = vcombine.low %v1261_v31, %v1264_v44  ;;  %v1954_v32 = vcombine.low %v1268_v58, %v1271_v8 }
  0x67   : > { %v1277_v19 = vrot.slane %v2517_v0, 5  ;;  %v1908_v18 = vcombine.low %v2373_v35, %v2380_v43  ;;  %v1276_v2 = vrot.slane %v1274_v28, 4  ;;  %v1941_v12 = vrot.slane %v2373_v35, 9 }
  0x68   : > { %v1302_v60 = vrot.slane %v2380_v43, 5  ;;  %v1305_v5 = vrot.slane %v2386_v51, 5  ;;  %v1275_v9 = vsel %vm2550_vm7, %v1937_v37, %v1274_v28  ;;  %v1282_v21 = vsel %vm2550_vm7, %v1938_v26, %v1281_v36 }
  0x69   : > { %v1283_v39 = vrot.slane %v1281_v36, 4  ;;  %v1909_v0 = vcombine.low %v2412_v38, %v2417_v45  ;;  %v1942_v27 = vrot.slane %v2412_v38, 9  ;;  %v1309_v51 = vrot.slane %v2417_v45, 5 }
  0x6a   : > { %2110 = vmatmul.mubr.msk.bf16.gmra.mxu0 %vm693_vm3, %v1951_v40  ;;  %v2662_v50 = vsel %vm2550_vm7, %v1941_v12, %v1302_v60  ;;  %v1304_v23 = vrot.slane %v1302_v60, 4  ;;  %v1288_v57 = vrot.slane %v2301_v59, 5  ;;  %v1312_v63 = vrot.slane %v2426_v61, 5  ;;  %v3126_v60 = vld [vmem:[#allocation2_spill] sm:$0xff] }
  0x6b   : > { %2113 = vmatprep.mubr.msk.bf16.mxu0 %vm693_vm3, %v1952_v41  ;;  %v1910_v14 = vcombine.low %v2450_v49, %v2457_v20  ;;  %v1943_v53 = vrot.slane %v2450_v49, 9  ;;  %v1278_v15 = vsel %vm2550_vm7, %v1276_v2, %v1277_v19  ;;  %v1310_v3 = vsel %vm2550_vm7, %v1942_v27, %v1309_v51  ;;  %v3127_v27 = vld [vmem:[#allocation3_spill] sm:$0xff] }
  0x6c   : > { %v1306_v62 = vsel %vm2550_vm7, %v1304_v23, %v1305_v5  ;;  %v1311_v6 = vrot.slane %v1309_v51, 4  ;;  %v1316_v48 = vrot.slane %v2457_v20, 5  ;;  %v1319_v61 = vrot.slane %v2463_v34, 5  ;;  %v3124_v34 = vld [vmem:[#allocation10_spill] sm:$0xff]  ;;  %v3128_v51 = vld [vmem:[#allocation4_spill] sm:$0xff] }
  0x6d   : > { %2076 = vmatmul.mubr.msk.bf16.gmra.mxu1 %vm693_vm3, %v1900_v42  ;;  %v1959_v7 = vcombine.low %v2662_v50, %v1306_v62  ;;  %v1911_v55 = vcombine.low %v3122_v29, %v3121_v25  ;;  %v1944_v24 = vrot.slane %v3122_v29, 9  ;;  %v1323_v33 = vrot.slane %v3121_v25, 5  ;;  %v3125_v42 = vld [vmem:[#allocation5_spill] sm:$0xff]  ;;  %v3129_v62 = vld [vmem:[#allocation6_spill] sm:$0xff] }
  0x6e   : > { %2079 = vmatprep.mubr.msk.bf16.mxu1 %vm693_vm3, %v1901_v11  ;;  %v1313_v30 = vsel %vm2550_vm7, %v1311_v6, %v1312_v63  ;;  %v1326_v40 = vrot.slane %v3123_v4, 5  ;;  %v1317_v31 = vsel %vm2550_vm7, %v1943_v53, %v1316_v48  ;;  %v1318_v44 = vrot.slane %v1316_v48, 4 }
  0x6f   : > { %v1960_v41 = vcombine.low %v1310_v3, %v1313_v30  ;;  %v1912_v58 = vcombine.low %v3124_v34, %v2531_v22  ;;  %v1324_v8 = vsel %vm2550_vm7, %v1944_v24, %v1323_v33  ;;  %v1325_v28 = vrot.slane %v1323_v33, 4 }
  0x70   : > { %v1945_v37 = vrot.slane %v3124_v34, 9  ;;  %v1330_v26 = vrot.slane %v2531_v22, 5  ;;  %v1285_v36 = vsel %vm2550_vm7, %v1283_v39, %v1284_v47  ;;  %v1295_v11 = vrot.slane %v3125_v42, 5 }
  0x71   : > { %v1333_v19 = vrot.slane %v2541_v54, 5  ;;  %v1327_v2 = vsel %vm2550_vm7, %v1325_v28, %v1326_v40  ;;  %v1955_v47 = vcombine.low %v1275_v9, %v1278_v15  ;;  %v1939_v5 = vrot.slane %v3126_v60, 9 }
  0x72   : > { %2114 = vmatmul.mubr.msk.bf16.gmra.mxu0 %vm693_vm3, %v1953_v17  ;;  %v1320_v17 = vsel %vm2550_vm7, %v1318_v44, %v1319_v61  ;;  %v1331_v12 = vsel %vm2550_vm7, %v1945_v37, %v1330_v26  ;;  %v1332_v22 = vrot.slane %v1330_v26, 4  ;;  %v1962_v39 = vcombine.low %v1324_v8, %v1327_v2 }
  0x73   : > { %2117 = vmatprep.mubr.msk.bf16.mxu0 %vm693_vm3, %v1954_v32  ;;  %v1961_v32 = vcombine.low %v1317_v31, %v1320_v17  ;;  %v1956_v50 = vcombine.low %v1282_v21, %v1285_v36  ;;  %v1290_v23 = vrot.slane %v1288_v57, 4  ;;  %v1291_v54 = vrot.slane %v3127_v27, 5 }
  0x74   : > { %v1940_v63 = vrot.slane %v3128_v51, 9  ;;  %v1297_v53 = vrot.slane %v1295_v11, 4  ;;  %v1298_v3 = vrot.slane %v3129_v62, 5  ;;  %v1905_v9 = vcombine.low %v2256_v13, %v2261_v16 }
  0x75   : > { %2080 = vmatmul.mubr.msk.bf16.gmra.mxu1 %vm693_vm3, %v1902_v56  ;;  %v1334_v56 = vsel %vm2550_vm7, %v1332_v22, %v1333_v19  ;;  %v1289_v21 = vsel %vm2550_vm7, %v1939_v5, %v1288_v57  ;;  %v1292_v15 = vsel %vm2550_vm7, %v1290_v23, %v1291_v54  ;;  %v1906_v16 = vcombine.low %v3126_v60, %v2301_v59 }
  0x76   : > { %2083 = vmatprep.mubr.msk.bf16.mxu1 %vm693_vm3, %v1903_v10  ;;  %v1963_v6 = vcombine.low %v1331_v12, %v1334_v56  ;;  %v1904_v10 = vcombine.low %v2507_v1, %v2514_v46  ;;  %v1296_v48 = vsel %vm2550_vm7, %v1940_v63, %v1295_v11  ;;  %v1299_v61 = vsel %vm2550_vm7, %v1297_v53, %v1298_v3 }
  0x77   : > { %v1957_v1 = vcombine.low %v1289_v21, %v1292_v15  ;;  %v1958_v13 = vcombine.low %v1296_v48, %v1299_v61  ;;  %v1907_v46 = vcombine.low %v3128_v51, %v3125_v42 }
  0x7a   : > { %2118 = vmatmul.mubr.msk.bf16.gmra.mxu0 %vm693_vm3, %v1955_v47 }
  0x7b   : > { %2121 = vmatprep.mubr.msk.bf16.mxu0 %vm693_vm3, %v1956_v50 }
  0x7d   : > { %2084 = vmatmul.mubr.msk.bf16.gmra.mxu1 %vm693_vm3, %v1904_v10 }
  0x7e   : > { %2087 = vmatprep.mubr.msk.bf16.mxu1 %vm693_vm3, %v1905_v9 }
  0x82   : > { %2122 = vmatmul.mubr.msk.bf16.gmra.mxu0 %vm693_vm3, %v1957_v1 }
  0x83   : > { %2125 = vmatprep.mubr.msk.bf16.mxu0 %vm693_vm3, %v1958_v13 }
  0x85   : > { %2088 = vmatmul.mubr.msk.bf16.gmra.mxu1 %vm693_vm3, %v1906_v16 }
  0x86   : > { %2091 = vmatprep.mubr.msk.bf16.mxu1 %vm693_vm3, %v1907_v46 }
  0x8a   : > { %2126 = vmatmul.mubr.msk.bf16.gmra.mxu0 %vm693_vm3, %v1959_v7 }
  0x8b   : > { %2129 = vmatprep.mubr.msk.bf16.mxu0 %vm693_vm3, %v1960_v41 }
  0x8d   : > { %2092 = vmatmul.mubr.msk.bf16.gmra.mxu1 %vm693_vm3, %v1908_v18 }
  0x8e   : > { %2095 = vmatprep.mubr.msk.bf16.mxu1 %vm693_vm3, %v1909_v0 }
  0x92   : > { %2130 = vmatmul.mubr.msk.bf16.gmra.mxu0 %vm693_vm3, %v1961_v32 }
  0x93   : > { %2133 = vmatprep.mubr.msk.bf16.mxu0 %vm693_vm3, %v1962_v39 }
  0x95   : > { %2096 = vmatmul.mubr.msk.bf16.gmra.mxu1 %vm693_vm3, %v1910_v14 }
  0x96   : > { %2099 = vmatprep.mubr.msk.bf16.mxu1 %vm693_vm3, %v1911_v55 }
  0x9a   : > { %2134 = vmatmul.mubr.msk.bf16.gmra.mxu0 %vm693_vm3, %v1963_v6 }
  0x9d   : > { %2100 = vmatmul.mubr.msk.bf16.gmra.mxu1 %vm693_vm3, %v1912_v58 }
  0xe6   : > { %v2039_v59 = vpop.f32.mrf.mxu0 }
  0xe8   : > { %v780_v43 = vpop.f32.mrf.mxu0 }
  0xea   : > { %v2040_v45 = vpop.f32.mrf.mxu0 }
  0xeb   : > { %v2759_v35 = vpop.f32.mrf.mxu1 }
  0xec   : > { %v783_v18 = vpop.f32.mrf.mxu0 }
  0xed   : > { %v2761_v38 = vpop.f32.mrf.mxu1 }
  0xef   : > { %v2763_v52 = vpop.f32.mrf.mxu1 }
  0xf1   : > { %v2765_v0 = vpop.f32.mrf.mxu1 }
  0xf7   : > { %v2043_v49 = vpop.f32.mrf.mxu0 }
  0xf9   : > { %v796_v57 = vpop.f32.mrf.mxu0 }
  0xfb   : > { %v2767_v20 = vpop.f32.mrf.mxu1  ;;  %v2044_v7 = vpop.f32.mrf.mxu0 }
  0xfd   : > { %v2769_v14 = vpop.f32.mrf.mxu1  ;;  %v799_v29 = vpop.f32.mrf.mxu0 }
  0xff   : > { %v2771_v25 = vpop.f32.mrf.mxu1 }
 0x101   : > { %v2773_v55 = vpop.f32.mrf.mxu1 }
 0x108   : > { %v2775_v30 = vpop.f32.mrf.mxu0 }
 0x10a   : > { %v2779_v33 = vpop.f32.mrf.mxu0 }
 0x10c   : > { %v2783_v40 = vpop.f32.mrf.mxu0 }
 0x10d   : > { %v2777_v24 = vpop.f32.mrf.mxu1 }
 0x10e   : > { %v2787_v31 = vpop.f32.mrf.mxu0 }
 0x10f   : > { %v2781_v4 = vpop.f32.mrf.mxu1 }
 0x111   : > { %v2785_v41 = vpop.f32.mrf.mxu1 }
 0x113   : > { %v2789_v44 = vpop.f32.mrf.mxu1 }
 0x11a   : > { %v2792_v34 = vpop.f32.mrf.mxu0 }
 0x11c   : > { %v2794_v58 = vpop.f32.mrf.mxu0 }
 0x11d   : > { %v2796_v8 = vpop.f32.mrf.mxu1 }
 0x11e   : > { %v2798_v28 = vpop.f32.mrf.mxu0 }
 0x11f   : > { %v2800_v37 = vpop.f32.mrf.mxu1 }
 0x120   : > { %v2802_v26 = vpop.f32.mrf.mxu0 }
 0x121   : > { %v2804_v36 = vpop.f32.mrf.mxu1 }
 0x122   : > { %v2107_v42 = vpop.f32.mrf.mxu0 }
 0x123   : > { %v2806_v11 = vpop.f32.mrf.mxu1 }
 0x124   : > { %v1476_v17 = vpop.f32.mrf.mxu0 }
 0x125   : > { %v2073_v19 = vpop.f32.mrf.mxu1 }
 0x126   : > { %v1086_v32 = vadd.f32 %v2073_v19, %v2039_v59  ;;  %v2108_v2 = vpop.f32.mrf.mxu0 }
 0x127   : > { %v1077_v12 = vpop.f32.mrf.mxu1 }
 0x128   : > { %v2813_v22 = vadd.f32 %v2107_v42, %v1086_v32  ;;  %v1078_v47 = vadd.f32 %v1077_v12, %v780_v43  ;;  %v1479_v60 = vpop.f32.mrf.mxu0 }
 0x129   : > { %v2074_v5 = vpop.f32.mrf.mxu1 }
 0x12a   : > { %1637 = vst [vmem:[%s2811_s6 + $0x10] sm:$0xff] %v2813_v22  ;;  %v2817_v39 = vadd.f32 %v1476_v17, %v1078_v47  ;;  %v1089_v50 = vadd.f32 %v2074_v5, %v2040_v45  ;;  %v2111_v23 = vpop.f32.mrf.mxu0 }
 0x12b   : > { %v1080_v27 = vpop.f32.mrf.mxu1 }
 0x12c   : > { %1635 = vst [vmem:[%s2811_s6] sm:$0xff] %v2817_v39  ;;  %v2821_v54 = vadd.f32 %v2108_v2, %v1089_v50  ;;  %v1081_v56 = vadd.f32 %v1080_v27, %v783_v18  ;;  %v1492_v51 = vpop.f32.mrf.mxu0 }
 0x12d   : > { %v2077_v63 = vpop.f32.mrf.mxu1 }
 0x12e   : > { %1638 = vst [vmem:[%s2811_s6 + $0x18] sm:$0xff] %v2821_v54  ;;  %v2825_v53 = vadd.f32 %v1479_v60, %v1081_v56  ;;  %v1102_v62 = vadd.f32 %v2077_v63, %v2043_v49  ;;  %v2112_v3 = vpop.f32.mrf.mxu0 }
 0x12f   : > { %v1093_v6 = vpop.f32.mrf.mxu1 }
 0x130   : > { %1636 = vst [vmem:[%s2811_s6 + $0x8] sm:$0xff] %v2825_v53  ;;  %v2829_v10 = vadd.f32 %v2111_v23, %v1102_v62  ;;  %v1094_v9 = vadd.f32 %v1093_v6, %v796_v57  ;;  %v1495_v21 = vpop.f32.mrf.mxu0 }
 0x131   : > { %v2078_v15 = vpop.f32.mrf.mxu1 }
 0x132   : > { %1641 = vst [vmem:[%s2811_s6 + $0x30] sm:$0xff] %v2829_v10  ;;  %v2833_v48 = vadd.f32 %v1492_v51, %v1094_v9  ;;  %v1105_v61 = vadd.f32 %v2078_v15, %v2044_v7  ;;  %v2115_v1 = vpop.f32.mrf.mxu0 }
 0x133   : > { %v1096_v13 = vpop.f32.mrf.mxu1 }
 0x134   : > { %1639 = vst [vmem:[%s2811_s6 + $0x20] sm:$0xff] %v2833_v48  ;;  %v2837_v16 = vadd.f32 %v2112_v3, %v1105_v61  ;;  %v1097_v46 = vadd.f32 %v1096_v13, %v799_v29  ;;  %v1508_v59 = vpop.f32.mrf.mxu0 }
 0x135   : > { %v2081_v43 = vpop.f32.mrf.mxu1 }
 0x136   : > { %1642 = vst [vmem:[%s2811_s6 + $0x38] sm:$0xff] %v2837_v16  ;;  %v2841_v45 = vadd.f32 %v1495_v21, %v1097_v46  ;;  %v1118_v18 = vadd.f32 %v2081_v43, %v2775_v30  ;;  %v2116_v49 = vpop.f32.mrf.mxu0 }
 0x137   : > { %v1109_v57 = vpop.f32.mrf.mxu1 }
 0x138   : > { %1640 = vst [vmem:[%s2811_s6 + $0x28] sm:$0xff] %v2841_v45  ;;  %v2846_v7 = vadd.f32 %v2115_v1, %v1118_v18  ;;  %v1110_v42 = vadd.f32 %v1109_v57, %v2779_v33  ;;  %v1511_v17 = vpop.f32.mrf.mxu0 }
 0x139   : > { %v2082_v29 = vpop.f32.mrf.mxu1 }
 0x13a   : > { %1645 = vst [vmem:[%s2811_s6 + $0x50] sm:$0xff] %v2846_v7  ;;  %v2851_v19 = vadd.f32 %v1508_v59, %v1110_v42  ;;  %v1121_v32 = vadd.f32 %v2082_v29, %v2783_v40  ;;  %v2119_v2 = vpop.f32.mrf.mxu0 }
 0x13b   : > { %v1112_v30 = vpop.f32.mrf.mxu1 }
 0x13c   : > { %1643 = vst [vmem:[%s2811_s6 + $0x40] sm:$0xff] %v2851_v19  ;;  %v2856_v12 = vadd.f32 %v2116_v49, %v1121_v32  ;;  %v1113_v47 = vadd.f32 %v1112_v30, %v2787_v31  ;;  %v1524_v60 = vpop.f32.mrf.mxu0 }
 0x13d   : > { %v2085_v33 = vpop.f32.mrf.mxu1 }
 0x13e   : > { %1646 = vst [vmem:[%s2811_s6 + $0x58] sm:$0xff] %v2856_v12  ;;  %v2861_v5 = vadd.f32 %v1511_v17, %v1113_v47  ;;  %v1134_v50 = vadd.f32 %v2085_v33, %v2792_v34  ;;  %v2120_v23 = vpop.f32.mrf.mxu0 }
 0x13f   : > { %v1125_v40 = vpop.f32.mrf.mxu1 }
 0x140   : > { %1644 = vst [vmem:[%s2811_s6 + $0x48] sm:$0xff] %v2861_v5  ;;  %v2866_v27 = vadd.f32 %v2119_v2, %v1134_v50  ;;  %v1126_v56 = vadd.f32 %v1125_v40, %v2794_v58  ;;  %v1527_v51 = vpop.f32.mrf.mxu0 }
 0x141   : > { %v2086_v31 = vpop.f32.mrf.mxu1 }
 0x142   : > { %1649 = vst [vmem:[%s2811_s6 + $0x70] sm:$0xff] %v2866_v27  ;;  %v2871_v63 = vadd.f32 %v1524_v60, %v1126_v56  ;;  %v1137_v62 = vadd.f32 %v2086_v31, %v2798_v28  ;;  %v2123_v3 = vpop.f32.mrf.mxu0 }
 0x143   : > { %v1128_v34 = vpop.f32.mrf.mxu1 }
 0x144   : > { %1647 = vst [vmem:[%s2811_s6 + $0x60] sm:$0xff] %v2871_v63  ;;  %v2876_v6 = vadd.f32 %v2120_v23, %v1137_v62  ;;  %v1129_v9 = vadd.f32 %v1128_v34, %v2802_v26  ;;  %v1540_v21 = vpop.f32.mrf.mxu0 }
 0x145   : > { %v2089_v58 = vpop.f32.mrf.mxu1 }
 0x146   : > { %1650 = vst [vmem:[%s2811_s6 + $0x78] sm:$0xff] %v2876_v6  ;;  %v2881_v15 = vadd.f32 %v1527_v51, %v1129_v9  ;;  %v1150_v61 = vadd.f32 %v2089_v58, %v2759_v35  ;;  %v2124_v1 = vpop.f32.mrf.mxu0 }
 0x147   : > { %v1141_v28 = vpop.f32.mrf.mxu1 }
 0x148   : > { %1648 = vst [vmem:[%s2811_s6 + $0x68] sm:$0xff] %v2881_v15  ;;  %v2886_v13 = vadd.f32 %v2123_v3, %v1150_v61  ;;  %v1142_v46 = vadd.f32 %v1141_v28, %v2761_v38  ;;  %v1543_v59 = vpop.f32.mrf.mxu0 }
 0x149   : > { %v2090_v26 = vpop.f32.mrf.mxu1 }
 0x14a   : > { %1653 = vst [vmem:[%s2811_s6 + $0x90] sm:$0xff] %v2886_v13  ;;  %v2891_v43 = vadd.f32 %v1540_v21, %v1142_v46  ;;  %v1153_v18 = vadd.f32 %v2090_v26, %v2763_v52  ;;  %v2127_v49 = vpop.f32.mrf.mxu0 }
 0x14b   : > { %v1144_v35 = vpop.f32.mrf.mxu1 }
 0x14c   : > { %1651 = vst [vmem:[%s2811_s6 + $0x80] sm:$0xff] %v2891_v43  ;;  %v2896_v57 = vadd.f32 %v2124_v1, %v1153_v18  ;;  %v1145_v42 = vadd.f32 %v1144_v35, %v2765_v0  ;;  %v1556_v17 = vpop.f32.mrf.mxu0 }
 0x14d   : > { %v2093_v38 = vpop.f32.mrf.mxu1 }
 0x14e   : > { %1654 = vst [vmem:[%s2811_s6 + $0x98] sm:$0xff] %v2896_v57  ;;  %v2901_v29 = vadd.f32 %v1543_v59, %v1145_v42  ;;  %v1166_v32 = vadd.f32 %v2093_v38, %v2767_v20  ;;  %v2128_v2 = vpop.f32.mrf.mxu0 }
 0x14f   : > { %v1157_v52 = vpop.f32.mrf.mxu1 }
 0x150   : > { %1652 = vst [vmem:[%s2811_s6 + $0x88] sm:$0xff] %v2901_v29  ;;  %v2906_v30 = vadd.f32 %v2127_v49, %v1166_v32  ;;  %v1158_v47 = vadd.f32 %v1157_v52, %v2769_v14  ;;  %v1559_v60 = vpop.f32.mrf.mxu0 }
 0x151   : > { %v2094_v0 = vpop.f32.mrf.mxu1 }
 0x152   : > { %1657 = vst [vmem:[%s2811_s6 + $0xb0] sm:$0xff] %v2906_v30  ;;  %v2911_v33 = vadd.f32 %v1556_v17, %v1158_v47  ;;  %v1169_v50 = vadd.f32 %v2094_v0, %v2771_v25  ;;  %v2131_v23 = vpop.f32.mrf.mxu0 }
 0x153   : > { %v1160_v20 = vpop.f32.mrf.mxu1 }
 0x154   : > { %1655 = vst [vmem:[%s2811_s6 + $0xa0] sm:$0xff] %v2911_v33  ;;  %v2916_v40 = vadd.f32 %v2128_v2, %v1169_v50  ;;  %v1161_v56 = vadd.f32 %v1160_v20, %v2773_v55  ;;  %v1572_v51 = vpop.f32.mrf.mxu0 }
 0x155   : > { %v2097_v14 = vpop.f32.mrf.mxu1 }
 0x156   : > { %1658 = vst [vmem:[%s2811_s6 + $0xb8] sm:$0xff] %v2916_v40  ;;  %v2921_v31 = vadd.f32 %v1559_v60, %v1161_v56  ;;  %v1182_v62 = vadd.f32 %v2097_v14, %v2777_v24  ;;  %v2132_v3 = vpop.f32.mrf.mxu0 }
 0x157   : > { %v1173_v25 = vpop.f32.mrf.mxu1 }
 0x158   : > { %1656 = vst [vmem:[%s2811_s6 + $0xa8] sm:$0xff] %v2921_v31  ;;  %v2926_v34 = vadd.f32 %v2131_v23, %v1182_v62  ;;  %v1174_v9 = vadd.f32 %v1173_v25, %v2781_v4  ;;  %v1575_v21 = vpop.f32.mrf.mxu0 }
 0x159   : > { %v2098_v55 = vpop.f32.mrf.mxu1 }
 0x15a   : > { %1661 = vst [vmem:[%s2811_s6 + $0xd0] sm:$0xff] %v2926_v34  ;;  %v2931_v58 = vadd.f32 %v1572_v51, %v1174_v9  ;;  %v1185_v61 = vadd.f32 %v2098_v55, %v2785_v41  ;;  %v2135_v1 = vpop.f32.mrf.mxu0 }
 0x15b   : > { %v1176_v24 = vpop.f32.mrf.mxu1 }
 0x15c   : > { %1659 = vst [vmem:[%s2811_s6 + $0xc0] sm:$0xff] %v2931_v58  ;;  %v2936_v28 = vadd.f32 %v2132_v3, %v1185_v61  ;;  %v1177_v46 = vadd.f32 %v1176_v24, %v2789_v44  ;;  %v1588_v59 = vpop.f32.mrf.mxu0 }
 0x15d   : > { %v2101_v4 = vpop.f32.mrf.mxu1 }
 0x15e   : > { %1662 = vst [vmem:[%s2811_s6 + $0xd8] sm:$0xff] %v2936_v28  ;;  %v2941_v26 = vadd.f32 %v1575_v21, %v1177_v46  ;;  %v1198_v18 = vadd.f32 %v2101_v4, %v2796_v8  ;;  %v2136_v44 = vpop.f32.mrf.mxu0 }
 0x15f   : > { %v1189_v41 = vpop.f32.mrf.mxu1 }
 0x160   : > { %1660 = vst [vmem:[%s2811_s6 + $0xc8] sm:$0xff] %v2941_v26  ;;  %v2946_v49 = vadd.f32 %v2135_v1, %v1198_v18  ;;  %v1190_v35 = vadd.f32 %v1189_v41, %v2800_v37  ;;  %v1591_v52 = vpop.f32.mrf.mxu0 }
 0x161   : > { %v2102_v42 = vpop.f32.mrf.mxu1 }
 0x162   : > { %1665 = vst [vmem:[%s2811_s6 + $0xf0] sm:$0xff] %v2946_v49  ;;  %v2951_v17 = vadd.f32 %v1588_v59, %v1190_v35  ;;  %v1201_v38 = vadd.f32 %v2102_v42, %v2804_v36 }
 0x163   : > { %v1192_v32 = vpop.f32.mrf.mxu1 }
 0x164   : > { %1663 = vst [vmem:[%s2811_s6 + $0xe0] sm:$0xff] %v2951_v17  ;;  %v2956_v8 = vadd.f32 %v2136_v44, %v1201_v38  ;;  %v1193_v2 = vadd.f32 %v1192_v32, %v2806_v11  ;;  %1670 = sbr.rel (%p1981_p5) target bundleno = 363 (0x16b), region = 32 }
 0x166   : > { %1666 = vst [vmem:[%s2811_s6 + $0xf8] sm:$0xff] %v2956_v8  ;;  %v2961_v47 = vadd.f32 %v1591_v52, %v1193_v2 }
 0x168   : > { %1664 = vst [vmem:[%s2811_s6 + $0xe8] sm:$0xff] %v2961_v47 }
 0x169   : > { %v2180_v37 = vmov 0.0  }
 0x16a   : > { %1671 = vst [vmem:[%s3086_s3] sm:$0x1] %v2180_v37  ;;  %1672 = vst [vmem:[%s3087_s4] sm:$0x1] %v2180_v37 }
 0x16b PF: > { %v1674_v36 = vadd.f32 %v2825_v53, %v2817_v39  ;;  %v1714_v0 = vmul.f32 %v2817_v39, %v2817_v39  ;;  %v1715_v50 = vmul.f32 %v2825_v53, %v2825_v53  ;;  %v1716_v20 = vmul.f32 %v2813_v22, %v2813_v22 }
 0x16c   : > { %v1717_v51 = vmul.f32 %v2821_v54, %v2821_v54  ;;  %v1718_v3 = vmul.f32 %v2833_v48, %v2833_v48  ;;  %v1719_v53 = vmul.f32 %v2841_v45, %v2841_v45  ;;  %v1720_v21 = vmul.f32 %v2829_v10, %v2829_v10 }
 0x16d   : > { %v1675_v11 = vadd.f32 %v1674_v36, %v2813_v22  ;;  %v1746_v14 = vadd.f32 %v1715_v50, %v1714_v0  ;;  %v1721_v61 = vmul.f32 %v2837_v16, %v2837_v16  ;;  %v1722_v24 = vmul.f32 %v2851_v19, %v2851_v19 }
 0x16e   : > { %v1723_v4 = vmul.f32 %v2861_v5, %v2861_v5  ;;  %v1724_v18 = vmul.f32 %v2846_v7, %v2846_v7  ;;  %v1725_v35 = vmul.f32 %v2856_v12, %v2856_v12  ;;  %v1726_v44 = vmul.f32 %v2871_v63, %v2871_v63 }
 0x16f   : > { %v1676_v60 = vadd.f32 %v1675_v11, %v2821_v54  ;;  %v1747_v39 = vadd.f32 %v1746_v14, %v1716_v20  ;;  %v1727_v32 = vmul.f32 %v2881_v15, %v2881_v15  ;;  %v1728_v52 = vmul.f32 %v2866_v27, %v2866_v27 }
 0x170   : > { %v1729_v36 = vmul.f32 %v2876_v6, %v2876_v6  ;;  %v1731_v50 = vmul.f32 %v2901_v29, %v2901_v29  ;;  %v1732_v20 = vmul.f32 %v2886_v13, %v2886_v13 }
 0x171   : > { %v1677_v23 = vadd.f32 %v1676_v60, %v2833_v48  ;;  %v1748_v9 = vadd.f32 %v1747_v39, %v1717_v51  ;;  %v1730_v60 = vmul.f32 %v2891_v43, %v2891_v43  ;;  %v1733_v51 = vmul.f32 %v2896_v57, %v2896_v57 }
 0x172   : > { %v1735_v39 = vmul.f32 %v2921_v31, %v2921_v31 }
 0x173   : > { %v1678_v56 = vadd.f32 %v1677_v23, %v2841_v45  ;;  %v1749_v55 = vadd.f32 %v1748_v9, %v1718_v3 }
 0x175   : > { %v1679_v62 = vadd.f32 %v1678_v56, %v2829_v10  ;;  %v1750_v1 = vadd.f32 %v1749_v55, %v1719_v53  ;;  %v1736_v53 = vmul.f32 %v2906_v30, %v2906_v30  ;;  %v1738_v55 = vmul.f32 %v2931_v58, %v2931_v58 }
 0x177   : > { %v1680_v25 = vadd.f32 %v1679_v62, %v2837_v16  ;;  %v1751_v46 = vadd.f32 %v1750_v1, %v1720_v21  ;;  %v1734_v62 = vmul.f32 %v2911_v33, %v2911_v33 }
 0x179   : > { %v1681_v22 = vadd.f32 %v1680_v25, %v2851_v19  ;;  %v1752_v59 = vadd.f32 %v1751_v46, %v1721_v61  ;;  %v1739_v61 = vmul.f32 %v2941_v26, %v2941_v26  ;;  %v1741_v46 = vmul.f32 %v2936_v28, %v2936_v28 }
 0x17b   : > { %v1682_v54 = vadd.f32 %v1681_v22, %v2861_v5  ;;  %v1753_v41 = vadd.f32 %v1752_v59, %v1722_v24  ;;  %v1737_v22 = vmul.f32 %v2916_v40, %v2916_v40 }
 0x17d   : > { %v1683_v48 = vadd.f32 %v1682_v54, %v2846_v7  ;;  %v1754_v42 = vadd.f32 %v1753_v41, %v1723_v4  ;;  %v1742_v4 = vmul.f32 %v2951_v17, %v2951_v17  ;;  %v1744_v41 = vmul.f32 %v2946_v49, %v2946_v49 }
 0x17f   : > { %v1684_v45 = vadd.f32 %v1683_v48, %v2856_v12  ;;  %v1755_v38 = vadd.f32 %v1754_v42, %v1724_v18  ;;  %v1740_v48 = vmul.f32 %v2926_v34, %v2926_v34 }
 0x181   : > { %v1685_v10 = vadd.f32 %v1684_v45, %v2871_v63  ;;  %v1756_v2 = vadd.f32 %v1755_v38, %v1725_v35 }
 0x183   : > { %v1686_v16 = vadd.f32 %v1685_v10, %v2881_v15  ;;  %v1757_v37 = vadd.f32 %v1756_v2, %v1726_v44  ;;  %v1743_v10 = vmul.f32 %v2961_v47, %v2961_v47 }
 0x185   : > { %v1687_v19 = vadd.f32 %v1686_v16, %v2866_v27  ;;  %v1758_v11 = vadd.f32 %v1757_v37, %v1727_v32 }
 0x187   : > { %v1688_v5 = vadd.f32 %v1687_v19, %v2876_v6  ;;  %v1759_v0 = vadd.f32 %v1758_v11, %v1728_v52 }
 0x189   : > { %v1689_v7 = vadd.f32 %v1688_v5, %v2891_v43  ;;  %v1760_v23 = vadd.f32 %v1759_v0, %v1729_v36 }
 0x18b   : > { %v1690_v12 = vadd.f32 %v1689_v7, %v2901_v29  ;;  %v1761_v56 = vadd.f32 %v1760_v23, %v1730_v60 }
 0x18d   : > { %v1691_v63 = vadd.f32 %v1690_v12, %v2886_v13  ;;  %v1762_v14 = vadd.f32 %v1761_v56, %v1731_v50  ;;  %v1713_v12 = vld [vmem:[%s3087_s4] sm:$0x1] }
 0x18f   : > { %v1692_v15 = vadd.f32 %v1691_v63, %v2896_v57  ;;  %v1763_v3 = vadd.f32 %v1762_v14, %v1732_v20 }
 0x191   : > { %v1693_v27 = vadd.f32 %v1692_v15, %v2911_v33  ;;  %v1764_v25 = vadd.f32 %v1763_v3, %v1733_v51 }
 0x193   : > { %v1694_v6 = vadd.f32 %v1693_v27, %v2921_v31  ;;  %v1765_v9 = vadd.f32 %v1764_v25, %v1734_v62 }
 0x195   : > { %v1695_v43 = vadd.f32 %v1694_v6, %v2906_v30  ;;  %v1766_v21 = vadd.f32 %v1765_v9, %v1735_v39 }
 0x197   : > { %v1696_v29 = vadd.f32 %v1695_v43, %v2916_v40  ;;  %v1767_v54 = vadd.f32 %v1766_v21, %v1736_v53 }
 0x199   : > { %v1697_v13 = vadd.f32 %v1696_v29, %v2931_v58  ;;  %v1768_v1 = vadd.f32 %v1767_v54, %v1737_v22 }
 0x19b   : > { %v1698_v57 = vadd.f32 %v1697_v13, %v2941_v26  ;;  %v1769_v24 = vadd.f32 %v1768_v1, %v1738_v55 }
 0x19d   : > { %v1699_v33 = vadd.f32 %v1698_v57, %v2926_v34  ;;  %v1770_v45 = vadd.f32 %v1769_v24, %v1739_v61 }
 0x19f   : > { %v1700_v31 = vadd.f32 %v1699_v33, %v2936_v28  ;;  %v1771_v59 = vadd.f32 %v1770_v45, %v1740_v48  ;;  %v1745_v28 = vmul.f32 %v2956_v8, %v2956_v8 }
 0x1a1   : > { %v1701_v30 = vadd.f32 %v1700_v31, %v2951_v17  ;;  %v1772_v18 = vadd.f32 %v1771_v59, %v1741_v46 }
 0x1a3   : > { %v1702_v40 = vadd.f32 %v1701_v30, %v2961_v47  ;;  %v1773_v16 = vadd.f32 %v1772_v18, %v1742_v4  ;;  %v1673_v47 = vld [vmem:[%s3086_s3] sm:$0x1] }
 0x1a5   : > { %v1703_v58 = vadd.f32 %v1702_v40, %v2946_v49  ;;  %v1774_v42 = vadd.f32 %v1773_v16, %v1743_v10 }
 0x1a7   : > { %v1704_v26 = vadd.f32 %v1703_v58, %v2956_v8  ;;  %v1775_v44 = vadd.f32 %v1774_v42, %v1744_v41 }
 0x1a9   : > { %v1705_v34 = vrot.slane %v1704_v26, 4  ;;  %v1776_v38 = vadd.f32 %v1775_v44, %v1745_v28 }
 0x1ab   : > { %v1706_v35 = vadd.f32 %v1705_v34, %v1704_v26  ;;  %v1777_v32 = vrot.slane %v1776_v38, 4 }
 0x1ad   : > { %v1707_v19 = vrot.slane %v1706_v35, 2  ;;  %v1778_v7 = vadd.f32 %v1777_v32, %v1776_v38 }
 0x1af   : > { %v1708_v17 = vadd.f32 %v1707_v19, %v1706_v35  ;;  %v1779_v49 = vrot.slane %v1778_v7, 2 }
 0x1b1   : > { %v1709_v5 = vrot.slane %v1708_v17, 1  ;;  %v1780_v8 = vadd.f32 %v1779_v49, %v1778_v7 }
 0x1b3   : > { %v1710_v2 = vadd.f32 %v1709_v5, %v1708_v17  ;;  %v1781_v37 = vrot.slane %v1780_v8, 1 }
 0x1b5   : > { %v1711_v52 = vadd.f32 %v1710_v2, %v1673_v47  ;;  %v1782_v36 = vadd.f32 %v1781_v37, %v1780_v8 }
 0x1b7   : > { %1712 = vst [vmem:[%s3086_s3] sm:$0x1] %v1711_v52  ;;  %v1783_v11 = vadd.f32 %v1782_v36, %v1713_v12 }
 0x1b9   : > { %1784 = vst [vmem:[%s3087_s4] sm:$0x1] %v1783_v11 }
 0x1ba PF: > { %s15_s15 = sadd.s32 1, %s2178_s15  }
 0x1bb   : > { %p12_p6 = scmp.ge.s32.totalorder %s15_s15, 4  }
 0x1bd   :  { %14 = sbr.rel (!%p12_p6) target bundleno = 1 (0x1), region = 80 }

// kernel: inconv_forward.7
= control target key start
LH: loop header
LB: loop body
LE: loop exit
PB: predicated region body
PF: predicated region fallthrough
CT: control target
= control target key end

     0   :  { %s453_s12 = smov 0   ;;  %s612_s0 = inlined_call_operand.vmem [shape: f32[512,128], index: 0, kind: input, shape index: {}]   ;;  %s613_s1 = inlined_call_operand.vmem [shape: f32[1,128], index: 1, kind: input, shape index: {}]   ;;  %s614_s2 = inlined_call_operand.vmem [shape: f32[1,128], index: 2, kind: input, shape index: {}]   ;;  %s615_s3 = inlined_call_operand.vmem [shape: f32[512,128], index: 3, kind: output, shape index: {}]  }
   0x1 LB: > { %s404_s13 = sadd.s32 4294967295, %s431_s12   ;;  %p408_p0 = scmp.ge.s32.totalorder %s431_s12, 1  ;;  %s431_s12 = sphi %s453_s12, %s13_s12  }
   0x2   : > { %p138_p1 = scmp.lt.s32.totalorder %s431_s12, 3 }
   0x4   : > { %p139_p2 = pnand %p408_p0, %p138_p1 }
   0x5   : > { %s409_s14 = sshll.u32 (!%p139_p2), %s404_s13, 5 }
   0x6   : > { %142 = sbr.rel (%p139_p2) target bundleno = 44 (0x2c), region = 32  ;;  %p163_p3 = scmp.lt.s32.totalorder (!%p139_p2), %s409_s14, 63 }
   0xb   : > { %s617_s14 = smov (!%p163_p3, %s409_s14), 63  ;;  %v464_v0 = vld [vmem:[%s613_s1] ss:$0 sm:$0xff] }
   0xc   : > { %s410_s15 = sshll.u32 %s617_s14, 3  ;;  %v474_v1 = vld [vmem:[%s614_s2] ss:$0 sm:$0xff] }
   0xd   : > { %s469_s20 = scalar_lea.vmem %s612_s0, %s410_s15  ;;  %s497_s25 = scalar_lea.vmem %s615_s3, %s410_s15 }
   0xe   : > { %v174_v2 = vld [vmem:[%s469_s20] sm:$0xff]  ;;  %v175_v3 = vld [vmem:[%s469_s20 + $0x8] sm:$0xff]  ;;  %v176_v4 = vld [vmem:[%s469_s20 + $0x10] sm:$0xff] }
   0xf   : > { %v213_v5 = vmul.f32 %v464_v0, %v174_v2  ;;  %v214_v6 = vmul.f32 %v464_v0, %v175_v3  ;;  %v215_v7 = vmul.f32 %v464_v0, %v176_v4  ;;  %v177_v8 = vld [vmem:[%s469_s20 + $0x18] sm:$0xff]  ;;  %v178_v9 = vld [vmem:[%s469_s20 + $0x20] sm:$0xff]  ;;  %v179_v10 = vld [vmem:[%s469_s20 + $0x28] sm:$0xff] }
  0x10   : > { %v216_v11 = vmul.f32 %v464_v0, %v177_v8  ;;  %v217_v12 = vmul.f32 %v464_v0, %v178_v9  ;;  %v218_v13 = vmul.f32 %v464_v0, %v179_v10  ;;  %v180_v14 = vld [vmem:[%s469_s20 + $0x30] sm:$0xff]  ;;  %v181_v15 = vld [vmem:[%s469_s20 + $0x38] sm:$0xff]  ;;  %v182_v24 = vld [vmem:[%s469_s20 + $0x40] sm:$0xff] }
  0x11   : > { %v252_v16 = vadd.f32 %v474_v1, %v213_v5  ;;  %v253_v17 = vadd.f32 %v474_v1, %v214_v6  ;;  %v254_v18 = vadd.f32 %v474_v1, %v215_v7  ;;  %v219_v19 = vmul.f32 %v464_v0, %v180_v14  ;;  %v183_v25 = vld [vmem:[%s469_s20 + $0x48] sm:$0xff]  ;;  %v184_v26 = vld [vmem:[%s469_s20 + $0x50] sm:$0xff]  ;;  %v185_v31 = vld [vmem:[%s469_s20 + $0x58] sm:$0xff] }
  0x12   : > { %v255_v20 = vadd.f32 %v474_v1, %v216_v11  ;;  %v256_v21 = vadd.f32 %v474_v1, %v217_v12  ;;  %v257_v22 = vadd.f32 %v474_v1, %v218_v13  ;;  %v220_v23 = vmul.f32 %v464_v0, %v181_v15  ;;  %v186_v32 = vld [vmem:[%s469_s20 + $0x60] sm:$0xff]  ;;  %v187_v33 = vld [vmem:[%s469_s20 + $0x68] sm:$0xff]  ;;  %v188_v38 = vld [vmem:[%s469_s20 + $0x70] sm:$0xff] }
  0x13   : > { %v284_v27 = vmax.f32 %v252_v16, 0.0  ;;  %v285_v28 = vmax.f32 %v253_v17, 0.0  ;;  %v286_v29 = vmax.f32 %v254_v18, 0.0  ;;  %v258_v30 = vadd.f32 %v474_v1, %v219_v19  ;;  %v189_v43 = vld [vmem:[%s469_s20 + $0x78] sm:$0xff]  ;;  %v190_v56 = vld [vmem:[%s469_s20 + $0x80] sm:$0xff]  ;;  %v191_v57 = vld [vmem:[%s469_s20 + $0x88] sm:$0xff] }
  0x14   : > { %v287_v34 = vmax.f32 %v255_v20, 0.0  ;;  %v288_v35 = vmax.f32 %v256_v21, 0.0  ;;  %v289_v36 = vmax.f32 %v257_v22, 0.0  ;;  %v259_v37 = vadd.f32 %v474_v1, %v220_v23  ;;  %v192_v58 = vld [vmem:[%s469_s20 + $0x90] sm:$0xff]  ;;  %v193_v63 = vld [vmem:[%s469_s20 + $0x98] sm:$0xff]  ;;  %v194_v2 = vld [vmem:[%s469_s20 + $0xa0] sm:$0xff] }
  0x15   : > { %316 = vst [vmem:[%s497_s25] sm:$0xff] %v284_v27  ;;  %317 = vst [vmem:[%s497_s25 + $0x8] sm:$0xff] %v285_v28  ;;  %v290_v39 = vmax.f32 %v258_v30, 0.0  ;;  %v221_v40 = vmul.f32 %v464_v0, %v182_v24  ;;  %v222_v41 = vmul.f32 %v464_v0, %v183_v25  ;;  %v223_v42 = vmul.f32 %v464_v0, %v184_v26  ;;  %v195_v3 = vld [vmem:[%s469_s20 + $0xa8] sm:$0xff]  ;;  %v196_v8 = vld [vmem:[%s469_s20 + $0xb0] sm:$0xff] }
  0x16   : > { %318 = vst [vmem:[%s497_s25 + $0x10] sm:$0xff] %v286_v29  ;;  %319 = vst [vmem:[%s497_s25 + $0x18] sm:$0xff] %v287_v34  ;;  %v291_v44 = vmax.f32 %v259_v37, 0.0  ;;  %v224_v45 = vmul.f32 %v464_v0, %v185_v31  ;;  %v225_v46 = vmul.f32 %v464_v0, %v186_v32  ;;  %v226_v47 = vmul.f32 %v464_v0, %v187_v33  ;;  %v197_v13 = vld [vmem:[%s469_s20 + $0xb8] sm:$0xff]  ;;  %v198_v26 = vld [vmem:[%s469_s20 + $0xc0] sm:$0xff] }
  0x17   : > { %320 = vst [vmem:[%s497_s25 + $0x20] sm:$0xff] %v288_v35  ;;  %321 = vst [vmem:[%s497_s25 + $0x28] sm:$0xff] %v289_v36  ;;  %v260_v48 = vadd.f32 %v474_v1, %v221_v40  ;;  %v261_v49 = vadd.f32 %v474_v1, %v222_v41  ;;  %v262_v50 = vadd.f32 %v474_v1, %v223_v42  ;;  %v199_v27 = vld [vmem:[%s469_s20 + $0xc8] sm:$0xff]  ;;  %v200_v28 = vld [vmem:[%s469_s20 + $0xd0] sm:$0xff] }
  0x18   : > { %322 = vst [vmem:[%s497_s25 + $0x30] sm:$0xff] %v290_v39  ;;  %v227_v51 = vmul.f32 %v464_v0, %v188_v38  ;;  %323 = vst [vmem:[%s497_s25 + $0x38] sm:$0xff] %v291_v44  ;;  %v263_v52 = vadd.f32 %v474_v1, %v224_v45  ;;  %v264_v53 = vadd.f32 %v474_v1, %v225_v46  ;;  %v201_v33 = vld [vmem:[%s469_s20 + $0xd8] sm:$0xff]  ;;  %v202_v34 = vld [vmem:[%s469_s20 + $0xe0] sm:$0xff] }
  0x19   : > { %v265_v54 = vadd.f32 %v474_v1, %v226_v47  ;;  %v228_v55 = vmul.f32 %v464_v0, %v189_v43  ;;  %v292_v59 = vmax.f32 %v260_v48, 0.0  ;;  %v293_v60 = vmax.f32 %v261_v49, 0.0  ;;  %v203_v35 = vld [vmem:[%s469_s20 + $0xe8] sm:$0xff]  ;;  %v204_v40 = vld [vmem:[%s469_s20 + $0xf0] sm:$0xff]  ;;  %v205_v45 = vld [vmem:[%s469_s20 + $0xf8] sm:$0xff] }
  0x1a   : > { %v294_v61 = vmax.f32 %v262_v50, 0.0  ;;  %v266_v62 = vadd.f32 %v474_v1, %v227_v51  ;;  %v295_v4 = vmax.f32 %v263_v52, 0.0  ;;  %v296_v5 = vmax.f32 %v264_v53, 0.0 }
  0x1b   : > { %v297_v6 = vmax.f32 %v265_v54, 0.0  ;;  %v267_v7 = vadd.f32 %v474_v1, %v228_v55  ;;  %324 = vst [vmem:[%s497_s25 + $0x40] sm:$0xff] %v292_v59  ;;  %325 = vst [vmem:[%s497_s25 + $0x48] sm:$0xff] %v293_v60  ;;  %v229_v10 = vmul.f32 %v464_v0, %v190_v56  ;;  %v230_v11 = vmul.f32 %v464_v0, %v191_v57 }
  0x1c   : > { %326 = vst [vmem:[%s497_s25 + $0x50] sm:$0xff] %v294_v61  ;;  %v298_v9 = vmax.f32 %v266_v62, 0.0  ;;  %v231_v12 = vmul.f32 %v464_v0, %v192_v58  ;;  %327 = vst [vmem:[%s497_s25 + $0x58] sm:$0xff] %v295_v4  ;;  %v232_v15 = vmul.f32 %v464_v0, %v193_v63  ;;  %v233_v16 = vmul.f32 %v464_v0, %v194_v2 }
  0x1d   : > { %328 = vst [vmem:[%s497_s25 + $0x60] sm:$0xff] %v296_v5  ;;  %329 = vst [vmem:[%s497_s25 + $0x68] sm:$0xff] %v297_v6  ;;  %v299_v14 = vmax.f32 %v267_v7, 0.0  ;;  %v234_v17 = vmul.f32 %v464_v0, %v195_v3  ;;  %v268_v18 = vadd.f32 %v474_v1, %v229_v10  ;;  %v269_v19 = vadd.f32 %v474_v1, %v230_v11 }
  0x1e   : > { %330 = vst [vmem:[%s497_s25 + $0x70] sm:$0xff] %v298_v9  ;;  %v270_v20 = vadd.f32 %v474_v1, %v231_v12  ;;  %v235_v21 = vmul.f32 %v464_v0, %v196_v8  ;;  %v271_v22 = vadd.f32 %v474_v1, %v232_v15  ;;  %v272_v23 = vadd.f32 %v474_v1, %v233_v16 }
  0x1f   : > { %331 = vst [vmem:[%s497_s25 + $0x78] sm:$0xff] %v299_v14  ;;  %v273_v24 = vadd.f32 %v474_v1, %v234_v17  ;;  %v236_v25 = vmul.f32 %v464_v0, %v197_v13  ;;  %v300_v29 = vmax.f32 %v268_v18, 0.0  ;;  %v301_v30 = vmax.f32 %v269_v19, 0.0 }
  0x20   : > { %v302_v31 = vmax.f32 %v270_v20, 0.0  ;;  %v274_v32 = vadd.f32 %v474_v1, %v235_v21  ;;  %v303_v36 = vmax.f32 %v271_v22, 0.0  ;;  %v304_v37 = vmax.f32 %v272_v23, 0.0 }
  0x21   : > { %v305_v38 = vmax.f32 %v273_v24, 0.0  ;;  %v275_v39 = vadd.f32 %v474_v1, %v236_v25  ;;  %332 = vst [vmem:[%s497_s25 + $0x80] sm:$0xff] %v300_v29  ;;  %333 = vst [vmem:[%s497_s25 + $0x88] sm:$0xff] %v301_v30  ;;  %v237_v42 = vmul.f32 %v464_v0, %v198_v26  ;;  %v238_v43 = vmul.f32 %v464_v0, %v199_v27 }
  0x22   : > { %334 = vst [vmem:[%s497_s25 + $0x90] sm:$0xff] %v302_v31  ;;  %v306_v41 = vmax.f32 %v274_v32, 0.0  ;;  %v239_v44 = vmul.f32 %v464_v0, %v200_v28  ;;  %335 = vst [vmem:[%s497_s25 + $0x98] sm:$0xff] %v303_v36  ;;  %v240_v47 = vmul.f32 %v464_v0, %v201_v33  ;;  %v241_v48 = vmul.f32 %v464_v0, %v202_v34 }
  0x23   : > { %336 = vst [vmem:[%s497_s25 + $0xa0] sm:$0xff] %v304_v37  ;;  %337 = vst [vmem:[%s497_s25 + $0xa8] sm:$0xff] %v305_v38  ;;  %v307_v46 = vmax.f32 %v275_v39, 0.0  ;;  %v242_v49 = vmul.f32 %v464_v0, %v203_v35  ;;  %v276_v50 = vadd.f32 %v474_v1, %v237_v42  ;;  %v277_v51 = vadd.f32 %v474_v1, %v238_v43 }
  0x24   : > { %338 = vst [vmem:[%s497_s25 + $0xb0] sm:$0xff] %v306_v41  ;;  %v278_v52 = vadd.f32 %v474_v1, %v239_v44  ;;  %v243_v53 = vmul.f32 %v464_v0, %v204_v40  ;;  %v279_v54 = vadd.f32 %v474_v1, %v240_v47  ;;  %v280_v55 = vadd.f32 %v474_v1, %v241_v48 }
  0x25   : > { %339 = vst [vmem:[%s497_s25 + $0xb8] sm:$0xff] %v307_v46  ;;  %v281_v56 = vadd.f32 %v474_v1, %v242_v49  ;;  %v244_v57 = vmul.f32 %v464_v0, %v205_v45  ;;  %v308_v58 = vmax.f32 %v276_v50, 0.0  ;;  %v309_v59 = vmax.f32 %v277_v51, 0.0 }
  0x26   : > { %v310_v60 = vmax.f32 %v278_v52, 0.0  ;;  %v282_v61 = vadd.f32 %v474_v1, %v243_v53  ;;  %v311_v62 = vmax.f32 %v279_v54, 0.0  ;;  %v312_v63 = vmax.f32 %v280_v55, 0.0 }
  0x27   : > { %v313_v2 = vmax.f32 %v281_v56, 0.0  ;;  %v283_v3 = vadd.f32 %v474_v1, %v244_v57  ;;  %340 = vst [vmem:[%s497_s25 + $0xc0] sm:$0xff] %v308_v58  ;;  %341 = vst [vmem:[%s497_s25 + $0xc8] sm:$0xff] %v309_v59 }
  0x28   : > { %342 = vst [vmem:[%s497_s25 + $0xd0] sm:$0xff] %v310_v60  ;;  %v314_v4 = vmax.f32 %v282_v61, 0.0  ;;  %343 = vst [vmem:[%s497_s25 + $0xd8] sm:$0xff] %v311_v62 }
  0x29   : > { %344 = vst [vmem:[%s497_s25 + $0xe0] sm:$0xff] %v312_v63  ;;  %345 = vst [vmem:[%s497_s25 + $0xe8] sm:$0xff] %v313_v2  ;;  %v315_v0 = vmax.f32 %v283_v3, 0.0 }
  0x2a   : > { %346 = vst [vmem:[%s497_s25 + $0xf0] sm:$0xff] %v314_v4 }
  0x2b   : > { %347 = vst [vmem:[%s497_s25 + $0xf8] sm:$0xff] %v315_v0 }
  0x2c PF: > { %s13_s12 = sadd.s32 1, %s431_s12  }
  0x2d   : > { %p10_p4 = scmp.ge.s32.totalorder %s13_s12, 4  }
  0x2f   :  { %12 = sbr.rel (!%p10_p4) target bundleno = 1 (0x1), region = 62 }

// kernel: inconv_forward.6
= control target key start
LH: loop header
LB: loop body
LE: loop exit
PB: predicated region body
PF: predicated region fallthrough
CT: control target
= control target key end

     0   :  { %s2240_s15 = smov 0   ;;  %s3126_s0 = inlined_call_operand.vmem [shape: bf16[32,18,24], index: 0, kind: input, shape index: {}]   ;;  %s3127_s1 = inlined_call_operand.vmem [shape: bf16[3,24,128], index: 1, kind: input, shape index: {}]   ;;  %s3128_s2 = inlined_call_operand.vmem [shape: f32[512,128], index: 2, kind: output, shape index: {0}]   ;;  %s3129_s3 = inlined_call_operand.vmem [shape: f32[1,128], index: 3, kind: output, shape index: {1}]   ;;  %s3130_s4 = inlined_call_operand.vmem [shape: f32[1,128], index: 4, kind: output, shape index: {2}]  }
   0x1 LB: > { %s2246_s16 = sadd.s32 4294967295, %s2212_s15   ;;  %p1872_p0 = scmp.ge.s32.totalorder %s2212_s15, 1  ;;  %s2212_s15 = sphi %s2240_s15, %s15_s15  }
   0x2   : > { %p159_p1 = scmp.lt.s32.totalorder %s2212_s15, 3 }
   0x4   : > { %p160_p2 = pnand %p1872_p0, %p159_p1 }
   0x6   : > { %163 = sbr.rel (%p160_p2) target bundleno = 442 (0x1ba), region = 28 }
   0xb   : > { %v2184_v0 = vld [vmem:[%s3127_s1 + $0x14] ss:$0 sps:$4 sm:$0xff]   ;;  %vm748_vm0 = vcmask 1043456   ;;  %v2185_v1 = vld [vmem:[%s3127_s1 + $0xc] sm:$0xff]   ;;  %s1873_s21 = sshll.u32 %s2246_s16, 4  ;;  %vm699_vm3 = vcmask 195584  }
   0xc   : > { %2171 = vmatprep.subr.msk.bf16.mxu1 %vm748_vm0, %v2184_v0  ;;  %2170 = vmatprep.subr.msk.bf16.mxu0 %vm748_vm0, %v2184_v0  ;;  %v750_v2 = vsel %vm748_vm0, %v2184_v0, 0  ;;  %p187_p3 = scmp.lt.s32.totalorder %s1873_s21, 31  ;;  %v2186_v3 = vld [vmem:[%s3127_s1 + $0x8] ss:$0 sps:$4 sm:$0xff]   ;;  %v2187_v4 = vld [vmem:[%s3127_s1 + $0x20] ss:$0 sps:$4 sm:$0xff]  }
   0xd   : > { %2168 = vmatpush3.bf16.msra.mxu1 %v750_v2  ;;  %2059 = vmatpush3.bf16.msra.mxu0 %v750_v2  ;;  %vm251_vm1 = vsmask.f32 3328  ;;  %vm252_vm2 = vsmask.f32 7440  ;;  %v2273_v5 = vsel %vm748_vm0, %v2186_v3, 0  ;;  %v2277_v6 = vsel %vm748_vm0, %v2187_v4, 0 }
   0xe   : > { %2167 = vmatprep.subr.bf16.mxu1 %v2185_v1  ;;  %2060 = vmatprep.subr.bf16.mxu0 %v2185_v1  ;;  %s3174_s21 = smov (!%p187_p3, %s1873_s21), 31  ;;  %vm2316_vm4 = vmor %vm251_vm1, %vm252_vm2  ;;  %vm1230_vm5 = vcmask 1042432   ;;  %vm1231_vm6 = vcmask 1046532   ;;  %s1875_s8 = sshll.u32 %s2246_s16, 5 }
   0xf   : > { %s2174_s26 = smul.u32 12, %s3174_s21  ;;  %vm2593_vm7 = vmor %vm1230_vm5, %vm1231_vm6  ;;  %p194_p4 = scmp.lt.s32.totalorder %s1875_s8, 63 }
  0x10   : > { %p2001_p5 = scmp.ne.s32.totalorder %s2246_s16, 0 }
  0x11   : > { %2169 = vmatpush3.bf16.msra.mxu1 %v2185_v1  ;;  %2061 = vmatpush3.bf16.msra.mxu0 %v2185_v1  ;;  %s2269_s29 = scalar_lea.vmem %s3126_s0, %s2174_s26  ;;  %s3176_s8 = smov (!%p194_p4, %s1875_s8), 63 }
  0x12   : > { %2172 = vmatprep.subr.msk.bf16.mxu1 %vm748_vm0, %v2186_v3  ;;  %2173 = vmatprep.subr.msk.bf16.mxu0 %vm748_vm0, %v2187_v4  ;;  %v2280_v7 = vld [vmem:[%s2269_s29] sm:$0xf]  ;;  %v2283_v8 = vld [vmem:[%s2269_s29 + $0x4] sm:$0xf]  ;;  %v2286_v9 = vld [vmem:[%s2269_s29 + $0x8] sm:$0x1] }
  0x13   : > { %v255_v10 = vshrl.u32 %v2280_v7, 16  ;;  %v258_v11 = vshll.u32 %v2280_v7, 16  ;;  %v264_v12 = vshll.u32 %v2283_v8, 16  ;;  %v268_v13 = vshrl.u32 %v2283_v8, 16  ;;  %v2293_v14 = vld [vmem:[%s2269_s29 + $0x60] sm:$0xf] }
  0x14   : > { %v274_v15 = vshll.u32 %v2286_v9, 16  ;;  %v2298_v17 = vld [vmem:[%s2269_s29 + $0x64] sm:$0xf]  ;;  %v2301_v18 = vld [vmem:[%s2269_s29 + $0x68] sm:$0x1]  ;;  %v447_v24 = vshrl.u32 %v2293_v14, 16 }
  0x15   : > { %v257_v19 = vrot.slane %v255_v10, 4  ;;  %v260_v20 = vrot.slane %v258_v11, 5  ;;  %v266_v21 = vrot.slane %v264_v12, 5  ;;  %v270_v22 = vrot.slane %v268_v13, 4  ;;  %v2309_v31 = vld [vmem:[%s2269_s29 + $0xc] sm:$0xf] }
  0x16   : > { %v276_v23 = vrot.slane %v274_v15, 5  ;;  %v450_v25 = vshll.u32 %v2293_v14, 16  ;;  %v456_v26 = vshll.u32 %v2298_v17, 16  ;;  %v460_v29 = vshrl.u32 %v2298_v17, 16  ;;  %v2312_v32 = vld [vmem:[%s2269_s29 + $0x10] sm:$0xf] }
  0x17   : > { %v261_v27 = vor.u32 %v260_v20, %v257_v19  ;;  %v271_v28 = vor.u32 %v270_v22, %v266_v21  ;;  %v466_v30 = vshll.u32 %v2301_v18, 16  ;;  %v449_v34 = vrot.slane %v447_v24, 4  ;;  %v2323_v43 = vld [vmem:[%s2269_s29 + $0x14] sm:$0x1]  ;;  %v2334_v55 = vld [vmem:[%s2269_s29 + $0x6c] sm:$0xf] }
  0x18   : > { %v452_v35 = vrot.slane %v450_v25, 5  ;;  %v458_v36 = vrot.slane %v456_v26, 5  ;;  %v462_v40 = vrot.slane %v460_v29, 4  ;;  %v279_v44 = vshrl.u32 %v2309_v31, 16  ;;  %3148 = vst [vmem:[#allocation2_spill] sm:$0xff] %v2334_v55  ;;  %s1876_s9 = sshll.u32 %s3176_s8, 3 }
  0x19   : > { %v262_v38 = vrot.slane %v261_v27, 4  ;;  %v272_v39 = vrot.slane %v271_v28, 4  ;;  %v468_v41 = vrot.slane %v466_v30, 5  ;;  %v282_v45 = vshll.u32 %v2309_v31, 16  ;;  %v2338_v60 = vld [vmem:[%s2269_s29 + $0x70] sm:$0xf]  ;;  %s2854_s12 = scalar_lea.vmem %s3128_s2, %s1876_s9 }
  0x1a   : > { %v453_v42 = vor.u32 %v452_v35, %v449_v34  ;;  %v288_v46 = vshll.u32 %v2312_v32, 16  ;;  %v463_v49 = vor.u32 %v462_v40, %v458_v36  ;;  %v292_v50 = vshrl.u32 %v2312_v32, 16  ;;  %v2346_v1 = vld [vmem:[%s2269_s29 + $0x74] sm:$0x1]  ;;  %v2352_v11 = vld [vmem:[%s2269_s29 + $0x18] sm:$0xf] }
  0x1b   : > { %v267_v47 = vsel %vm2316_vm4, %v262_v38, %v266_v21  ;;  %v277_v48 = vsel %vm2316_vm4, %v272_v39, %v276_v23  ;;  %v281_v53 = vrot.slane %v279_v44, 4  ;;  %v284_v54 = vrot.slane %v282_v45, 5  ;;  %3149 = vst [vmem:[#allocation3_spill] sm:$0xff] %v2346_v1  ;;  %v2359_v24 = vld [vmem:[%s2269_s29 + $0x1c] sm:$0xf] }
  0x1c   : > { %v1880_v51 = vcombine.low %v267_v47, %v277_v48  ;;  %v454_v52 = vrot.slane %v453_v42, 4  ;;  %v464_v56 = vrot.slane %v463_v49, 4  ;;  %v290_v57 = vrot.slane %v288_v46, 5  ;;  %v2365_v28 = vld [vmem:[%s2269_s29 + $0x20] sm:$0x1]  ;;  %v2189_v44 = vld [vmem:[%s3127_s1 + $0x18] sm:$0xff]  }
  0x1d   : > { %v294_v58 = vrot.slane %v292_v50, 4  ;;  %v298_v59 = vshll.u32 %v2323_v43, 16  ;;  %v285_v62 = vor.u32 %v284_v54, %v281_v53  ;;  %v471_v10 = vshrl.u32 %v2334_v55, 16  ;;  %v2372_v38 = vld [vmem:[%s2269_s29 + $0x78] sm:$0xf] }
  0x1e   : > { %2062 = vmatprep.mubr.msk.bf16.mxu0 %vm699_vm3, %v1880_v51  ;;  %v459_v61 = vsel %vm2316_vm4, %v454_v52, %v458_v36  ;;  %v469_v2 = vsel %vm2316_vm4, %v464_v56, %v468_v41  ;;  %v474_v15 = vshll.u32 %v2334_v55, 16  ;;  %v480_v19 = vshll.u32 %v2338_v60, 16  ;;  %3150 = vst [vmem:[#allocation4_spill] sm:$0xff] %v2372_v38  ;;  %v2381_v49 = vld [vmem:[%s2269_s29 + $0x7c] sm:$0xf] }
  0x1f   : > { %v295_v3 = vor.u32 %v294_v58, %v290_v57  ;;  %v300_v4 = vrot.slane %v298_v59, 5  ;;  %v1888_v12 = vcombine.low %v459_v61, %v469_v2  ;;  %v286_v13 = vrot.slane %v285_v62, 4  ;;  %3151 = vst [vmem:[#allocation5_spill] sm:$0xff] %v2381_v49  ;;  %v2388_v59 = vld [vmem:[%s2269_s29 + $0x80] sm:$0x1] }
  0x20   : > { %v473_v21 = vrot.slane %v471_v10, 4  ;;  %v484_v22 = vshrl.u32 %v2338_v60, 16  ;;  %v490_v23 = vshll.u32 %v2346_v1, 16  ;;  %v476_v26 = vrot.slane %v474_v15, 5  ;;  %3152 = vst [vmem:[#allocation6_spill] sm:$0xff] %v2388_v59 }
  0x21   : > { %v296_v20 = vrot.slane %v295_v3, 4  ;;  %2078 = vmatprep.mubr.msk.bf16.mxu1 %vm699_vm3, %v1888_v12  ;;  %v291_v25 = vsel %vm2316_vm4, %v286_v13, %v290_v57  ;;  %v482_v27 = vrot.slane %v480_v19, 5  ;;  %v303_v29 = vshrl.u32 %v2352_v11, 16  ;;  %v2400_v15 = vld [vmem:[%s2269_s29 + $0x28] sm:$0xf] }
  0x22   : > { %v486_v34 = vrot.slane %v484_v22, 4  ;;  %v492_v35 = vrot.slane %v490_v23, 5  ;;  %v306_v36 = vshll.u32 %v2352_v11, 16  ;;  %v477_v40 = vor.u32 %v476_v26, %v473_v21  ;;  %v2188_v23 = vld [vmem:[%s3127_s1] sm:$0xff]   ;;  %v2560_v1 = vld [vmem:[%s2269_s29 + $0x5c] sm:$0x1] }
  0x23   : > { %v301_v30 = vsel %vm2316_vm4, %v296_v20, %v300_v4  ;;  %v305_v41 = vrot.slane %v303_v29, 4  ;;  %v312_v42 = vshll.u32 %v2359_v24, 16  ;;  %v316_v47 = vshrl.u32 %v2359_v24, 16  ;;  %v2394_v4 = vld [vmem:[%s2269_s29 + $0x24] sm:$0xf] }
  0x24   : > { %v1881_v39 = vcombine.low %v291_v25, %v301_v30  ;;  %v487_v45 = vor.u32 %v486_v34, %v482_v27  ;;  %v308_v46 = vrot.slane %v306_v36, 5  ;;  %v322_v48 = vshll.u32 %v2365_v28, 16  ;;  %v2409_v29 = vld [vmem:[%s2269_s29 + $0x2c] sm:$0x1]  ;;  %v2584_v55 = vld [vmem:[%s2269_s29 + $0xbc] sm:$0x1] }
  0x25   : > { %v478_v50 = vrot.slane %v477_v40, 4  ;;  %v314_v51 = vrot.slane %v312_v42, 5  ;;  %v495_v52 = vshrl.u32 %v2372_v38, 16  ;;  %v498_v53 = vshll.u32 %v2372_v38, 16  ;;  %v2416_v40 = vld [vmem:[%s2269_s29 + $0x84] sm:$0xf] }
  0x26   : > { %2063 = vmatmul.mubr.msk.bf16.vlgmr.msra.gmra.mxu0 %vm699_vm3, %v1881_v39  ;;  %v488_v54 = vrot.slane %v487_v45, 4  ;;  %v309_v56 = vor.u32 %v308_v46, %v305_v41  ;;  %v318_v57 = vrot.slane %v316_v47, 4  ;;  %v324_v58 = vrot.slane %v322_v48, 5  ;;  %v2423_v46 = vld [vmem:[%s2269_s29 + $0x88] sm:$0xf] }
  0x27   : > { %2131 = vmatpush3.bf16.msra.mxu0 %v2277_v6  ;;  %v483_v61 = vsel %vm2316_vm4, %v478_v50, %v482_v27  ;;  %v497_v62 = vrot.slane %v495_v52, 4  ;;  %v500_v2 = vrot.slane %v498_v53, 5  ;;  %v504_v3 = vshll.u32 %v2381_v49, 16 }
  0x28   : > { %2132 = vmatprep.subr.bf16.mxu0 %v2189_v44  ;;  %v493_v10 = vsel %vm2316_vm4, %v488_v54, %v492_v35  ;;  %v310_v6 = vrot.slane %v309_v56, 4  ;;  %v319_v12 = vor.u32 %v318_v57, %v314_v51  ;;  %v508_v13 = vshrl.u32 %v2381_v49, 16  ;;  %v2429_v54 = vld [vmem:[%s2269_s29 + $0x8c] sm:$0x1] }
  0x29   : > { %v1889_v19 = vcombine.low %v483_v61, %v493_v10  ;;  %v501_v20 = vor.u32 %v500_v2, %v497_v62  ;;  %v506_v21 = vrot.slane %v504_v3, 5  ;;  %v514_v22 = vshll.u32 %v2388_v59, 16  ;;  %v2437_v2 = vld [vmem:[%s2269_s29 + $0x30] sm:$0xf] }
  0x2a   : > { %v315_v25 = vsel %vm2316_vm4, %v310_v6, %v314_v51  ;;  %v320_v26 = vrot.slane %v319_v12, 4  ;;  %v510_v27 = vrot.slane %v508_v13, 4  ;;  %v327_v30 = vshrl.u32 %v2394_v4, 16  ;;  %v2442_v13 = vld [vmem:[%s2269_s29 + $0x34] sm:$0xf] }
  0x2b   : > { %2133 = vmatpush3.bf16.msra.mxu0 %v2189_v44  ;;  %2079 = vmatmul.mubr.msk.bf16.vlgmr.msra.gmra.mxu1 %vm699_vm3, %v1889_v19  ;;  %v502_v34 = vrot.slane %v501_v20, 4  ;;  %v516_v35 = vrot.slane %v514_v22, 5  ;;  %v330_v36 = vshll.u32 %v2394_v4, 16  ;;  %v336_v39 = vshll.u32 %v2400_v15, 16 }
  0x2c   : > { %2095 = vmatpush3.bf16.msra.mxu1 %v2273_v5  ;;  %v325_v41 = vsel %vm2316_vm4, %v320_v26, %v324_v58  ;;  %v511_v42 = vor.u32 %v510_v27, %v506_v21  ;;  %v329_v45 = vrot.slane %v327_v30, 4  ;;  %v340_v44 = vshrl.u32 %v2400_v15, 16 }
  0x2d   : > { %v1882_v47 = vcombine.low %v315_v25, %v325_v41  ;;  %v507_v48 = vsel %vm2316_vm4, %v502_v34, %v506_v21  ;;  %v332_v50 = vrot.slane %v330_v36, 5  ;;  %v338_v51 = vrot.slane %v336_v39, 5  ;;  %2096 = vmatprep.subr.bf16.mxu1 %v2188_v23  ;;  %v2450_v36 = vld [vmem:[%s2269_s29 + $0x38] sm:$0x1]  ;;  %v2455_v41 = vld [vmem:[%s2269_s29 + $0x90] sm:$0xf] }
  0x2e   : > { %v512_v52 = vrot.slane %v511_v42, 4  ;;  %v342_v5 = vrot.slane %v340_v44, 4  ;;  %v346_v53 = vshll.u32 %v2409_v29, 16  ;;  %v519_v56 = vshrl.u32 %v2416_v40, 16 }
  0x2f   : > { %2066 = vmatprep.mubr.msk.bf16.mxu0 %vm699_vm3, %v1882_v47  ;;  %v333_v57 = vor.u32 %v332_v50, %v329_v45  ;;  %v522_v58 = vshll.u32 %v2416_v40, 16  ;;  %v528_v61 = vshll.u32 %v2423_v46, 16  ;;  %v532_v62 = vshrl.u32 %v2423_v46, 16 }
  0x30   : > { %v517_v3 = vsel %vm2316_vm4, %v512_v52, %v516_v35  ;;  %v343_v10 = vor.u32 %v342_v5, %v338_v51  ;;  %v348_v6 = vrot.slane %v346_v53, 5  ;;  %v521_v12 = vrot.slane %v519_v56, 4  ;;  %2097 = vmatpush3.bf16.msra.mxu1 %v2188_v23 }
  0x31   : > { %v1890_v19 = vcombine.low %v507_v48, %v517_v3  ;;  %v334_v20 = vrot.slane %v333_v57, 4  ;;  %v524_v21 = vrot.slane %v522_v58, 5  ;;  %v530_v22 = vrot.slane %v528_v61, 5  ;;  %v2460_v48 = vld [vmem:[%s2269_s29 + $0x94] sm:$0xf] }
  0x32   : > { %v344_v25 = vrot.slane %v343_v10, 4  ;;  %v534_v26 = vrot.slane %v532_v62, 4  ;;  %v538_v27 = vshll.u32 %v2429_v54, 16  ;;  %v351_v30 = vshrl.u32 %v2437_v2, 16  ;;  %v2469_v3 = vld [vmem:[%s2269_s29 + $0x98] sm:$0x1] }
  0x33   : > { %2082 = vmatprep.mubr.msk.bf16.mxu1 %vm699_vm3, %v1890_v19  ;;  %v339_v34 = vsel %vm2316_vm4, %v334_v20, %v338_v51  ;;  %v525_v35 = vor.u32 %v524_v21, %v521_v12  ;;  %v354_v23 = vshll.u32 %v2437_v2, 16  ;;  %v360_v39 = vshll.u32 %v2442_v13, 16  ;;  %v2474_v12 = vld [vmem:[%s2269_s29 + $0x3c] sm:$0xf] }
  0x34   : > { %v349_v42 = vsel %vm2316_vm4, %v344_v25, %v348_v6  ;;  %v535_v45 = vor.u32 %v534_v26, %v530_v22  ;;  %v540_v44 = vrot.slane %v538_v27, 5  ;;  %v353_v47 = vrot.slane %v351_v30, 4  ;;  %v2479_v26 = vld [vmem:[%s2269_s29 + $0x40] sm:$0xf] }
  0x35   : > { %v1883_v50 = vcombine.low %v339_v34, %v349_v42  ;;  %v526_v51 = vrot.slane %v525_v35, 4  ;;  %v356_v52 = vrot.slane %v354_v23, 5  ;;  %v362_v5 = vrot.slane %v360_v39, 5 }
  0x36   : > { %v536_v53 = vrot.slane %v535_v45, 4  ;;  %v364_v56 = vshrl.u32 %v2442_v13, 16  ;;  %v370_v57 = vshll.u32 %v2450_v36, 16  ;;  %v543_v58 = vshrl.u32 %v2455_v41, 16 }
  0x37   : > { %2067 = vmatmul.mubr.msk.bf16.gmra.mxu0 %vm699_vm3, %v1883_v50  ;;  %v531_v61 = vsel %vm2316_vm4, %v526_v51, %v530_v22  ;;  %v357_v62 = vor.u32 %v356_v52, %v353_v47  ;;  %v546_v10 = vshll.u32 %v2455_v41, 16  ;;  %v552_v6 = vshll.u32 %v2460_v48, 16  ;;  %v2488_v47 = vld [vmem:[%s2269_s29 + $0x44] sm:$0x1]  ;;  %v2493_v52 = vld [vmem:[%s2269_s29 + $0x9c] sm:$0xf] }
  0x38   : > { %v541_v19 = vsel %vm2316_vm4, %v536_v53, %v540_v44  ;;  %v366_v20 = vrot.slane %v364_v56, 4  ;;  %v372_v21 = vrot.slane %v370_v57, 5  ;;  %v545_v25 = vrot.slane %v543_v58, 4 }
  0x39   : > { %v1891_v22 = vcombine.low %v531_v61, %v541_v19  ;;  %v358_v27 = vrot.slane %v357_v62, 4  ;;  %v548_v30 = vrot.slane %v546_v10, 5  ;;  %v554_v34 = vrot.slane %v552_v6, 5 }
  0x3a   : > { %v367_v35 = vor.u32 %v366_v20, %v362_v5  ;;  %v556_v23 = vshrl.u32 %v2460_v48, 16  ;;  %v562_v39 = vshll.u32 %v2469_v3, 16  ;;  %v375_v42 = vshrl.u32 %v2474_v12, 16 }
  0x3b   : > { %2083 = vmatmul.mubr.msk.bf16.gmra.mxu1 %vm699_vm3, %v1891_v22  ;;  %v363_v45 = vsel %vm2316_vm4, %v358_v27, %v362_v5  ;;  %v549_v44 = vor.u32 %v548_v30, %v545_v25  ;;  %v378_v50 = vshll.u32 %v2474_v12, 16  ;;  %v384_v51 = vshll.u32 %v2479_v26, 16  ;;  %v2500_v25 = vld [vmem:[%s2269_s29 + $0xa0] sm:$0xf] }
  0x3c   : > { %v368_v53 = vrot.slane %v367_v35, 4  ;;  %v558_v56 = vrot.slane %v556_v23, 4  ;;  %v564_v57 = vrot.slane %v562_v39, 5  ;;  %v377_v58 = vrot.slane %v375_v42, 4  ;;  %v2506_v39 = vld [vmem:[%s2269_s29 + $0xa4] sm:$0x1] }
  0x3d   : > { %v550_v61 = vrot.slane %v549_v44, 4  ;;  %v380_v62 = vrot.slane %v378_v50, 5  ;;  %v386_v10 = vrot.slane %v384_v51, 5  ;;  %v388_v5 = vshrl.u32 %v2479_v26, 16  ;;  %v2509_v42 = vld [vmem:[%s2269_s29 + $0x48] sm:$0xf] }
  0x3e   : > { %v373_v6 = vsel %vm2316_vm4, %v368_v53, %v372_v21  ;;  %v559_v19 = vor.u32 %v558_v56, %v554_v34  ;;  %v394_v20 = vshll.u32 %v2488_v47, 16  ;;  %v567_v22 = vshrl.u32 %v2493_v52, 16 }
  0x3f   : > { %v1884_v27 = vcombine.low %v363_v45, %v373_v6  ;;  %v555_v30 = vsel %vm2316_vm4, %v550_v61, %v554_v34  ;;  %v381_v35 = vor.u32 %v380_v62, %v377_v58  ;;  %v390_v23 = vrot.slane %v388_v5, 4  ;;  %v2519_v5 = vld [vmem:[%s2269_s29 + $0x4c] sm:$0xf] }
  0x40   : > { %v560_v44 = vrot.slane %v559_v19, 4  ;;  %v396_v21 = vrot.slane %v394_v20, 5  ;;  %v569_v50 = vrot.slane %v567_v22, 4  ;;  %v570_v51 = vshll.u32 %v2493_v52, 16 }
  0x41   : > { %2070 = vmatprep.mubr.msk.bf16.mxu0 %vm699_vm3, %v1884_v27  ;;  %v382_v53 = vrot.slane %v381_v35, 4  ;;  %v391_v45 = vor.u32 %v390_v23, %v386_v10  ;;  %v576_v56 = vshll.u32 %v2500_v25, 16  ;;  %v580_v34 = vshrl.u32 %v2500_v25, 16  ;;  %v2525_v35 = vld [vmem:[%s2269_s29 + $0x50] sm:$0x1] }
  0x42   : > { %v565_v58 = vsel %vm2316_vm4, %v560_v44, %v564_v57  ;;  %v572_v61 = vrot.slane %v570_v51, 5  ;;  %v586_v62 = vshll.u32 %v2506_v39, 16  ;;  %v399_v6 = vshrl.u32 %v2509_v42, 16  ;;  %v2528_v44 = vld [vmem:[%s2269_s29 + $0xa8] sm:$0xf] }
  0x43   : > { %v1892_v19 = vcombine.low %v555_v30, %v565_v58  ;;  %v387_v20 = vsel %vm2316_vm4, %v382_v53, %v386_v10  ;;  %v392_v22 = vrot.slane %v391_v45, 4  ;;  %v578_v27 = vrot.slane %v576_v56, 5  ;;  %3153 = vst [vmem:[#allocation7_spill] sm:$0xff] %v2528_v44  ;;  %v2538_v58 = vld [vmem:[%s2269_s29 + $0xac] sm:$0xf] }
  0x44   : > { %v573_v23 = vor.u32 %v572_v61, %v569_v50  ;;  %v582_v37 = vrot.slane %v580_v34, 4  ;;  %v588_v0 = vrot.slane %v586_v62, 5  ;;  %v401_v57 = vrot.slane %v399_v6, 4  ;;  %3154 = vst [vmem:[#allocation8_spill] sm:$0xff] %v2538_v58 }
  0x45   : > { %2086 = vmatprep.mubr.msk.bf16.mxu1 %vm699_vm3, %v1892_v19  ;;  %v397_v30 = vsel %vm2316_vm4, %v392_v22, %v396_v21  ;;  %v402_v51 = vshll.u32 %v2509_v42, 16  ;;  %v408_v10 = vshll.u32 %v2519_v5, 16  ;;  %v412_v53 = vshrl.u32 %v2519_v5, 16  ;;  %v2541_v19 = vld [vmem:[%s2269_s29 + $0xb0] sm:$0x1] }
  0x46   : > { %v1885_v45 = vcombine.low %v387_v20, %v397_v30  ;;  %v574_v56 = vrot.slane %v573_v23, 4  ;;  %v583_v50 = vor.u32 %v582_v37, %v578_v27  ;;  %v418_v34 = vshll.u32 %v2525_v35, 16  ;;  %3155 = vst [vmem:[#allocation9_spill] sm:$0xff] %v2541_v19 }
  0x47   : > { %v404_v61 = vrot.slane %v402_v51, 5  ;;  %v410_v62 = vrot.slane %v408_v10, 5  ;;  %v414_v6 = vrot.slane %v412_v53, 4  ;;  %v591_v21 = vshrl.u32 %v2528_v44, 16  ;;  %v2550_v10 = vld [vmem:[%s2269_s29 + $0x54] sm:$0xf] }
  0x48   : > { %2071 = vmatmul.mubr.msk.bf16.gmra.mxu0 %vm699_vm3, %v1885_v45  ;;  %v579_v20 = vsel %vm2316_vm4, %v574_v56, %v578_v27  ;;  %v584_v22 = vrot.slane %v583_v50, 4  ;;  %v420_v37 = vrot.slane %v418_v34, 5  ;;  %v594_v23 = vshll.u32 %v2528_v44, 16  ;;  %v2557_v50 = vld [vmem:[%s2269_s29 + $0x58] sm:$0xf] }
  0x49   : > { %v405_v30 = vor.u32 %v404_v61, %v401_v57  ;;  %v415_v16 = vor.u32 %v414_v6, %v410_v62  ;;  %v593_v63 = vrot.slane %v591_v21, 4  ;;  %v600_v51 = vshll.u32 %v2538_v58, 16 }
  0x4a   : > { %v589_v53 = vsel %vm2316_vm4, %v584_v22, %v588_v0  ;;  %v596_v45 = vrot.slane %v594_v23, 5  ;;  %v604_v27 = vshrl.u32 %v2538_v58, 16  ;;  %v610_v56 = vshll.u32 %v2541_v19, 16 }
  0x4b   : > { %v1893_v57 = vcombine.low %v579_v20, %v589_v53  ;;  %v406_v34 = vrot.slane %v405_v30, 4  ;;  %v416_v61 = vrot.slane %v415_v16, 4  ;;  %v602_v6 = vrot.slane %v600_v51, 5  ;;  %v2571_v30 = vld [vmem:[%s2269_s29 + $0xb4] sm:$0xf] }
  0x4c   : > { %v597_v21 = vor.u32 %v596_v45, %v593_v63  ;;  %v606_v59 = vrot.slane %v604_v27, 4  ;;  %v612_v38 = vrot.slane %v610_v56, 5  ;;  %v423_v0 = vshrl.u32 %v2550_v10, 16  ;;  %3156 = vst [vmem:[#allocation10_spill] sm:$0xff] %v2571_v30  ;;  %v2574_v27 = vld [vmem:[%s2269_s29 + $0xb8] sm:$0xf] }
  0x4d   : > { %2087 = vmatmul.mubr.msk.bf16.gmra.mxu1 %vm699_vm3, %v1893_v57  ;;  %v411_v22 = vsel %vm2316_vm4, %v406_v34, %v410_v62  ;;  %v421_v23 = vsel %vm2316_vm4, %v416_v61, %v420_v37  ;;  %v426_v20 = vshll.u32 %v2550_v10, 16  ;;  %v432_v16 = vshll.u32 %v2557_v50, 16 }
  0x4e   : > { %v1886_v63 = vcombine.low %v411_v22, %v421_v23  ;;  %v598_v51 = vrot.slane %v597_v21, 4  ;;  %v607_v53 = vor.u32 %v606_v59, %v602_v6  ;;  %v425_v45 = vrot.slane %v423_v0, 4 }
  0x4f   : > { %v428_v56 = vrot.slane %v426_v20, 5  ;;  %v434_v57 = vrot.slane %v432_v16, 5  ;;  %v436_v62 = vshrl.u32 %v2557_v50, 16  ;;  %v442_v34 = vshll.u32 %v2560_v1, 16 }
  0x50   : > { %2074 = vmatprep.mubr.msk.bf16.mxu0 %vm699_vm3, %v1886_v63  ;;  %v603_v37 = vsel %vm2316_vm4, %v598_v51, %v602_v6  ;;  %v608_v61 = vrot.slane %v607_v53, 4  ;;  %v615_v22 = vshrl.u32 %v2571_v30, 16  ;;  %v618_v21 = vshll.u32 %v2571_v30, 16 }
  0x51   : > { %v429_v59 = vor.u32 %v428_v56, %v425_v45  ;;  %v438_v0 = vrot.slane %v436_v62, 4  ;;  %v444_v23 = vrot.slane %v442_v34, 5  ;;  %v624_v20 = vshll.u32 %v2574_v27, 16 }
  0x52   : > { %v613_v16 = vsel %vm2316_vm4, %v608_v61, %v612_v38  ;;  %v617_v49 = vrot.slane %v615_v22, 4  ;;  %v620_v63 = vrot.slane %v618_v21, 5  ;;  %v628_v19 = vshrl.u32 %v2574_v27, 16 }
  0x53   : > { %v1894_v6 = vcombine.low %v603_v37, %v613_v16  ;;  %v430_v51 = vrot.slane %v429_v59, 4  ;;  %v439_v53 = vor.u32 %v438_v0, %v434_v57  ;;  %v626_v44 = vrot.slane %v624_v20, 5 }
  0x54   : > { %v621_v58 = vor.u32 %v620_v63, %v617_v49  ;;  %v630_v30 = vrot.slane %v628_v19, 4  ;;  %v634_v45 = vshll.u32 %v2584_v55, 16  ;;  %v1948_v38 = vrot.slane %v2280_v7, 9 }
  0x55   : > { %2090 = vmatprep.mubr.msk.bf16.mxu1 %vm699_vm3, %v1894_v6  ;;  %v435_v62 = vsel %vm2316_vm4, %v430_v51, %v434_v57  ;;  %v440_v34 = vrot.slane %v439_v53, 4  ;;  %v1235_v37 = vrot.slane %v2283_v8, 5  ;;  %v1915_v49 = vcombine.low %v2309_v31, %v2312_v32 }
  0x56   : > { %v622_v19 = vrot.slane %v621_v58, 4  ;;  %v631_v61 = vor.u32 %v630_v30, %v626_v44  ;;  %v636_v22 = vrot.slane %v634_v45, 5  ;;  %v1949_v21 = vrot.slane %v2309_v31, 9 }
  0x57   : > { %v445_v59 = vsel %vm2316_vm4, %v440_v34, %v444_v23  ;;  %v1236_v0 = vsel %vm2593_vm7, %v1948_v38, %v1235_v37  ;;  %v1237_v20 = vrot.slane %v1235_v37, 4  ;;  %v3159_v57 = vrot.slane %v2312_v32, 5 }
  0x58   : > { %v1887_v63 = vcombine.low %v435_v62, %v445_v59  ;;  %v627_v6 = vsel %vm2316_vm4, %v622_v19, %v626_v44  ;;  %v632_v51 = vrot.slane %v631_v61, 4  ;;  %v3161_v30 = vrot.slane %v2286_v9, 5 }
  0x59   : > { %v1244_v16 = vrot.slane %v3159_v57, 4  ;;  %v3160_v58 = vmov %v3159_v57  ;;  %v3162_v53 = vrot.slane %v2323_v43, 5  ;;  %v1916_v38 = vcombine.low %v2352_v11, %v2359_v24 }
  0x5a   : > { %v1243_v31 = vsel %vm2593_vm7, %v1949_v21, %v3160_v58  ;;  %v1239_v23 = vsel %vm2593_vm7, %v1237_v20, %v3161_v30  ;;  %v1950_v44 = vrot.slane %v2352_v11, 9  ;;  %2075 = vmatmul.mubr.msk.bf16.gmra.mxu0 %vm699_vm3, %v1887_v63  ;;  %v637_v32 = vsel %vm2316_vm4, %v632_v51, %v636_v22 }
  0x5b   : > { %v1246_v45 = vsel %vm2593_vm7, %v1244_v16, %v3162_v53  ;;  %v1967_v62 = vcombine.low %v1236_v0, %v1239_v23  ;;  %v1249_v34 = vrot.slane %v2359_v24, 5  ;;  %v1895_v37 = vcombine.low %v627_v6, %v637_v32 }
  0x5c   : > { %v1968_v9 = vcombine.low %v1243_v31, %v1246_v45  ;;  %v1252_v43 = vrot.slane %v2365_v28, 5  ;;  %v1256_v11 = vrot.slane %v2400_v15, 5  ;;  %v1951_v33 = vrot.slane %v2394_v4, 9 }
  0x5d   : > { %2134 = vmatprep.mubr.msk.bf16.mxu0 %vm699_vm3, %v1967_v62  ;;  %v1250_v19 = vsel %vm2593_vm7, %v1950_v44, %v1249_v34  ;;  %v1251_v61 = vrot.slane %v1249_v34, 4  ;;  %2091 = vmatmul.mubr.msk.bf16.gmra.mxu1 %vm699_vm3, %v1895_v37  ;;  %v1952_v22 = vrot.slane %v2437_v2, 9  ;;  %v1263_v21 = vrot.slane %v2442_v13, 5 }
  0x5e   : > { %v3163_v24 = vcombine.low %v2280_v7, %v2283_v8  ;;  %v1258_v59 = vrot.slane %v1256_v11, 4  ;;  %v1259_v0 = vrot.slane %v2409_v29, 5  ;;  %v1266_v20 = vrot.slane %v2450_v36, 5 }
  0x5f   : > { %v1253_v28 = vsel %vm2593_vm7, %v1251_v61, %v1252_v43  ;;  %v1265_v16 = vrot.slane %v1263_v21, 4  ;;  %v1270_v63 = vrot.slane %v2479_v26, 5  ;;  %v1257_v6 = vsel %vm2593_vm7, %v1951_v33, %v1256_v11 }
  0x60   : > { %2098 = vmatprep.mubr.msk.bf16.mxu1 %vm699_vm3, %v3163_v24  ;;  %v1969_v57 = vcombine.low %v1250_v19, %v1253_v28  ;;  %v1264_v7 = vsel %vm2593_vm7, %v1952_v22, %v1263_v21  ;;  %v1277_v8 = vrot.slane %v2519_v5, 5  ;;  %v1260_v51 = vsel %vm2593_vm7, %v1258_v59, %v1259_v0 }
  0x61   : > { %v1267_v29 = vsel %vm2593_vm7, %v1265_v16, %v1266_v20  ;;  %v1953_v36 = vrot.slane %v2474_v12, 9  ;;  %v1273_v58 = vrot.slane %v2488_v47, 5  ;;  %v1272_v31 = vrot.slane %v1270_v63, 4 }
  0x62   : > { %2135 = vmatmul.mubr.msk.bf16.vlgmr.msra.gmra.mxu0 %vm699_vm3, %v1968_v9  ;;  %v1954_v30 = vrot.slane %v2509_v42, 9  ;;  %v1279_v23 = vrot.slane %v1277_v8, 4  ;;  %v1280_v53 = vrot.slane %v2525_v35, 5  ;;  %v1970_v45 = vcombine.low %v1257_v6, %v1260_v51 }
  0x63   : > { %2138 = vmatprep.mubr.msk.bf16.mxu0 %vm699_vm3, %v1969_v57  ;;  %v1971_v44 = vcombine.low %v1264_v7, %v1267_v29  ;;  %v1271_v32 = vsel %vm2593_vm7, %v1953_v36, %v1270_v63  ;;  %v1274_v47 = vsel %vm2593_vm7, %v1272_v31, %v1273_v58  ;;  %v1284_v35 = vrot.slane %v2557_v50, 5  ;;  %v3164_v29 = vld [vmem:[#allocation8_spill] sm:$0xff]  ;;  %v3165_v36 = vld [vmem:[#allocation7_spill] sm:$0xff] }
  0x64   : > { %v1278_v62 = vsel %vm2593_vm7, %v1954_v30, %v1277_v8  ;;  %v1281_v9 = vsel %vm2593_vm7, %v1279_v23, %v1280_v53  ;;  %v1956_v34 = vrot.slane %v2293_v14, 9  ;;  %v1291_v37 = vrot.slane %v2298_v17, 5  ;;  %v3166_v53 = vld [vmem:[#allocation9_spill] sm:$0xff] }
  0x65   : > { %2099 = vmatmul.mubr.msk.bf16.vlgmr.msra.gmra.mxu1 %vm699_vm3, %v1915_v49  ;;  %v1294_v49 = vrot.slane %v2301_v18, 5  ;;  %v1917_v43 = vcombine.low %v2394_v4, %v2400_v15  ;;  %v1918_v19 = vcombine.low %v2437_v2, %v2442_v13  ;;  %v1919_v61 = vcombine.low %v2474_v12, %v2479_v26 }
  0x66   : > { %2102 = vmatprep.mubr.msk.bf16.mxu1 %vm699_vm3, %v1916_v38  ;;  %v1955_v38 = vrot.slane %v2550_v10, 9  ;;  %v1920_v11 = vcombine.low %v2509_v42, %v2519_v5  ;;  %v1972_v18 = vcombine.low %v1271_v32, %v1274_v47  ;;  %v1973_v33 = vcombine.low %v1278_v62, %v1281_v9 }
  0x67   : > { %v1287_v22 = vrot.slane %v2560_v1, 5  ;;  %v1925_v21 = vcombine.low %v2416_v40, %v2423_v46  ;;  %v1286_v4 = vrot.slane %v1284_v35, 4  ;;  %v1959_v15 = vrot.slane %v2416_v40, 9 }
  0x68   : > { %v1312_v2 = vrot.slane %v2423_v46, 5  ;;  %v1315_v13 = vrot.slane %v2429_v54, 5  ;;  %v1285_v12 = vsel %vm2593_vm7, %v1955_v38, %v1284_v35  ;;  %v1292_v26 = vsel %vm2593_vm7, %v1956_v34, %v1291_v37 }
  0x69   : > { %v1293_v42 = vrot.slane %v1291_v37, 4  ;;  %v1926_v1 = vcombine.low %v2455_v41, %v2460_v48  ;;  %v1960_v28 = vrot.slane %v2455_v41, 9  ;;  %v1319_v54 = vrot.slane %v2460_v48, 5 }
  0x6a   : > { %2139 = vmatmul.mubr.msk.bf16.gmra.mxu0 %vm699_vm3, %v1970_v45  ;;  %v2705_v5 = vsel %vm2593_vm7, %v1959_v15, %v1312_v2  ;;  %v1314_v24 = vrot.slane %v1312_v2, 4  ;;  %v1298_v59 = vrot.slane %v2338_v60, 5  ;;  %v1322_v0 = vrot.slane %v2469_v3, 5  ;;  %v3169_v2 = vld [vmem:[#allocation2_spill] sm:$0xff] }
  0x6b   : > { %2142 = vmatprep.mubr.msk.bf16.mxu0 %vm699_vm3, %v1971_v44  ;;  %v1927_v20 = vcombine.low %v2493_v52, %v2500_v25  ;;  %v1961_v57 = vrot.slane %v2493_v52, 9  ;;  %v1288_v16 = vsel %vm2593_vm7, %v1286_v4, %v1287_v22  ;;  %v1320_v6 = vsel %vm2593_vm7, %v1960_v28, %v1319_v54  ;;  %v3170_v28 = vld [vmem:[#allocation3_spill] sm:$0xff] }
  0x6c   : > { %v1316_v63 = vsel %vm2593_vm7, %v1314_v24, %v1315_v13  ;;  %v1321_v7 = vrot.slane %v1319_v54, 4  ;;  %v1326_v51 = vrot.slane %v2500_v25, 5  ;;  %v1329_v3 = vrot.slane %v2506_v39, 5  ;;  %v3167_v39 = vld [vmem:[#allocation10_spill] sm:$0xff]  ;;  %v3171_v54 = vld [vmem:[#allocation4_spill] sm:$0xff] }
  0x6d   : > { %2103 = vmatmul.mubr.msk.bf16.gmra.mxu1 %vm699_vm3, %v1917_v43  ;;  %v1978_v8 = vcombine.low %v2705_v5, %v1316_v63  ;;  %v1928_v58 = vcombine.low %v3165_v36, %v3164_v29  ;;  %v1962_v30 = vrot.slane %v3165_v36, 9  ;;  %v1333_v23 = vrot.slane %v3164_v29, 5  ;;  %v3168_v43 = vld [vmem:[#allocation5_spill] sm:$0xff]  ;;  %v3172_v63 = vld [vmem:[#allocation6_spill] sm:$0xff] }
  0x6e   : > { %2106 = vmatprep.mubr.msk.bf16.mxu1 %vm699_vm3, %v1918_v19  ;;  %v1323_v31 = vsel %vm2593_vm7, %v1321_v7, %v1322_v0  ;;  %v1336_v45 = vrot.slane %v3166_v53, 5  ;;  %v1327_v32 = vsel %vm2593_vm7, %v1961_v57, %v1326_v51  ;;  %v1328_v47 = vrot.slane %v1326_v51, 4 }
  0x6f   : > { %v1979_v44 = vcombine.low %v1320_v6, %v1323_v31  ;;  %v1929_v62 = vcombine.low %v3167_v39, %v2574_v27  ;;  %v1334_v9 = vsel %vm2593_vm7, %v1962_v30, %v1333_v23  ;;  %v1335_v35 = vrot.slane %v1333_v23, 4 }
  0x70   : > { %v1963_v38 = vrot.slane %v3167_v39, 9  ;;  %v1340_v34 = vrot.slane %v2574_v27, 5  ;;  %v1295_v37 = vsel %vm2593_vm7, %v1293_v42, %v1294_v49  ;;  %v1305_v19 = vrot.slane %v3168_v43, 5 }
  0x71   : > { %v1343_v22 = vrot.slane %v2584_v55, 5  ;;  %v1337_v4 = vsel %vm2593_vm7, %v1335_v35, %v1336_v45  ;;  %v1974_v49 = vcombine.low %v1285_v12, %v1288_v16  ;;  %v1957_v13 = vrot.slane %v3169_v2, 9 }
  0x72   : > { %2143 = vmatmul.mubr.msk.bf16.gmra.mxu0 %vm699_vm3, %v1972_v18  ;;  %v1330_v18 = vsel %vm2593_vm7, %v1328_v47, %v1329_v3  ;;  %v1341_v15 = vsel %vm2593_vm7, %v1963_v38, %v1340_v34  ;;  %v1342_v27 = vrot.slane %v1340_v34, 4  ;;  %v1981_v42 = vcombine.low %v1334_v9, %v1337_v4 }
  0x73   : > { %2146 = vmatprep.mubr.msk.bf16.mxu0 %vm699_vm3, %v1973_v33  ;;  %v1980_v33 = vcombine.low %v1327_v32, %v1330_v18  ;;  %v1975_v5 = vcombine.low %v1292_v26, %v1295_v37  ;;  %v1300_v24 = vrot.slane %v1298_v59, 4  ;;  %v1301_v55 = vrot.slane %v3170_v28, 5 }
  0x74   : > { %v1958_v0 = vrot.slane %v3171_v54, 9  ;;  %v1307_v57 = vrot.slane %v1305_v19, 4  ;;  %v1308_v6 = vrot.slane %v3172_v63, 5  ;;  %v1922_v12 = vcombine.low %v2293_v14, %v2298_v17 }
  0x75   : > { %2107 = vmatmul.mubr.msk.bf16.gmra.mxu1 %vm699_vm3, %v1919_v61  ;;  %v1344_v61 = vsel %vm2593_vm7, %v1342_v27, %v1343_v22  ;;  %v1299_v26 = vsel %vm2593_vm7, %v1957_v13, %v1298_v59  ;;  %v1302_v16 = vsel %vm2593_vm7, %v1300_v24, %v1301_v55  ;;  %v1923_v17 = vcombine.low %v3169_v2, %v2338_v60 }
  0x76   : > { %2110 = vmatprep.mubr.msk.bf16.mxu1 %vm699_vm3, %v1920_v11  ;;  %v1982_v7 = vcombine.low %v1341_v15, %v1344_v61  ;;  %v1921_v11 = vcombine.low %v2550_v10, %v2557_v50  ;;  %v1306_v51 = vsel %vm2593_vm7, %v1958_v0, %v1305_v19  ;;  %v1309_v3 = vsel %vm2593_vm7, %v1307_v57, %v1308_v6 }
  0x77   : > { %v1976_v10 = vcombine.low %v1299_v26, %v1302_v16  ;;  %v1977_v14 = vcombine.low %v1306_v51, %v1309_v3  ;;  %v1924_v50 = vcombine.low %v3171_v54, %v3168_v43 }
  0x7a   : > { %2147 = vmatmul.mubr.msk.bf16.gmra.mxu0 %vm699_vm3, %v1974_v49 }
  0x7b   : > { %2150 = vmatprep.mubr.msk.bf16.mxu0 %vm699_vm3, %v1975_v5 }
  0x7d   : > { %2111 = vmatmul.mubr.msk.bf16.gmra.mxu1 %vm699_vm3, %v1921_v11 }
  0x7e   : > { %2114 = vmatprep.mubr.msk.bf16.mxu1 %vm699_vm3, %v1922_v12 }
  0x82   : > { %2151 = vmatmul.mubr.msk.bf16.gmra.mxu0 %vm699_vm3, %v1976_v10 }
  0x83   : > { %2154 = vmatprep.mubr.msk.bf16.mxu0 %vm699_vm3, %v1977_v14 }
  0x85   : > { %2115 = vmatmul.mubr.msk.bf16.gmra.mxu1 %vm699_vm3, %v1923_v17 }
  0x86   : > { %2118 = vmatprep.mubr.msk.bf16.mxu1 %vm699_vm3, %v1924_v50 }
  0x8a   : > { %2155 = vmatmul.mubr.msk.bf16.gmra.mxu0 %vm699_vm3, %v1978_v8 }
  0x8b   : > { %2158 = vmatprep.mubr.msk.bf16.mxu0 %vm699_vm3, %v1979_v44 }
  0x8d   : > { %2119 = vmatmul.mubr.msk.bf16.gmra.mxu1 %vm699_vm3, %v1925_v21 }
  0x8e   : > { %2122 = vmatprep.mubr.msk.bf16.mxu1 %vm699_vm3, %v1926_v1 }
  0x92   : > { %2159 = vmatmul.mubr.msk.bf16.gmra.mxu0 %vm699_vm3, %v1980_v33 }
  0x93   : > { %2162 = vmatprep.mubr.msk.bf16.mxu0 %vm699_vm3, %v1981_v42 }
  0x95   : > { %2123 = vmatmul.mubr.msk.bf16.gmra.mxu1 %vm699_vm3, %v1927_v20 }
  0x96   : > { %2126 = vmatprep.mubr.msk.bf16.mxu1 %vm699_vm3, %v1928_v58 }
  0x9a   : > { %2163 = vmatmul.mubr.msk.bf16.gmra.mxu0 %vm699_vm3, %v1982_v7 }
  0x9d   : > { %2127 = vmatmul.mubr.msk.bf16.gmra.mxu1 %vm699_vm3, %v1929_v62 }
  0xe6   : > { %v2064_v60 = vpop.f32.mrf.mxu0 }
  0xe8   : > { %v786_v46 = vpop.f32.mrf.mxu0 }
  0xea   : > { %v2065_v48 = vpop.f32.mrf.mxu0 }
  0xeb   : > { %v2802_v40 = vpop.f32.mrf.mxu1 }
  0xec   : > { %v789_v21 = vpop.f32.mrf.mxu0 }
  0xed   : > { %v2804_v41 = vpop.f32.mrf.mxu1 }
  0xef   : > { %v2806_v56 = vpop.f32.mrf.mxu1 }
  0xf1   : > { %v2808_v1 = vpop.f32.mrf.mxu1 }
  0xf7   : > { %v2068_v52 = vpop.f32.mrf.mxu0 }
  0xf9   : > { %v802_v59 = vpop.f32.mrf.mxu0 }
  0xfb   : > { %v2810_v25 = vpop.f32.mrf.mxu1  ;;  %v2069_v8 = vpop.f32.mrf.mxu0 }
  0xfd   : > { %v2812_v20 = vpop.f32.mrf.mxu1  ;;  %v805_v36 = vpop.f32.mrf.mxu0 }
  0xff   : > { %v2814_v29 = vpop.f32.mrf.mxu1 }
 0x101   : > { %v2816_v58 = vpop.f32.mrf.mxu1 }
 0x108   : > { %v2818_v31 = vpop.f32.mrf.mxu0 }
 0x10a   : > { %v2822_v23 = vpop.f32.mrf.mxu0 }
 0x10c   : > { %v2826_v45 = vpop.f32.mrf.mxu0 }
 0x10d   : > { %v2820_v30 = vpop.f32.mrf.mxu1 }
 0x10e   : > { %v2830_v32 = vpop.f32.mrf.mxu0 }
 0x10f   : > { %v2824_v53 = vpop.f32.mrf.mxu1 }
 0x111   : > { %v2828_v44 = vpop.f32.mrf.mxu1 }
 0x113   : > { %v2832_v47 = vpop.f32.mrf.mxu1 }
 0x11a   : > { %v2835_v39 = vpop.f32.mrf.mxu0 }
 0x11c   : > { %v2837_v62 = vpop.f32.mrf.mxu0 }
 0x11d   : > { %v2839_v9 = vpop.f32.mrf.mxu1 }
 0x11e   : > { %v2841_v35 = vpop.f32.mrf.mxu0 }
 0x11f   : > { %v2843_v38 = vpop.f32.mrf.mxu1 }
 0x120   : > { %v2845_v34 = vpop.f32.mrf.mxu0 }
 0x121   : > { %v2847_v37 = vpop.f32.mrf.mxu1 }
 0x122   : > { %v2136_v43 = vpop.f32.mrf.mxu0 }
 0x123   : > { %v2849_v19 = vpop.f32.mrf.mxu1 }
 0x124   : > { %v1491_v18 = vpop.f32.mrf.mxu0 }
 0x125   : > { %v2100_v22 = vpop.f32.mrf.mxu1 }
 0x126   : > { %v1096_v33 = vadd.f32 %v2100_v22, %v2064_v60  ;;  %v2137_v4 = vpop.f32.mrf.mxu0 }
 0x127   : > { %v1087_v15 = vpop.f32.mrf.mxu1 }
 0x128   : > { %v2856_v27 = vadd.f32 %v2136_v43, %v1096_v33  ;;  %v1088_v49 = vadd.f32 %v1087_v15, %v786_v46  ;;  %v1494_v2 = vpop.f32.mrf.mxu0 }
 0x129   : > { %v2101_v13 = vpop.f32.mrf.mxu1 }
 0x12a   : > { %1652 = vst [vmem:[%s2854_s12 + $0x10] sm:$0xff] %v2856_v27  ;;  %v2860_v42 = vadd.f32 %v1491_v18, %v1088_v49  ;;  %v1099_v5 = vadd.f32 %v2101_v13, %v2065_v48  ;;  %v2140_v24 = vpop.f32.mrf.mxu0 }
 0x12b   : > { %v1090_v28 = vpop.f32.mrf.mxu1 }
 0x12c   : > { %1650 = vst [vmem:[%s2854_s12] sm:$0xff] %v2860_v42  ;;  %v2864_v55 = vadd.f32 %v2137_v4, %v1099_v5  ;;  %v1091_v61 = vadd.f32 %v1090_v28, %v789_v21  ;;  %v1507_v54 = vpop.f32.mrf.mxu0 }
 0x12d   : > { %v2104_v0 = vpop.f32.mrf.mxu1 }
 0x12e   : > { %1653 = vst [vmem:[%s2854_s12 + $0x18] sm:$0xff] %v2864_v55  ;;  %v2868_v57 = vadd.f32 %v1494_v2, %v1091_v61  ;;  %v1112_v63 = vadd.f32 %v2104_v0, %v2068_v52  ;;  %v2141_v6 = vpop.f32.mrf.mxu0 }
 0x12f   : > { %v1103_v7 = vpop.f32.mrf.mxu1 }
 0x130   : > { %1651 = vst [vmem:[%s2854_s12 + $0x8] sm:$0xff] %v2868_v57  ;;  %v2872_v11 = vadd.f32 %v2140_v24, %v1112_v63  ;;  %v1104_v12 = vadd.f32 %v1103_v7, %v802_v59  ;;  %v1510_v26 = vpop.f32.mrf.mxu0 }
 0x131   : > { %v2105_v16 = vpop.f32.mrf.mxu1 }
 0x132   : > { %1656 = vst [vmem:[%s2854_s12 + $0x30] sm:$0xff] %v2872_v11  ;;  %v2876_v51 = vadd.f32 %v1507_v54, %v1104_v12  ;;  %v1115_v3 = vadd.f32 %v2105_v16, %v2069_v8  ;;  %v2144_v10 = vpop.f32.mrf.mxu0 }
 0x133   : > { %v1106_v14 = vpop.f32.mrf.mxu1 }
 0x134   : > { %1654 = vst [vmem:[%s2854_s12 + $0x20] sm:$0xff] %v2876_v51  ;;  %v2880_v17 = vadd.f32 %v2141_v6, %v1115_v3  ;;  %v1107_v50 = vadd.f32 %v1106_v14, %v805_v36  ;;  %v1523_v60 = vpop.f32.mrf.mxu0 }
 0x135   : > { %v2108_v46 = vpop.f32.mrf.mxu1 }
 0x136   : > { %1657 = vst [vmem:[%s2854_s12 + $0x38] sm:$0xff] %v2880_v17  ;;  %v2884_v48 = vadd.f32 %v1510_v26, %v1107_v50  ;;  %v1128_v21 = vadd.f32 %v2108_v46, %v2818_v31  ;;  %v2145_v52 = vpop.f32.mrf.mxu0 }
 0x137   : > { %v1119_v59 = vpop.f32.mrf.mxu1 }
 0x138   : > { %1655 = vst [vmem:[%s2854_s12 + $0x28] sm:$0xff] %v2884_v48  ;;  %v2889_v8 = vadd.f32 %v2144_v10, %v1128_v21  ;;  %v1120_v43 = vadd.f32 %v1119_v59, %v2822_v23  ;;  %v1526_v18 = vpop.f32.mrf.mxu0 }
 0x139   : > { %v2109_v36 = vpop.f32.mrf.mxu1 }
 0x13a   : > { %1660 = vst [vmem:[%s2854_s12 + $0x50] sm:$0xff] %v2889_v8  ;;  %v2894_v22 = vadd.f32 %v1523_v60, %v1120_v43  ;;  %v1131_v33 = vadd.f32 %v2109_v36, %v2826_v45  ;;  %v2148_v4 = vpop.f32.mrf.mxu0 }
 0x13b   : > { %v1122_v31 = vpop.f32.mrf.mxu1 }
 0x13c   : > { %1658 = vst [vmem:[%s2854_s12 + $0x40] sm:$0xff] %v2894_v22  ;;  %v2899_v15 = vadd.f32 %v2145_v52, %v1131_v33  ;;  %v1123_v49 = vadd.f32 %v1122_v31, %v2830_v32  ;;  %v1539_v2 = vpop.f32.mrf.mxu0 }
 0x13d   : > { %v2112_v23 = vpop.f32.mrf.mxu1 }
 0x13e   : > { %1661 = vst [vmem:[%s2854_s12 + $0x58] sm:$0xff] %v2899_v15  ;;  %v2904_v13 = vadd.f32 %v1526_v18, %v1123_v49  ;;  %v1144_v5 = vadd.f32 %v2112_v23, %v2835_v39  ;;  %v2149_v24 = vpop.f32.mrf.mxu0 }
 0x13f   : > { %v1135_v45 = vpop.f32.mrf.mxu1 }
 0x140   : > { %1659 = vst [vmem:[%s2854_s12 + $0x48] sm:$0xff] %v2904_v13  ;;  %v2909_v28 = vadd.f32 %v2148_v4, %v1144_v5  ;;  %v1136_v61 = vadd.f32 %v1135_v45, %v2837_v62  ;;  %v1542_v54 = vpop.f32.mrf.mxu0 }
 0x141   : > { %v2113_v32 = vpop.f32.mrf.mxu1 }
 0x142   : > { %1664 = vst [vmem:[%s2854_s12 + $0x70] sm:$0xff] %v2909_v28  ;;  %v2914_v0 = vadd.f32 %v1539_v2, %v1136_v61  ;;  %v1147_v63 = vadd.f32 %v2113_v32, %v2841_v35  ;;  %v2152_v6 = vpop.f32.mrf.mxu0 }
 0x143   : > { %v1138_v39 = vpop.f32.mrf.mxu1 }
 0x144   : > { %1662 = vst [vmem:[%s2854_s12 + $0x60] sm:$0xff] %v2914_v0  ;;  %v2919_v7 = vadd.f32 %v2149_v24, %v1147_v63  ;;  %v1139_v12 = vadd.f32 %v1138_v39, %v2845_v34  ;;  %v1555_v26 = vpop.f32.mrf.mxu0 }
 0x145   : > { %v2116_v62 = vpop.f32.mrf.mxu1 }
 0x146   : > { %1665 = vst [vmem:[%s2854_s12 + $0x78] sm:$0xff] %v2919_v7  ;;  %v2924_v16 = vadd.f32 %v1542_v54, %v1139_v12  ;;  %v1160_v3 = vadd.f32 %v2116_v62, %v2802_v40  ;;  %v2153_v10 = vpop.f32.mrf.mxu0 }
 0x147   : > { %v1151_v35 = vpop.f32.mrf.mxu1 }
 0x148   : > { %1663 = vst [vmem:[%s2854_s12 + $0x68] sm:$0xff] %v2924_v16  ;;  %v2929_v14 = vadd.f32 %v2152_v6, %v1160_v3  ;;  %v1152_v50 = vadd.f32 %v1151_v35, %v2804_v41  ;;  %v1558_v60 = vpop.f32.mrf.mxu0 }
 0x149   : > { %v2117_v34 = vpop.f32.mrf.mxu1 }
 0x14a   : > { %1668 = vst [vmem:[%s2854_s12 + $0x90] sm:$0xff] %v2929_v14  ;;  %v2934_v46 = vadd.f32 %v1555_v26, %v1152_v50  ;;  %v1163_v21 = vadd.f32 %v2117_v34, %v2806_v56  ;;  %v2156_v52 = vpop.f32.mrf.mxu0 }
 0x14b   : > { %v1154_v40 = vpop.f32.mrf.mxu1 }
 0x14c   : > { %1666 = vst [vmem:[%s2854_s12 + $0x80] sm:$0xff] %v2934_v46  ;;  %v2939_v59 = vadd.f32 %v2153_v10, %v1163_v21  ;;  %v1155_v43 = vadd.f32 %v1154_v40, %v2808_v1  ;;  %v1571_v18 = vpop.f32.mrf.mxu0 }
 0x14d   : > { %v2120_v41 = vpop.f32.mrf.mxu1 }
 0x14e   : > { %1669 = vst [vmem:[%s2854_s12 + $0x98] sm:$0xff] %v2939_v59  ;;  %v2944_v36 = vadd.f32 %v1558_v60, %v1155_v43  ;;  %v1176_v33 = vadd.f32 %v2120_v41, %v2810_v25  ;;  %v2157_v4 = vpop.f32.mrf.mxu0 }
 0x14f   : > { %v1167_v56 = vpop.f32.mrf.mxu1 }
 0x150   : > { %1667 = vst [vmem:[%s2854_s12 + $0x88] sm:$0xff] %v2944_v36  ;;  %v2949_v31 = vadd.f32 %v2156_v52, %v1176_v33  ;;  %v1168_v49 = vadd.f32 %v1167_v56, %v2812_v20  ;;  %v1574_v2 = vpop.f32.mrf.mxu0 }
 0x151   : > { %v2121_v1 = vpop.f32.mrf.mxu1 }
 0x152   : > { %1672 = vst [vmem:[%s2854_s12 + $0xb0] sm:$0xff] %v2949_v31  ;;  %v2954_v23 = vadd.f32 %v1571_v18, %v1168_v49  ;;  %v1179_v5 = vadd.f32 %v2121_v1, %v2814_v29  ;;  %v2160_v24 = vpop.f32.mrf.mxu0 }
 0x153   : > { %v1170_v25 = vpop.f32.mrf.mxu1 }
 0x154   : > { %1670 = vst [vmem:[%s2854_s12 + $0xa0] sm:$0xff] %v2954_v23  ;;  %v2959_v45 = vadd.f32 %v2157_v4, %v1179_v5  ;;  %v1171_v61 = vadd.f32 %v1170_v25, %v2816_v58  ;;  %v1587_v54 = vpop.f32.mrf.mxu0 }
 0x155   : > { %v2124_v20 = vpop.f32.mrf.mxu1 }
 0x156   : > { %1673 = vst [vmem:[%s2854_s12 + $0xb8] sm:$0xff] %v2959_v45  ;;  %v2964_v32 = vadd.f32 %v1574_v2, %v1171_v61  ;;  %v1192_v63 = vadd.f32 %v2124_v20, %v2820_v30  ;;  %v2161_v6 = vpop.f32.mrf.mxu0 }
 0x157   : > { %v1183_v29 = vpop.f32.mrf.mxu1 }
 0x158   : > { %1671 = vst [vmem:[%s2854_s12 + $0xa8] sm:$0xff] %v2964_v32  ;;  %v2969_v39 = vadd.f32 %v2160_v24, %v1192_v63  ;;  %v1184_v12 = vadd.f32 %v1183_v29, %v2824_v53  ;;  %v1590_v26 = vpop.f32.mrf.mxu0 }
 0x159   : > { %v2125_v58 = vpop.f32.mrf.mxu1 }
 0x15a   : > { %1676 = vst [vmem:[%s2854_s12 + $0xd0] sm:$0xff] %v2969_v39  ;;  %v2974_v62 = vadd.f32 %v1587_v54, %v1184_v12  ;;  %v1195_v3 = vadd.f32 %v2125_v58, %v2828_v44  ;;  %v2164_v10 = vpop.f32.mrf.mxu0 }
 0x15b   : > { %v1186_v30 = vpop.f32.mrf.mxu1 }
 0x15c   : > { %1674 = vst [vmem:[%s2854_s12 + $0xc0] sm:$0xff] %v2974_v62  ;;  %v2979_v35 = vadd.f32 %v2161_v6, %v1195_v3  ;;  %v1187_v50 = vadd.f32 %v1186_v30, %v2832_v47  ;;  %v1603_v60 = vpop.f32.mrf.mxu0 }
 0x15d   : > { %v2128_v53 = vpop.f32.mrf.mxu1 }
 0x15e   : > { %1677 = vst [vmem:[%s2854_s12 + $0xd8] sm:$0xff] %v2979_v35  ;;  %v2984_v34 = vadd.f32 %v1590_v26, %v1187_v50  ;;  %v1208_v21 = vadd.f32 %v2128_v53, %v2839_v9  ;;  %v2165_v47 = vpop.f32.mrf.mxu0 }
 0x15f   : > { %v1199_v44 = vpop.f32.mrf.mxu1 }
 0x160   : > { %1675 = vst [vmem:[%s2854_s12 + $0xc8] sm:$0xff] %v2984_v34  ;;  %v2989_v52 = vadd.f32 %v2164_v10, %v1208_v21  ;;  %v1200_v40 = vadd.f32 %v1199_v44, %v2843_v38  ;;  %v1606_v56 = vpop.f32.mrf.mxu0 }
 0x161   : > { %v2129_v43 = vpop.f32.mrf.mxu1 }
 0x162   : > { %1680 = vst [vmem:[%s2854_s12 + $0xf0] sm:$0xff] %v2989_v52  ;;  %v2994_v18 = vadd.f32 %v1603_v60, %v1200_v40  ;;  %v1211_v41 = vadd.f32 %v2129_v43, %v2847_v37 }
 0x163   : > { %v1202_v33 = vpop.f32.mrf.mxu1 }
 0x164   : > { %1678 = vst [vmem:[%s2854_s12 + $0xe0] sm:$0xff] %v2994_v18  ;;  %v2999_v9 = vadd.f32 %v2165_v47, %v1211_v41  ;;  %v1203_v4 = vadd.f32 %v1202_v33, %v2849_v19  ;;  %1685 = sbr.rel (%p2001_p5) target bundleno = 363 (0x16b), region = 32 }
 0x166   : > { %1681 = vst [vmem:[%s2854_s12 + $0xf8] sm:$0xff] %v2999_v9  ;;  %v3004_v49 = vadd.f32 %v1606_v56, %v1203_v4 }
 0x168   : > { %1679 = vst [vmem:[%s2854_s12 + $0xe8] sm:$0xff] %v3004_v49 }
 0x169   : > { %v2214_v38 = vmov 0.0  }
 0x16a   : > { %1686 = vst [vmem:[%s3129_s3] sm:$0x1] %v2214_v38  ;;  %1687 = vst [vmem:[%s3130_s4] sm:$0x1] %v2214_v38 }
 0x16b PF: > { %v1689_v37 = vadd.f32 %v2868_v57, %v2860_v42  ;;  %v1729_v1 = vmul.f32 %v2860_v42, %v2860_v42  ;;  %v1730_v5 = vmul.f32 %v2868_v57, %v2868_v57  ;;  %v1731_v25 = vmul.f32 %v2856_v27, %v2856_v27 }
 0x16c   : > { %v1732_v54 = vmul.f32 %v2864_v55, %v2864_v55  ;;  %v1733_v6 = vmul.f32 %v2876_v51, %v2876_v51  ;;  %v1734_v57 = vmul.f32 %v2884_v48, %v2884_v48  ;;  %v1735_v26 = vmul.f32 %v2872_v11, %v2872_v11 }
 0x16d   : > { %v1690_v19 = vadd.f32 %v1689_v37, %v2856_v27  ;;  %v1761_v20 = vadd.f32 %v1730_v5, %v1729_v1  ;;  %v1736_v3 = vmul.f32 %v2880_v17, %v2880_v17  ;;  %v1737_v30 = vmul.f32 %v2894_v22, %v2894_v22 }
 0x16e   : > { %v1738_v53 = vmul.f32 %v2904_v13, %v2904_v13  ;;  %v1739_v21 = vmul.f32 %v2889_v8, %v2889_v8  ;;  %v1740_v40 = vmul.f32 %v2899_v15, %v2899_v15  ;;  %v1741_v47 = vmul.f32 %v2914_v0, %v2914_v0 }
 0x16f   : > { %v1691_v2 = vadd.f32 %v1690_v19, %v2864_v55  ;;  %v1762_v42 = vadd.f32 %v1761_v20, %v1731_v25  ;;  %v1742_v33 = vmul.f32 %v2924_v16, %v2924_v16  ;;  %v1743_v56 = vmul.f32 %v2909_v28, %v2909_v28 }
 0x170   : > { %v1744_v37 = vmul.f32 %v2919_v7, %v2919_v7  ;;  %v1746_v5 = vmul.f32 %v2944_v36, %v2944_v36  ;;  %v1747_v25 = vmul.f32 %v2929_v14, %v2929_v14 }
 0x171   : > { %v1692_v24 = vadd.f32 %v1691_v2, %v2876_v51  ;;  %v1763_v12 = vadd.f32 %v1762_v42, %v1732_v54  ;;  %v1745_v2 = vmul.f32 %v2934_v46, %v2934_v46  ;;  %v1748_v54 = vmul.f32 %v2939_v59, %v2939_v59 }
 0x172   : > { %v1750_v42 = vmul.f32 %v2964_v32, %v2964_v32 }
 0x173   : > { %v1693_v61 = vadd.f32 %v1692_v24, %v2884_v48  ;;  %v1764_v58 = vadd.f32 %v1763_v12, %v1733_v6 }
 0x175   : > { %v1694_v63 = vadd.f32 %v1693_v61, %v2872_v11  ;;  %v1765_v10 = vadd.f32 %v1764_v58, %v1734_v57  ;;  %v1751_v57 = vmul.f32 %v2949_v31, %v2949_v31  ;;  %v1753_v58 = vmul.f32 %v2974_v62, %v2974_v62 }
 0x177   : > { %v1695_v29 = vadd.f32 %v1694_v63, %v2880_v17  ;;  %v1766_v50 = vadd.f32 %v1765_v10, %v1735_v26  ;;  %v1749_v63 = vmul.f32 %v2954_v23, %v2954_v23 }
 0x179   : > { %v1696_v27 = vadd.f32 %v1695_v29, %v2894_v22  ;;  %v1767_v60 = vadd.f32 %v1766_v50, %v1736_v3  ;;  %v1754_v3 = vmul.f32 %v2984_v34, %v2984_v34  ;;  %v1756_v50 = vmul.f32 %v2979_v35, %v2979_v35 }
 0x17b   : > { %v1697_v55 = vadd.f32 %v1696_v27, %v2904_v13  ;;  %v1768_v44 = vadd.f32 %v1767_v60, %v1737_v30  ;;  %v1752_v27 = vmul.f32 %v2959_v45, %v2959_v45 }
 0x17d   : > { %v1698_v51 = vadd.f32 %v1697_v55, %v2889_v8  ;;  %v1769_v43 = vadd.f32 %v1768_v44, %v1738_v53  ;;  %v1757_v53 = vmul.f32 %v2994_v18, %v2994_v18  ;;  %v1759_v44 = vmul.f32 %v2989_v52, %v2989_v52 }
 0x17f   : > { %v1699_v48 = vadd.f32 %v1698_v51, %v2899_v15  ;;  %v1770_v41 = vadd.f32 %v1769_v43, %v1739_v21  ;;  %v1755_v51 = vmul.f32 %v2969_v39, %v2969_v39 }
 0x181   : > { %v1700_v11 = vadd.f32 %v1699_v48, %v2914_v0  ;;  %v1771_v4 = vadd.f32 %v1770_v41, %v1740_v40 }
 0x183   : > { %v1701_v17 = vadd.f32 %v1700_v11, %v2924_v16  ;;  %v1772_v38 = vadd.f32 %v1771_v4, %v1741_v47  ;;  %v1758_v11 = vmul.f32 %v3004_v49, %v3004_v49 }
 0x185   : > { %v1702_v22 = vadd.f32 %v1701_v17, %v2909_v28  ;;  %v1773_v19 = vadd.f32 %v1772_v38, %v1742_v33 }
 0x187   : > { %v1703_v13 = vadd.f32 %v1702_v22, %v2919_v7  ;;  %v1774_v1 = vadd.f32 %v1773_v19, %v1743_v56 }
 0x189   : > { %v1704_v8 = vadd.f32 %v1703_v13, %v2934_v46  ;;  %v1775_v24 = vadd.f32 %v1774_v1, %v1744_v37 }
 0x18b   : > { %v1705_v15 = vadd.f32 %v1704_v8, %v2944_v36  ;;  %v1776_v61 = vadd.f32 %v1775_v24, %v1745_v2 }
 0x18d   : > { %v1706_v0 = vadd.f32 %v1705_v15, %v2929_v14  ;;  %v1777_v20 = vadd.f32 %v1776_v61, %v1746_v5  ;;  %v1728_v15 = vld [vmem:[%s3130_s4] sm:$0x1] }
 0x18f   : > { %v1707_v16 = vadd.f32 %v1706_v0, %v2939_v59  ;;  %v1778_v6 = vadd.f32 %v1777_v20, %v1747_v25 }
 0x191   : > { %v1708_v28 = vadd.f32 %v1707_v16, %v2954_v23  ;;  %v1779_v29 = vadd.f32 %v1778_v6, %v1748_v54 }
 0x193   : > { %v1709_v7 = vadd.f32 %v1708_v28, %v2964_v32  ;;  %v1780_v12 = vadd.f32 %v1779_v29, %v1749_v63 }
 0x195   : > { %v1710_v46 = vadd.f32 %v1709_v7, %v2949_v31  ;;  %v1781_v26 = vadd.f32 %v1780_v12, %v1750_v42 }
 0x197   : > { %v1711_v36 = vadd.f32 %v1710_v46, %v2959_v45  ;;  %v1782_v55 = vadd.f32 %v1781_v26, %v1751_v57 }
 0x199   : > { %v1712_v14 = vadd.f32 %v1711_v36, %v2974_v62  ;;  %v1783_v10 = vadd.f32 %v1782_v55, %v1752_v27 }
 0x19b   : > { %v1713_v59 = vadd.f32 %v1712_v14, %v2984_v34  ;;  %v1784_v30 = vadd.f32 %v1783_v10, %v1753_v58 }
 0x19d   : > { %v1714_v23 = vadd.f32 %v1713_v59, %v2969_v39  ;;  %v1785_v48 = vadd.f32 %v1784_v30, %v1754_v3 }
 0x19f   : > { %v1715_v32 = vadd.f32 %v1714_v23, %v2979_v35  ;;  %v1786_v60 = vadd.f32 %v1785_v48, %v1755_v51  ;;  %v1760_v35 = vmul.f32 %v2999_v9, %v2999_v9 }
 0x1a1   : > { %v1716_v31 = vadd.f32 %v1715_v32, %v2994_v18  ;;  %v1787_v21 = vadd.f32 %v1786_v60, %v1756_v50 }
 0x1a3   : > { %v1717_v45 = vadd.f32 %v1716_v31, %v3004_v49  ;;  %v1788_v17 = vadd.f32 %v1787_v21, %v1757_v53  ;;  %v1688_v49 = vld [vmem:[%s3129_s3] sm:$0x1] }
 0x1a5   : > { %v1718_v62 = vadd.f32 %v1717_v45, %v2989_v52  ;;  %v1789_v43 = vadd.f32 %v1788_v17, %v1758_v11 }
 0x1a7   : > { %v1719_v34 = vadd.f32 %v1718_v62, %v2999_v9  ;;  %v1790_v47 = vadd.f32 %v1789_v43, %v1759_v44 }
 0x1a9   : > { %v1720_v39 = vrot.slane %v1719_v34, 4  ;;  %v1791_v41 = vadd.f32 %v1790_v47, %v1760_v35 }
 0x1ab   : > { %v1721_v40 = vadd.f32 %v1720_v39, %v1719_v34  ;;  %v1792_v33 = vrot.slane %v1791_v41, 4 }
 0x1ad   : > { %v1722_v22 = vrot.slane %v1721_v40, 2  ;;  %v1793_v8 = vadd.f32 %v1792_v33, %v1791_v41 }
 0x1af   : > { %v1723_v18 = vadd.f32 %v1722_v22, %v1721_v40  ;;  %v1794_v52 = vrot.slane %v1793_v8, 2 }
 0x1b1   : > { %v1724_v13 = vrot.slane %v1723_v18, 1  ;;  %v1795_v9 = vadd.f32 %v1794_v52, %v1793_v8 }
 0x1b3   : > { %v1725_v4 = vadd.f32 %v1724_v13, %v1723_v18  ;;  %v1796_v38 = vrot.slane %v1795_v9, 1 }
 0x1b5   : > { %v1726_v56 = vadd.f32 %v1725_v4, %v1688_v49  ;;  %v1797_v37 = vadd.f32 %v1796_v38, %v1795_v9 }
 0x1b7   : > { %1727 = vst [vmem:[%s3129_s3] sm:$0x1] %v1726_v56  ;;  %v1798_v19 = vadd.f32 %v1797_v37, %v1728_v15 }
 0x1b9   : > { %1799 = vst [vmem:[%s3130_s4] sm:$0x1] %v1798_v19 }
 0x1ba PF: > { %s15_s15 = sadd.s32 1, %s2212_s15  }
 0x1bb   : > { %p12_p6 = scmp.ge.s32.totalorder %s15_s15, 4  }
 0x1bd   :  { %14 = sbr.rel (!%p12_p6) target bundleno = 1 (0x1), region = 80 }

</bundles_post_ra>
